<compile_context>
chip_gen: v6e
topology: v6e:2x2x1
jax: 0.10.0
libtpu: 0.0.40
codegen_flags: <defaults>
</compile_context>

<pallas_src>
import math

import jax
import jax.numpy as jnp
from jax import lax
from jax.experimental import pallas as pl
from jax.experimental.pallas import tpu as pltpu

# ---- deterministic hyper-parameters (module __init__ defaults) ---------------
BOARD_SIZE = 8
INPUT_CHANNELS = 4
BLOCK_SIZE = 2
BLOCK_CHANNELS = 32
POLICY_CHANNELS = 8
VALUE_CHANNELS = 4
VALUE_LAYERS = 256
BN_EPS = 1e-5
_CIN_PAD = 8  # pad input planes 4 -> 8 so im2col chunks stay 8-sublane aligned
# use_se=False: the SE path is structurally disabled in the reference module.

_VMEM = pl.BlockSpec(memory_space=pltpu.MemorySpace.VMEM)
_ANY = pl.BlockSpec(memory_space=pl.ANY)


# ---------------------------- fused network kernel ----------------------------
def _make_network_kernel(num_blocks, board):
    """One kernel = whole forward pass (gridless, everything VMEM-resident)."""

    def kernel(x_ref, masks_ref, selT_ref,
               w_in_ref, s_in_ref, b_in_ref,
               blk_w_ref, blk_s_ref, blk_b_ref,
               w_pv_ref, s_pv_ref, b_pv_ref,
               wz_pol_hbm, b_pol_ref,
               wz_val_hbm, b_val_ref,
               w_win_ref, b_win_ref,
               polT_ref, valT_ref,
               wz_pol_buf, wz_val_buf, dma_sem):
        # Kick off the (large) head-FC weight DMAs immediately so they overlap
        # the residual-tower compute instead of blocking kernel start.
        cp_pol = pltpu.make_async_copy(wz_pol_hbm, wz_pol_buf, dma_sem.at[0])
        cp_val = pltpu.make_async_copy(wz_val_hbm, wz_val_buf, dma_sem.at[1])
        cp_pol.start()
        cp_val.start()

        M = x_ref.shape[1]               # flattened batch*spatial (lane dim)
        masks = masks_ref[...]           # (9, 1, M) border-validity masks
        selT = selT_ref[...]             # (M, N) 0/1 batch selector

        def im2col(a):
            # 3x3 'same' conv patches in (9*C, M) layout, built fully in VMEM
            # from lane rotations (XLU) + border masks (VPU).
            taps = []
            for ky in range(3):
                for kx in range(3):
                    t = ky * 3 + kx
                    d = (ky - 1) * board + (kx - 1)          # flat-index shift
                    if d == 0:
                        taps.append(a)
                    else:
                        taps.append(pltpu.roll(a, (-d) % M, 1) * masks[t])
            return jnp.concatenate(taps, axis=0)             # sublane-aligned

        def conv3_bn_relu(a, w, s, b, residual=None):
            # single merged-K MXU matmul + folded-BN epilogue (+residual) + ReLU
            out = jnp.dot(w, im2col(a), preferred_element_type=jnp.float32)
            out = out * s + b
            if residual is not None:
                out = out + residual
            return jnp.maximum(out, 0.0)

        def head_fc(feat, wz_ref, bias):
            # torch flatten(C,H,W) + Linear, reshape-free:
            #   z[o, m]   = sum_c W[o, c*S + (m mod S)] * feat[c, m]
            #   out[o, n] = sum_{m in batch n} z[o, m] + b[o]   (= z @ selT + b)
            z = wz_ref[0] * feat[0:1, :]
            for c in range(1, feat.shape[0]):
                z = z + wz_ref[c] * feat[c:c + 1, :]
            return jnp.dot(z, selT, preferred_element_type=jnp.float32) + bias

        # ---- residual tower -------------------------------------------------
        h = conv3_bn_relu(x_ref[...], w_in_ref[...], s_in_ref[...], b_in_ref[...])
        for i in range(num_blocks):
            identity = h
            t = conv3_bn_relu(h, blk_w_ref[2 * i], blk_s_ref[2 * i],
                              blk_b_ref[2 * i])                       # conv1+ReLU
            h = conv3_bn_relu(t, blk_w_ref[2 * i + 1], blk_s_ref[2 * i + 1],
                              blk_b_ref[2 * i + 1], residual=identity)  # conv2+id+ReLU

        # ---- policy + value 1x1 ConvBlocks fused into one MXU matmul ---------
        pv = jnp.dot(w_pv_ref[...], h, preferred_element_type=jnp.float32)
        pv = jnp.maximum(pv * s_pv_ref[...] + b_pv_ref[...], 0.0)
        pol = pv[:POLICY_CHANNELS]                                    # (Cp, M)
        val = pv[POLICY_CHANNELS:POLICY_CHANNELS + VALUE_CHANNELS]    # (Cv, M)

        # ---- policy head ------------------------------------------------------
        cp_pol.wait()
        polT_ref[...] = head_fc(pol, wz_pol_buf, b_pol_ref[...])      # (S+1, N)

        # ---- value head -------------------------------------------------------
        cp_val.wait()
        hid = jnp.maximum(head_fc(val, wz_val_buf, b_val_ref[...]), 0.0)
        win = jnp.dot(w_win_ref[...], hid,
                      preferred_element_type=jnp.float32) + b_win_ref[...]
        valT_ref[...] = jnp.tanh(win)                                  # (1, N)

    return kernel


# ---------------------------- host-side helpers --------------------------------
def _shift_masks(n, board):
    """(9, 1, M) validity masks for the 9 conv taps over the flattened M axis."""
    m = jnp.arange(n * board * board)
    y = (m % (board * board)) // board
    x = m % board
    rows = []
    for ky in range(3):
        for kx in range(3):
            valid = ((y + ky - 1 >= 0) & (y + ky - 1 < board) &
                     (x + kx - 1 >= 0) & (x + kx - 1 < board))
            rows.append(valid.astype(jnp.float32))
    return jnp.stack(rows, 0)[:, None, :]


def _batch_selector(n, board):
    """(M, N) 0/1 matrix; column n selects the lanes of batch element n."""
    m = jnp.arange(n * board * board)
    return (m[:, None] // (board * board) == jnp.arange(n)[None, :]).astype(jnp.float32)


# ---------------------------- parameter init -----------------------------------
def _init_conv_block(key, cin, cout, k, cin_pad=None):
    cin_pad = cin if cin_pad is None else cin_pad
    kw, kb, kg, kbt, km, kv = jax.random.split(key, 6)
    fan_out = cout * k * k
    w = jax.random.normal(kw, (cout, cin, k, k), jnp.float32) * math.sqrt(2.0 / fan_out)
    bound = 1.0 / math.sqrt(cin * k * k)
    b = jax.random.uniform(kb, (cout,), jnp.float32, -bound, bound)
    gamma = 1.0 + 0.1 * jax.random.normal(kg, (cout,), jnp.float32)
    beta = 0.1 * jax.random.normal(kbt, (cout,), jnp.float32)
    mean = 0.1 * jax.random.normal(km, (cout,), jnp.float32)
    var = jnp.abs(1.0 + 0.1 * jax.random.normal(kv, (cout,), jnp.float32))
    # fold BN (running stats): y = scale * conv_nobias(x) + bias
    scale = gamma / jnp.sqrt(var + BN_EPS)
    bias = scale * (b - mean) + beta
    if k == 3:
        # (Cout, Cin, ky, kx) -> merged-K (Cout, 9*Cin_pad), tap-major/channel-minor
        w_r = jnp.transpose(w, (0, 2, 3, 1))                 # (Cout, ky, kx, Cin)
        w_r = jnp.pad(w_r, ((0, 0), (0, 0), (0, 0), (0, cin_pad - cin)))
        w_mat = w_r.reshape(cout, 9 * cin_pad)
    else:
        w_mat = w[:, :, 0, 0]                                # (Cout, Cin)
    return {"w": w_mat, "scale": scale[:, None], "bias": bias[:, None],
            "raw": (w, b, gamma, beta, mean, var)}


def _init_fc(key, in_size, out_size, channels=None, spatial=None):
    kw, kb = jax.random.split(key)
    bound = 1.0 / math.sqrt(in_size)
    w = jax.random.uniform(kw, (out_size, in_size), jnp.float32, -bound, bound)
    b = jax.random.uniform(kb, (out_size,), jnp.float32, -bound, bound)
    p = {"raw": (w, b), "b": b[:, None]}
    if channels is not None:
        # bake the torch (C,H,W) flatten order into (C, out, spatial):
        # wz[c, o, s] = W[o, c*spatial + s]
        p["wz"] = jnp.transpose(w.reshape(out_size, channels, spatial), (1, 0, 2))
    else:
        p["w"] = w
    return p


def init_network_params(key, board_size=BOARD_SIZE):
    spatial = board_size * board_size
    keys = jax.random.split(key, 6 + BLOCK_SIZE)
    params = {
        "input_conv": _init_conv_block(keys[0], INPUT_CHANNELS, BLOCK_CHANNELS, 3,
                                       cin_pad=_CIN_PAD),
        "blocks": [],
        "policy_conv": _init_conv_block(keys[1], BLOCK_CHANNELS, POLICY_CHANNELS, 1),
        "policy_fc": _init_fc(keys[2], POLICY_CHANNELS * spatial, spatial + 1,
                              channels=POLICY_CHANNELS, spatial=spatial),
        "value_conv": _init_conv_block(keys[3], BLOCK_CHANNELS, VALUE_CHANNELS, 1),
        "value_fc": _init_fc(keys[4], VALUE_CHANNELS * spatial, VALUE_LAYERS,
                             channels=VALUE_CHANNELS, spatial=spatial),
        "winrate_fc": _init_fc(keys[5], VALUE_LAYERS, 1),
    }
    for s in range(BLOCK_SIZE):
        k1, k2 = jax.random.split(keys[6 + s])
        params["blocks"].append({
            "conv1": _init_conv_block(k1, BLOCK_CHANNELS, BLOCK_CHANNELS, 3),
            "conv2": _init_conv_block(k2, BLOCK_CHANNELS, BLOCK_CHANNELS, 3),
        })
    return params


def prepare_inference_params(params, batch_size, board_size=BOARD_SIZE):
    """One-time fold/stack/tile into the kernel-ready layout (per batch size).

    Keeping this out of the per-call path means the forward does nothing in XLA
    except the tiny input layout transform + the single pallas_call.
    """
    def stack(field):
        return jnp.stack([p[field] for blk in params["blocks"]
                          for p in (blk["conv1"], blk["conv2"])], axis=0)

    pc, vc = params["policy_conv"], params["value_conv"]
    return {
        "masks": _shift_masks(batch_size, board_size),          # (9, 1, M)
        "selT": _batch_selector(batch_size, board_size),        # (M, N)
        "w_in": params["input_conv"]["w"],
        "s_in": params["input_conv"]["scale"],
        "b_in": params["input_conv"]["bias"],
        "blk_w": stack("w"),                                    # (2*nb, C, 9C)
        "blk_s": stack("scale"),                                # (2*nb, C, 1)
        "blk_b": stack("bias"),                                 # (2*nb, C, 1)
        "w_pv": jnp.concatenate([pc["w"], vc["w"]], axis=0),    # (Cp+Cv, C)
        "s_pv": jnp.concatenate([pc["scale"], vc["scale"]], axis=0),
        "b_pv": jnp.concatenate([pc["bias"], vc["bias"]], axis=0),
        "wz_pol": jnp.tile(params["policy_fc"]["wz"], (1, 1, batch_size)),  # (Cp,S+1,M)
        "b_pol": params["policy_fc"]["b"],
        "wz_val": jnp.tile(params["value_fc"]["wz"], (1, 1, batch_size)),   # (Cv,VL,M)
        "b_val": params["value_fc"]["b"],
        "w_win": params["winrate_fc"]["w"],
        "b_win": params["winrate_fc"]["b"],
    }


# ---------------------------- full forward pass ---------------------------------
def network_forward(prep, planes):
    """planes: (N, INPUT_CHANNELS, B, B) f32 -> (policy (N, S+1), value (N, 1))."""
    n, cin, h, w = planes.shape
    assert h == w and cin == INPUT_CHANNELS
    m_total = n * h * w
    spatial = h * w
    num_blocks = prep["blk_w"].shape[0] // 2

    # one-time layout plumbing (tiny): NCHW -> (C, N*H*W), channels padded 4 -> 8
    x0 = jnp.transpose(planes, (1, 0, 2, 3)).reshape(cin, m_total)
    x0 = jnp.pad(x0, ((0, _CIN_PAD - cin), (0, 0)))

    inputs = [x0, prep["masks"], prep["selT"],
              prep["w_in"], prep["s_in"], prep["b_in"],
              prep["blk_w"], prep["blk_s"], prep["blk_b"],
              prep["w_pv"], prep["s_pv"], prep["b_pv"],
              prep["wz_pol"], prep["b_pol"],
              prep["wz_val"], prep["b_val"],
              prep["w_win"], prep["b_win"]]
    # head-FC weights stay in HBM (pl.ANY) and are DMA'd manually inside the
    # kernel so their transfer overlaps the residual-tower compute.
    in_specs = [_VMEM] * 12 + [_ANY, _VMEM, _ANY, _VMEM, _VMEM, _VMEM]

    polT, valT = pl.pallas_call(
        _make_network_kernel(num_blocks, h),
        out_shape=(jax.ShapeDtypeStruct((spatial + 1, n), jnp.float32),
                   jax.ShapeDtypeStruct((1, n), jnp.float32)),
        in_specs=in_specs,
        out_specs=(_VMEM, _VMEM),
        scratch_shapes=[
            pltpu.VMEM(prep["wz_pol"].shape, jnp.float32),
            pltpu.VMEM(prep["wz_val"].shape, jnp.float32),
            pltpu.SemaphoreType.DMA((2,)),
        ],
    )(*inputs)
    # outputs come back head-major (O, N); transpose the tiny results to torch order
    return polT.T, valT.T


# ---------------------------- pure-JAX reference (for verification) -------------
def _reference_forward(params, planes):
    prec = lax.Precision.HIGHEST

    def conv_block(x, p, relu=True):
        w, b, gamma, beta, mean, var = p["raw"]
        y = lax.conv_general_dilated(x, w, (1, 1), "SAME",
                                     dimension_numbers=("NCHW", "OIHW", "NCHW"),
                                     precision=prec)
        y = y + b[None, :, None, None]
        y = (gamma[None, :, None, None] * (y - mean[None, :, None, None])
             * lax.rsqrt(var + BN_EPS)[None, :, None, None] + beta[None, :, None, None])
        return jnp.maximum(y, 0.0) if relu else y

    def linear(x, p, relu=False):
        w, b = p["raw"]
        y = jnp.dot(x, w.T, precision=prec) + b
        return jnp.maximum(y, 0.0) if relu else y

    x = conv_block(planes, params["input_conv"])
    for blk in params["blocks"]:
        identity = x
        h = conv_block(x, blk["conv1"])
        h = conv_block(h, blk["conv2"], relu=False)
        x = jnp.maximum(h + identity, 0.0)
    n = planes.shape[0]
    pol = conv_block(x, params["policy_conv"]).reshape(n, -1)
    pol = linear(pol, params["policy_fc"])
    val = conv_block(x, params["value_conv"]).reshape(n, -1)
    val = linear(val, params["value_fc"], relu=True)
    val = jnp.tanh(linear(val, params["winrate_fc"]))
    return pol, val


if __name__ == "__main__":
    key = jax.random.PRNGKey(0)
    pkey, xkey = jax.random.split(key)
    params = init_network_params(pkey)
    planes = jax.random.normal(
        xkey, (2, INPUT_CHANNELS, BOARD_SIZE, BOARD_SIZE), jnp.float32)

    prep = prepare_inference_params(params, batch_size=planes.shape[0])

    fwd = jax.jit(network_forward)
    pol, val = fwd(prep, planes)
    jax.block_until_ready((pol, val))

    assert pol.shape == (2, BOARD_SIZE * BOARD_SIZE + 1) and pol.dtype == jnp.float32
    assert val.shape == (2, 1) and val.dtype == jnp.float32
    assert bool(jnp.all(jnp.isfinite(pol))) and bool(jnp.all(jnp.isfinite(val)))

    # numerical check against a pure-JAX/XLA reference of the PyTorch graph
    pol_ref, val_ref = jax.jit(_reference_forward)(params, planes)
    assert bool(jnp.allclose(pol, pol_ref, atol=2e-2, rtol=2e-2)), \
        float(jnp.max(jnp.abs(pol - pol_ref)))
    assert bool(jnp.allclose(val, val_ref, atol=2e-2, rtol=2e-2)), \
        float(jnp.max(jnp.abs(val - val_ref)))

    print("KERNEL_OK")
</pallas_src>

<mosaic_0001>
module attributes {stable_mosaic.version = 11 : i64} {
  func.func @kernel(%arg0: memref<8x128xf32, #tpu.memory_space<vmem>>, %arg1: memref<9x1x128xf32, #tpu.memory_space<vmem>>, %arg2: memref<128x2xf32, #tpu.memory_space<vmem>>, %arg3: memref<32x72xf32, #tpu.memory_space<vmem>>, %arg4: memref<32x1xf32, #tpu.memory_space<vmem>>, %arg5: memref<32x1xf32, #tpu.memory_space<vmem>>, %arg6: memref<4x32x288xf32, #tpu.memory_space<vmem>>, %arg7: memref<4x32x1xf32, #tpu.memory_space<vmem>>, %arg8: memref<4x32x1xf32, #tpu.memory_space<vmem>>, %arg9: memref<12x32xf32, #tpu.memory_space<vmem>>, %arg10: memref<12x1xf32, #tpu.memory_space<vmem>>, %arg11: memref<12x1xf32, #tpu.memory_space<vmem>>, %arg12: memref<8x65x128xf32, #tpu.memory_space<any>>, %arg13: memref<65x1xf32, #tpu.memory_space<vmem>>, %arg14: memref<4x256x128xf32, #tpu.memory_space<any>>, %arg15: memref<256x1xf32, #tpu.memory_space<vmem>>, %arg16: memref<1x256xf32, #tpu.memory_space<vmem>>, %arg17: memref<1x1xf32, #tpu.memory_space<vmem>>, %arg18: memref<65x2xf32, #tpu.memory_space<vmem>>, %arg19: memref<1x2xf32, #tpu.memory_space<vmem>>, %arg20: memref<8x65x128xf32, #tpu.memory_space<vmem>>, %arg21: memref<4x256x128xf32, #tpu.memory_space<vmem>>, %arg22: memref<2x!tpu.dma_semaphore, #tpu.memory_space<semaphore_mem>>) attributes {dimension_semantics = [], scalar_prefetch = 0 : i64, scratch_operands = 3 : i64, tpu.core_type = #tpu.core_type<tc>} {
    %c0_i32 = arith.constant 0 : i32
    %0 = tpu.memref_slice %arg22[%c0_i32] : memref<2x!tpu.dma_semaphore, #tpu.memory_space<semaphore_mem>> -> memref<1x!tpu.dma_semaphore, #tpu.memory_space<semaphore_mem>>
    %1 = tpu.memref_squeeze %0 : memref<1x!tpu.dma_semaphore, #tpu.memory_space<semaphore_mem>> -> memref<!tpu.dma_semaphore, #tpu.memory_space<semaphore_mem>>
    tpu.enqueue_dma source(%arg12 : memref<8x65x128xf32, #tpu.memory_space<any>>) target(%arg20 : memref<8x65x128xf32, #tpu.memory_space<vmem>>) target_semaphore(%1 : memref<!tpu.dma_semaphore, #tpu.memory_space<semaphore_mem>>)
    %c1_i32 = arith.constant 1 : i32
    %2 = tpu.memref_slice %arg22[%c1_i32] : memref<2x!tpu.dma_semaphore, #tpu.memory_space<semaphore_mem>> -> memref<1x!tpu.dma_semaphore, #tpu.memory_space<semaphore_mem>>
    %3 = tpu.memref_squeeze %2 : memref<1x!tpu.dma_semaphore, #tpu.memory_space<semaphore_mem>> -> memref<!tpu.dma_semaphore, #tpu.memory_space<semaphore_mem>>
    tpu.enqueue_dma source(%arg14 : memref<4x256x128xf32, #tpu.memory_space<any>>) target(%arg21 : memref<4x256x128xf32, #tpu.memory_space<vmem>>) target_semaphore(%3 : memref<!tpu.dma_semaphore, #tpu.memory_space<semaphore_mem>>)
    %c0 = arith.constant 0 : index
    %c0_0 = arith.constant 0 : index
    %c0_1 = arith.constant 0 : index
    %4 = vector.load %arg1[%c0, %c0_0, %c0_1] : memref<9x1x128xf32, #tpu.memory_space<vmem>>, vector<9x1x128xf32>
    %c0_2 = arith.constant 0 : index
    %c0_3 = arith.constant 0 : index
    %5 = vector.load %arg2[%c0_2, %c0_3] : memref<128x2xf32, #tpu.memory_space<vmem>>, vector<128x2xf32>
    %c0_4 = arith.constant 0 : index
    %c0_5 = arith.constant 0 : index
    %6 = vector.load %arg0[%c0_4, %c0_5] : memref<8x128xf32, #tpu.memory_space<vmem>>, vector<8x128xf32>
    %c0_6 = arith.constant 0 : index
    %c0_7 = arith.constant 0 : index
    %7 = vector.load %arg3[%c0_6, %c0_7] : memref<32x72xf32, #tpu.memory_space<vmem>>, vector<32x72xf32>
    %c0_8 = arith.constant 0 : index
    %c0_9 = arith.constant 0 : index
    %8 = vector.load %arg4[%c0_8, %c0_9] : memref<32x1xf32, #tpu.memory_space<vmem>>, vector<32x1xf32>
    %c0_10 = arith.constant 0 : index
    %c0_11 = arith.constant 0 : index
    %9 = vector.load %arg5[%c0_10, %c0_11] : memref<32x1xf32, #tpu.memory_space<vmem>>, vector<32x1xf32>
    %c9_i32 = arith.constant 9 : i32
    %10 = tpu.dynamic_rotate %6 by %c9_i32 dim 1 : vector<8x128xf32>, i32 -> vector<8x128xf32>
    %11 = vector.extract_strided_slice %4 {offsets = [0, 0, 0], sizes = [1, 1, 128], strides = [1, 1, 1]} : vector<9x1x128xf32> to vector<1x1x128xf32>
    %12 = vector.shape_cast %11 : vector<1x1x128xf32> to vector<1x128xf32>
    %13 = vector.broadcast %12 : vector<1x128xf32> to vector<8x128xf32>
    %14 = arith.mulf %10, %13 : vector<8x128xf32>
    %c8_i32 = arith.constant 8 : i32
    %15 = tpu.dynamic_rotate %6 by %c8_i32 dim 1 : vector<8x128xf32>, i32 -> vector<8x128xf32>
    %16 = vector.extract_strided_slice %4 {offsets = [1, 0, 0], sizes = [1, 1, 128], strides = [1, 1, 1]} : vector<9x1x128xf32> to vector<1x1x128xf32>
    %17 = vector.shape_cast %16 : vector<1x1x128xf32> to vector<1x128xf32>
    %18 = vector.broadcast %17 : vector<1x128xf32> to vector<8x128xf32>
    %19 = arith.mulf %15, %18 : vector<8x128xf32>
    %c7_i32 = arith.constant 7 : i32
    %20 = tpu.dynamic_rotate %6 by %c7_i32 dim 1 : vector<8x128xf32>, i32 -> vector<8x128xf32>
    %21 = vector.extract_strided_slice %4 {offsets = [2, 0, 0], sizes = [1, 1, 128], strides = [1, 1, 1]} : vector<9x1x128xf32> to vector<1x1x128xf32>
    %22 = vector.shape_cast %21 : vector<1x1x128xf32> to vector<1x128xf32>
    %23 = vector.broadcast %22 : vector<1x128xf32> to vector<8x128xf32>
    %24 = arith.mulf %20, %23 : vector<8x128xf32>
    %c1_i32_12 = arith.constant 1 : i32
    %25 = tpu.dynamic_rotate %6 by %c1_i32_12 dim 1 : vector<8x128xf32>, i32 -> vector<8x128xf32>
    %26 = vector.extract_strided_slice %4 {offsets = [3, 0, 0], sizes = [1, 1, 128], strides = [1, 1, 1]} : vector<9x1x128xf32> to vector<1x1x128xf32>
    %27 = vector.shape_cast %26 : vector<1x1x128xf32> to vector<1x128xf32>
    %28 = vector.broadcast %27 : vector<1x128xf32> to vector<8x128xf32>
    %29 = arith.mulf %25, %28 : vector<8x128xf32>
    %c127_i32 = arith.constant 127 : i32
    %30 = tpu.dynamic_rotate %6 by %c127_i32 dim 1 : vector<8x128xf32>, i32 -> vector<8x128xf32>
    %31 = vector.extract_strided_slice %4 {offsets = [5, 0, 0], sizes = [1, 1, 128], strides = [1, 1, 1]} : vector<9x1x128xf32> to vector<1x1x128xf32>
    %32 = vector.shape_cast %31 : vector<1x1x128xf32> to vector<1x128xf32>
    %33 = vector.broadcast %32 : vector<1x128xf32> to vector<8x128xf32>
    %34 = arith.mulf %30, %33 : vector<8x128xf32>
    %c121_i32 = arith.constant 121 : i32
    %35 = tpu.dynamic_rotate %6 by %c121_i32 dim 1 : vector<8x128xf32>, i32 -> vector<8x128xf32>
    %36 = vector.extract_strided_slice %4 {offsets = [6, 0, 0], sizes = [1, 1, 128], strides = [1, 1, 1]} : vector<9x1x128xf32> to vector<1x1x128xf32>
    %37 = vector.shape_cast %36 : vector<1x1x128xf32> to vector<1x128xf32>
    %38 = vector.broadcast %37 : vector<1x128xf32> to vector<8x128xf32>
    %39 = arith.mulf %35, %38 : vector<8x128xf32>
    %c120_i32 = arith.constant 120 : i32
    %40 = tpu.dynamic_rotate %6 by %c120_i32 dim 1 : vector<8x128xf32>, i32 -> vector<8x128xf32>
    %41 = vector.extract_strided_slice %4 {offsets = [7, 0, 0], sizes = [1, 1, 128], strides = [1, 1, 1]} : vector<9x1x128xf32> to vector<1x1x128xf32>
    %42 = vector.shape_cast %41 : vector<1x1x128xf32> to vector<1x128xf32>
    %43 = vector.broadcast %42 : vector<1x128xf32> to vector<8x128xf32>
    %44 = arith.mulf %40, %43 : vector<8x128xf32>
    %c119_i32 = arith.constant 119 : i32
    %45 = tpu.dynamic_rotate %6 by %c119_i32 dim 1 : vector<8x128xf32>, i32 -> vector<8x128xf32>
    %46 = vector.extract_strided_slice %4 {offsets = [8, 0, 0], sizes = [1, 1, 128], strides = [1, 1, 1]} : vector<9x1x128xf32> to vector<1x1x128xf32>
    %47 = vector.shape_cast %46 : vector<1x1x128xf32> to vector<1x128xf32>
    %48 = vector.broadcast %47 : vector<1x128xf32> to vector<8x128xf32>
    %49 = arith.mulf %45, %48 : vector<8x128xf32>
    %50 = tpu.concatenate %14, %19, %24, %29, %6, %34, %39, %44, %49 in 0 : vector<8x128xf32>, vector<8x128xf32>, vector<8x128xf32>, vector<8x128xf32>, vector<8x128xf32>, vector<8x128xf32>, vector<8x128xf32>, vector<8x128xf32>, vector<8x128xf32> -> vector<72x128xf32>
    %cst = arith.constant dense<0.000000e+00> : vector<32x128xf32>
    %51 = tpu.matmul %7, %50, %cst {dimension_numbers = #tpu.dot_dimension_numbers<[1], [0], [0], [1], [0, 0, 1, 1], [], []>} : vector<32x72xf32>, vector<72x128xf32>, vector<32x128xf32> -> vector<32x128xf32>
    %52 = vector.broadcast %8 : vector<32x1xf32> to vector<32x128xf32>
    %53 = arith.mulf %51, %52 : vector<32x128xf32>
    %54 = vector.broadcast %9 : vector<32x1xf32> to vector<32x128xf32>
    %55 = arith.addf %53, %54 : vector<32x128xf32>
    %cst_13 = arith.constant 0.000000e+00 : f32
    %56 = vector.broadcast %cst_13 : f32 to vector<32x128xf32>
    %57 = arith.maximumf %55, %56 : vector<32x128xf32>
    %c0_14 = arith.constant 0 : index
    %c0_15 = arith.constant 0 : index
    %c0_16 = arith.constant 0 : index
    %58 = vector.load %arg6[%c0_14, %c0_15, %c0_16] : memref<4x32x288xf32, #tpu.memory_space<vmem>>, vector<1x32x288xf32>
    %59 = vector.shape_cast %58 : vector<1x32x288xf32> to vector<32x288xf32>
    %c0_17 = arith.constant 0 : index
    %c0_18 = arith.constant 0 : index
    %c0_19 = arith.constant 0 : index
    %60 = vector.load %arg7[%c0_17, %c0_18, %c0_19] : memref<4x32x1xf32, #tpu.memory_space<vmem>>, vector<1x32x1xf32>
    %61 = vector.shape_cast %60 : vector<1x32x1xf32> to vector<32x1xf32>
    %c0_20 = arith.constant 0 : index
    %c0_21 = arith.constant 0 : index
    %c0_22 = arith.constant 0 : index
    %62 = vector.load %arg8[%c0_20, %c0_21, %c0_22] : memref<4x32x1xf32, #tpu.memory_space<vmem>>, vector<1x32x1xf32>
    %63 = vector.shape_cast %62 : vector<1x32x1xf32> to vector<32x1xf32>
    %c9_i32_23 = arith.constant 9 : i32
    %64 = tpu.dynamic_rotate %57 by %c9_i32_23 dim 1 : vector<32x128xf32>, i32 -> vector<32x128xf32>
    %65 = vector.extract_strided_slice %4 {offsets = [0, 0, 0], sizes = [1, 1, 128], strides = [1, 1, 1]} : vector<9x1x128xf32> to vector<1x1x128xf32>
    %66 = vector.shape_cast %65 : vector<1x1x128xf32> to vector<1x128xf32>
    %67 = vector.broadcast %66 : vector<1x128xf32> to vector<32x128xf32>
    %68 = arith.mulf %64, %67 : vector<32x128xf32>
    %c8_i32_24 = arith.constant 8 : i32
    %69 = tpu.dynamic_rotate %57 by %c8_i32_24 dim 1 : vector<32x128xf32>, i32 -> vector<32x128xf32>
    %70 = vector.extract_strided_slice %4 {offsets = [1, 0, 0], sizes = [1, 1, 128], strides = [1, 1, 1]} : vector<9x1x128xf32> to vector<1x1x128xf32>
    %71 = vector.shape_cast %70 : vector<1x1x128xf32> to vector<1x128xf32>
    %72 = vector.broadcast %71 : vector<1x128xf32> to vector<32x128xf32>
    %73 = arith.mulf %69, %72 : vector<32x128xf32>
    %c7_i32_25 = arith.constant 7 : i32
    %74 = tpu.dynamic_rotate %57 by %c7_i32_25 dim 1 : vector<32x128xf32>, i32 -> vector<32x128xf32>
    %75 = vector.extract_strided_slice %4 {offsets = [2, 0, 0], sizes = [1, 1, 128], strides = [1, 1, 1]} : vector<9x1x128xf32> to vector<1x1x128xf32>
    %76 = vector.shape_cast %75 : vector<1x1x128xf32> to vector<1x128xf32>
    %77 = vector.broadcast %76 : vector<1x128xf32> to vector<32x128xf32>
    %78 = arith.mulf %74, %77 : vector<32x128xf32>
    %c1_i32_26 = arith.constant 1 : i32
    %79 = tpu.dynamic_rotate %57 by %c1_i32_26 dim 1 : vector<32x128xf32>, i32 -> vector<32x128xf32>
    %80 = vector.extract_strided_slice %4 {offsets = [3, 0, 0], sizes = [1, 1, 128], strides = [1, 1, 1]} : vector<9x1x128xf32> to vector<1x1x128xf32>
    %81 = vector.shape_cast %80 : vector<1x1x128xf32> to vector<1x128xf32>
    %82 = vector.broadcast %81 : vector<1x128xf32> to vector<32x128xf32>
    %83 = arith.mulf %79, %82 : vector<32x128xf32>
    %c127_i32_27 = arith.constant 127 : i32
    %84 = tpu.dynamic_rotate %57 by %c127_i32_27 dim 1 : vector<32x128xf32>, i32 -> vector<32x128xf32>
    %85 = vector.extract_strided_slice %4 {offsets = [5, 0, 0], sizes = [1, 1, 128], strides = [1, 1, 1]} : vector<9x1x128xf32> to vector<1x1x128xf32>
    %86 = vector.shape_cast %85 : vector<1x1x128xf32> to vector<1x128xf32>
    %87 = vector.broadcast %86 : vector<1x128xf32> to vector<32x128xf32>
    %88 = arith.mulf %84, %87 : vector<32x128xf32>
    %c121_i32_28 = arith.constant 121 : i32
    %89 = tpu.dynamic_rotate %57 by %c121_i32_28 dim 1 : vector<32x128xf32>, i32 -> vector<32x128xf32>
    %90 = vector.extract_strided_slice %4 {offsets = [6, 0, 0], sizes = [1, 1, 128], strides = [1, 1, 1]} : vector<9x1x128xf32> to vector<1x1x128xf32>
    %91 = vector.shape_cast %90 : vector<1x1x128xf32> to vector<1x128xf32>
    %92 = vector.broadcast %91 : vector<1x128xf32> to vector<32x128xf32>
    %93 = arith.mulf %89, %92 : vector<32x128xf32>
    %c120_i32_29 = arith.constant 120 : i32
    %94 = tpu.dynamic_rotate %57 by %c120_i32_29 dim 1 : vector<32x128xf32>, i32 -> vector<32x128xf32>
    %95 = vector.extract_strided_slice %4 {offsets = [7, 0, 0], sizes = [1, 1, 128], strides = [1, 1, 1]} : vector<9x1x128xf32> to vector<1x1x128xf32>
    %96 = vector.shape_cast %95 : vector<1x1x128xf32> to vector<1x128xf32>
    %97 = vector.broadcast %96 : vector<1x128xf32> to vector<32x128xf32>
    %98 = arith.mulf %94, %97 : vector<32x128xf32>
    %c119_i32_30 = arith.constant 119 : i32
    %99 = tpu.dynamic_rotate %57 by %c119_i32_30 dim 1 : vector<32x128xf32>, i32 -> vector<32x128xf32>
    %100 = vector.extract_strided_slice %4 {offsets = [8, 0, 0], sizes = [1, 1, 128], strides = [1, 1, 1]} : vector<9x1x128xf32> to vector<1x1x128xf32>
    %101 = vector.shape_cast %100 : vector<1x1x128xf32> to vector<1x128xf32>
    %102 = vector.broadcast %101 : vector<1x128xf32> to vector<32x128xf32>
    %103 = arith.mulf %99, %102 : vector<32x128xf32>
    %104 = tpu.concatenate %68, %73, %78, %83, %57, %88, %93, %98, %103 in 0 : vector<32x128xf32>, vector<32x128xf32>, vector<32x128xf32>, vector<32x128xf32>, vector<32x128xf32>, vector<32x128xf32>, vector<32x128xf32>, vector<32x128xf32>, vector<32x128xf32> -> vector<288x128xf32>
    %cst_31 = arith.constant dense<0.000000e+00> : vector<32x128xf32>
    %105 = tpu.matmul %59, %104, %cst_31 {dimension_numbers = #tpu.dot_dimension_numbers<[1], [0], [0], [1], [0, 0, 1, 1], [], []>} : vector<32x288xf32>, vector<288x128xf32>, vector<32x128xf32> -> vector<32x128xf32>
    %106 = vector.broadcast %61 : vector<32x1xf32> to vector<32x128xf32>
    %107 = arith.mulf %105, %106 : vector<32x128xf32>
    %108 = vector.broadcast %63 : vector<32x1xf32> to vector<32x128xf32>
    %109 = arith.addf %107, %108 : vector<32x128xf32>
    %cst_32 = arith.constant 0.000000e+00 : f32
    %110 = vector.broadcast %cst_32 : f32 to vector<32x128xf32>
    %111 = arith.maximumf %109, %110 : vector<32x128xf32>
    %c1 = arith.constant 1 : index
    %c0_33 = arith.constant 0 : index
    %c0_34 = arith.constant 0 : index
    %112 = vector.load %arg6[%c1, %c0_33, %c0_34] : memref<4x32x288xf32, #tpu.memory_space<vmem>>, vector<1x32x288xf32>
    %113 = vector.shape_cast %112 : vector<1x32x288xf32> to vector<32x288xf32>
    %c1_35 = arith.constant 1 : index
    %c0_36 = arith.constant 0 : index
    %c0_37 = arith.constant 0 : index
    %114 = vector.load %arg7[%c1_35, %c0_36, %c0_37] : memref<4x32x1xf32, #tpu.memory_space<vmem>>, vector<1x32x1xf32>
    %115 = vector.shape_cast %114 : vector<1x32x1xf32> to vector<32x1xf32>
    %c1_38 = arith.constant 1 : index
    %c0_39 = arith.constant 0 : index
    %c0_40 = arith.constant 0 : index
    %116 = vector.load %arg8[%c1_38, %c0_39, %c0_40] : memref<4x32x1xf32, #tpu.memory_space<vmem>>, vector<1x32x1xf32>
    %117 = vector.shape_cast %116 : vector<1x32x1xf32> to vector<32x1xf32>
    %c9_i32_41 = arith.constant 9 : i32
    %118 = tpu.dynamic_rotate %111 by %c9_i32_41 dim 1 : vector<32x128xf32>, i32 -> vector<32x128xf32>
    %119 = vector.extract_strided_slice %4 {offsets = [0, 0, 0], sizes = [1, 1, 128], strides = [1, 1, 1]} : vector<9x1x128xf32> to vector<1x1x128xf32>
    %120 = vector.shape_cast %119 : vector<1x1x128xf32> to vector<1x128xf32>
    %121 = vector.broadcast %120 : vector<1x128xf32> to vector<32x128xf32>
    %122 = arith.mulf %118, %121 : vector<32x128xf32>
    %c8_i32_42 = arith.constant 8 : i32
    %123 = tpu.dynamic_rotate %111 by %c8_i32_42 dim 1 : vector<32x128xf32>, i32 -> vector<32x128xf32>
    %124 = vector.extract_strided_slice %4 {offsets = [1, 0, 0], sizes = [1, 1, 128], strides = [1, 1, 1]} : vector<9x1x128xf32> to vector<1x1x128xf32>
    %125 = vector.shape_cast %124 : vector<1x1x128xf32> to vector<1x128xf32>
    %126 = vector.broadcast %125 : vector<1x128xf32> to vector<32x128xf32>
    %127 = arith.mulf %123, %126 : vector<32x128xf32>
    %c7_i32_43 = arith.constant 7 : i32
    %128 = tpu.dynamic_rotate %111 by %c7_i32_43 dim 1 : vector<32x128xf32>, i32 -> vector<32x128xf32>
    %129 = vector.extract_strided_slice %4 {offsets = [2, 0, 0], sizes = [1, 1, 128], strides = [1, 1, 1]} : vector<9x1x128xf32> to vector<1x1x128xf32>
    %130 = vector.shape_cast %129 : vector<1x1x128xf32> to vector<1x128xf32>
    %131 = vector.broadcast %130 : vector<1x128xf32> to vector<32x128xf32>
    %132 = arith.mulf %128, %131 : vector<32x128xf32>
    %c1_i32_44 = arith.constant 1 : i32
    %133 = tpu.dynamic_rotate %111 by %c1_i32_44 dim 1 : vector<32x128xf32>, i32 -> vector<32x128xf32>
    %134 = vector.extract_strided_slice %4 {offsets = [3, 0, 0], sizes = [1, 1, 128], strides = [1, 1, 1]} : vector<9x1x128xf32> to vector<1x1x128xf32>
    %135 = vector.shape_cast %134 : vector<1x1x128xf32> to vector<1x128xf32>
    %136 = vector.broadcast %135 : vector<1x128xf32> to vector<32x128xf32>
    %137 = arith.mulf %133, %136 : vector<32x128xf32>
    %c127_i32_45 = arith.constant 127 : i32
    %138 = tpu.dynamic_rotate %111 by %c127_i32_45 dim 1 : vector<32x128xf32>, i32 -> vector<32x128xf32>
    %139 = vector.extract_strided_slice %4 {offsets = [5, 0, 0], sizes = [1, 1, 128], strides = [1, 1, 1]} : vector<9x1x128xf32> to vector<1x1x128xf32>
    %140 = vector.shape_cast %139 : vector<1x1x128xf32> to vector<1x128xf32>
    %141 = vector.broadcast %140 : vector<1x128xf32> to vector<32x128xf32>
    %142 = arith.mulf %138, %141 : vector<32x128xf32>
    %c121_i32_46 = arith.constant 121 : i32
    %143 = tpu.dynamic_rotate %111 by %c121_i32_46 dim 1 : vector<32x128xf32>, i32 -> vector<32x128xf32>
    %144 = vector.extract_strided_slice %4 {offsets = [6, 0, 0], sizes = [1, 1, 128], strides = [1, 1, 1]} : vector<9x1x128xf32> to vector<1x1x128xf32>
    %145 = vector.shape_cast %144 : vector<1x1x128xf32> to vector<1x128xf32>
    %146 = vector.broadcast %145 : vector<1x128xf32> to vector<32x128xf32>
    %147 = arith.mulf %143, %146 : vector<32x128xf32>
    %c120_i32_47 = arith.constant 120 : i32
    %148 = tpu.dynamic_rotate %111 by %c120_i32_47 dim 1 : vector<32x128xf32>, i32 -> vector<32x128xf32>
    %149 = vector.extract_strided_slice %4 {offsets = [7, 0, 0], sizes = [1, 1, 128], strides = [1, 1, 1]} : vector<9x1x128xf32> to vector<1x1x128xf32>
    %150 = vector.shape_cast %149 : vector<1x1x128xf32> to vector<1x128xf32>
    %151 = vector.broadcast %150 : vector<1x128xf32> to vector<32x128xf32>
    %152 = arith.mulf %148, %151 : vector<32x128xf32>
    %c119_i32_48 = arith.constant 119 : i32
    %153 = tpu.dynamic_rotate %111 by %c119_i32_48 dim 1 : vector<32x128xf32>, i32 -> vector<32x128xf32>
    %154 = vector.extract_strided_slice %4 {offsets = [8, 0, 0], sizes = [1, 1, 128], strides = [1, 1, 1]} : vector<9x1x128xf32> to vector<1x1x128xf32>
    %155 = vector.shape_cast %154 : vector<1x1x128xf32> to vector<1x128xf32>
    %156 = vector.broadcast %155 : vector<1x128xf32> to vector<32x128xf32>
    %157 = arith.mulf %153, %156 : vector<32x128xf32>
    %158 = tpu.concatenate %122, %127, %132, %137, %111, %142, %147, %152, %157 in 0 : vector<32x128xf32>, vector<32x128xf32>, vector<32x128xf32>, vector<32x128xf32>, vector<32x128xf32>, vector<32x128xf32>, vector<32x128xf32>, vector<32x128xf32>, vector<32x128xf32> -> vector<288x128xf32>
    %cst_49 = arith.constant dense<0.000000e+00> : vector<32x128xf32>
    %159 = tpu.matmul %113, %158, %cst_49 {dimension_numbers = #tpu.dot_dimension_numbers<[1], [0], [0], [1], [0, 0, 1, 1], [], []>} : vector<32x288xf32>, vector<288x128xf32>, vector<32x128xf32> -> vector<32x128xf32>
    %160 = vector.broadcast %115 : vector<32x1xf32> to vector<32x128xf32>
    %161 = arith.mulf %159, %160 : vector<32x128xf32>
    %162 = vector.broadcast %117 : vector<32x1xf32> to vector<32x128xf32>
    %163 = arith.addf %161, %162 : vector<32x128xf32>
    %164 = arith.addf %163, %57 : vector<32x128xf32>
    %cst_50 = arith.constant 0.000000e+00 : f32
    %165 = vector.broadcast %cst_50 : f32 to vector<32x128xf32>
    %166 = arith.maximumf %164, %165 : vector<32x128xf32>
    %c2 = arith.constant 2 : index
    %c0_51 = arith.constant 0 : index
    %c0_52 = arith.constant 0 : index
    %167 = vector.load %arg6[%c2, %c0_51, %c0_52] : memref<4x32x288xf32, #tpu.memory_space<vmem>>, vector<1x32x288xf32>
    %168 = vector.shape_cast %167 : vector<1x32x288xf32> to vector<32x288xf32>
    %c2_53 = arith.constant 2 : index
    %c0_54 = arith.constant 0 : index
    %c0_55 = arith.constant 0 : index
    %169 = vector.load %arg7[%c2_53, %c0_54, %c0_55] : memref<4x32x1xf32, #tpu.memory_space<vmem>>, vector<1x32x1xf32>
    %170 = vector.shape_cast %169 : vector<1x32x1xf32> to vector<32x1xf32>
    %c2_56 = arith.constant 2 : index
    %c0_57 = arith.constant 0 : index
    %c0_58 = arith.constant 0 : index
    %171 = vector.load %arg8[%c2_56, %c0_57, %c0_58] : memref<4x32x1xf32, #tpu.memory_space<vmem>>, vector<1x32x1xf32>
    %172 = vector.shape_cast %171 : vector<1x32x1xf32> to vector<32x1xf32>
    %c9_i32_59 = arith.constant 9 : i32
    %173 = tpu.dynamic_rotate %166 by %c9_i32_59 dim 1 : vector<32x128xf32>, i32 -> vector<32x128xf32>
    %174 = vector.extract_strided_slice %4 {offsets = [0, 0, 0], sizes = [1, 1, 128], strides = [1, 1, 1]} : vector<9x1x128xf32> to vector<1x1x128xf32>
    %175 = vector.shape_cast %174 : vector<1x1x128xf32> to vector<1x128xf32>
    %176 = vector.broadcast %175 : vector<1x128xf32> to vector<32x128xf32>
    %177 = arith.mulf %173, %176 : vector<32x128xf32>
    %c8_i32_60 = arith.constant 8 : i32
    %178 = tpu.dynamic_rotate %166 by %c8_i32_60 dim 1 : vector<32x128xf32>, i32 -> vector<32x128xf32>
    %179 = vector.extract_strided_slice %4 {offsets = [1, 0, 0], sizes = [1, 1, 128], strides = [1, 1, 1]} : vector<9x1x128xf32> to vector<1x1x128xf32>
    %180 = vector.shape_cast %179 : vector<1x1x128xf32> to vector<1x128xf32>
    %181 = vector.broadcast %180 : vector<1x128xf32> to vector<32x128xf32>
    %182 = arith.mulf %178, %181 : vector<32x128xf32>
    %c7_i32_61 = arith.constant 7 : i32
    %183 = tpu.dynamic_rotate %166 by %c7_i32_61 dim 1 : vector<32x128xf32>, i32 -> vector<32x128xf32>
    %184 = vector.extract_strided_slice %4 {offsets = [2, 0, 0], sizes = [1, 1, 128], strides = [1, 1, 1]} : vector<9x1x128xf32> to vector<1x1x128xf32>
    %185 = vector.shape_cast %184 : vector<1x1x128xf32> to vector<1x128xf32>
    %186 = vector.broadcast %185 : vector<1x128xf32> to vector<32x128xf32>
    %187 = arith.mulf %183, %186 : vector<32x128xf32>
    %c1_i32_62 = arith.constant 1 : i32
    %188 = tpu.dynamic_rotate %166 by %c1_i32_62 dim 1 : vector<32x128xf32>, i32 -> vector<32x128xf32>
    %189 = vector.extract_strided_slice %4 {offsets = [3, 0, 0], sizes = [1, 1, 128], strides = [1, 1, 1]} : vector<9x1x128xf32> to vector<1x1x128xf32>
    %190 = vector.shape_cast %189 : vector<1x1x128xf32> to vector<1x128xf32>
    %191 = vector.broadcast %190 : vector<1x128xf32> to vector<32x128xf32>
    %192 = arith.mulf %188, %191 : vector<32x128xf32>
    %c127_i32_63 = arith.constant 127 : i32
    %193 = tpu.dynamic_rotate %166 by %c127_i32_63 dim 1 : vector<32x128xf32>, i32 -> vector<32x128xf32>
    %194 = vector.extract_strided_slice %4 {offsets = [5, 0, 0], sizes = [1, 1, 128], strides = [1, 1, 1]} : vector<9x1x128xf32> to vector<1x1x128xf32>
    %195 = vector.shape_cast %194 : vector<1x1x128xf32> to vector<1x128xf32>
    %196 = vector.broadcast %195 : vector<1x128xf32> to vector<32x128xf32>
    %197 = arith.mulf %193, %196 : vector<32x128xf32>
    %c121_i32_64 = arith.constant 121 : i32
    %198 = tpu.dynamic_rotate %166 by %c121_i32_64 dim 1 : vector<32x128xf32>, i32 -> vector<32x128xf32>
    %199 = vector.extract_strided_slice %4 {offsets = [6, 0, 0], sizes = [1, 1, 128], strides = [1, 1, 1]} : vector<9x1x128xf32> to vector<1x1x128xf32>
    %200 = vector.shape_cast %199 : vector<1x1x128xf32> to vector<1x128xf32>
    %201 = vector.broadcast %200 : vector<1x128xf32> to vector<32x128xf32>
    %202 = arith.mulf %198, %201 : vector<32x128xf32>
    %c120_i32_65 = arith.constant 120 : i32
    %203 = tpu.dynamic_rotate %166 by %c120_i32_65 dim 1 : vector<32x128xf32>, i32 -> vector<32x128xf32>
    %204 = vector.extract_strided_slice %4 {offsets = [7, 0, 0], sizes = [1, 1, 128], strides = [1, 1, 1]} : vector<9x1x128xf32> to vector<1x1x128xf32>
    %205 = vector.shape_cast %204 : vector<1x1x128xf32> to vector<1x128xf32>
    %206 = vector.broadcast %205 : vector<1x128xf32> to vector<32x128xf32>
    %207 = arith.mulf %203, %206 : vector<32x128xf32>
    %c119_i32_66 = arith.constant 119 : i32
    %208 = tpu.dynamic_rotate %166 by %c119_i32_66 dim 1 : vector<32x128xf32>, i32 -> vector<32x128xf32>
    %209 = vector.extract_strided_slice %4 {offsets = [8, 0, 0], sizes = [1, 1, 128], strides = [1, 1, 1]} : vector<9x1x128xf32> to vector<1x1x128xf32>
    %210 = vector.shape_cast %209 : vector<1x1x128xf32> to vector<1x128xf32>
    %211 = vector.broadcast %210 : vector<1x128xf32> to vector<32x128xf32>
    %212 = arith.mulf %208, %211 : vector<32x128xf32>
    %213 = tpu.concatenate %177, %182, %187, %192, %166, %197, %202, %207, %212 in 0 : vector<32x128xf32>, vector<32x128xf32>, vector<32x128xf32>, vector<32x128xf32>, vector<32x128xf32>, vector<32x128xf32>, vector<32x128xf32>, vector<32x128xf32>, vector<32x128xf32> -> vector<288x128xf32>
    %cst_67 = arith.constant dense<0.000000e+00> : vector<32x128xf32>
    %214 = tpu.matmul %168, %213, %cst_67 {dimension_numbers = #tpu.dot_dimension_numbers<[1], [0], [0], [1], [0, 0, 1, 1], [], []>} : vector<32x288xf32>, vector<288x128xf32>, vector<32x128xf32> -> vector<32x128xf32>
    %215 = vector.broadcast %170 : vector<32x1xf32> to vector<32x128xf32>
    %216 = arith.mulf %214, %215 : vector<32x128xf32>
    %217 = vector.broadcast %172 : vector<32x1xf32> to vector<32x128xf32>
    %218 = arith.addf %216, %217 : vector<32x128xf32>
    %cst_68 = arith.constant 0.000000e+00 : f32
    %219 = vector.broadcast %cst_68 : f32 to vector<32x128xf32>
    %220 = arith.maximumf %218, %219 : vector<32x128xf32>
    %c3 = arith.constant 3 : index
    %c0_69 = arith.constant 0 : index
    %c0_70 = arith.constant 0 : index
    %221 = vector.load %arg6[%c3, %c0_69, %c0_70] : memref<4x32x288xf32, #tpu.memory_space<vmem>>, vector<1x32x288xf32>
    %222 = vector.shape_cast %221 : vector<1x32x288xf32> to vector<32x288xf32>
    %c3_71 = arith.constant 3 : index
    %c0_72 = arith.constant 0 : index
    %c0_73 = arith.constant 0 : index
    %223 = vector.load %arg7[%c3_71, %c0_72, %c0_73] : memref<4x32x1xf32, #tpu.memory_space<vmem>>, vector<1x32x1xf32>
    %224 = vector.shape_cast %223 : vector<1x32x1xf32> to vector<32x1xf32>
    %c3_74 = arith.constant 3 : index
    %c0_75 = arith.constant 0 : index
    %c0_76 = arith.constant 0 : index
    %225 = vector.load %arg8[%c3_74, %c0_75, %c0_76] : memref<4x32x1xf32, #tpu.memory_space<vmem>>, vector<1x32x1xf32>
    %226 = vector.shape_cast %225 : vector<1x32x1xf32> to vector<32x1xf32>
    %c9_i32_77 = arith.constant 9 : i32
    %227 = tpu.dynamic_rotate %220 by %c9_i32_77 dim 1 : vector<32x128xf32>, i32 -> vector<32x128xf32>
    %228 = vector.extract_strided_slice %4 {offsets = [0, 0, 0], sizes = [1, 1, 128], strides = [1, 1, 1]} : vector<9x1x128xf32> to vector<1x1x128xf32>
    %229 = vector.shape_cast %228 : vector<1x1x128xf32> to vector<1x128xf32>
    %230 = vector.broadcast %229 : vector<1x128xf32> to vector<32x128xf32>
    %231 = arith.mulf %227, %230 : vector<32x128xf32>
    %c8_i32_78 = arith.constant 8 : i32
    %232 = tpu.dynamic_rotate %220 by %c8_i32_78 dim 1 : vector<32x128xf32>, i32 -> vector<32x128xf32>
    %233 = vector.extract_strided_slice %4 {offsets = [1, 0, 0], sizes = [1, 1, 128], strides = [1, 1, 1]} : vector<9x1x128xf32> to vector<1x1x128xf32>
    %234 = vector.shape_cast %233 : vector<1x1x128xf32> to vector<1x128xf32>
    %235 = vector.broadcast %234 : vector<1x128xf32> to vector<32x128xf32>
    %236 = arith.mulf %232, %235 : vector<32x128xf32>
    %c7_i32_79 = arith.constant 7 : i32
    %237 = tpu.dynamic_rotate %220 by %c7_i32_79 dim 1 : vector<32x128xf32>, i32 -> vector<32x128xf32>
    %238 = vector.extract_strided_slice %4 {offsets = [2, 0, 0], sizes = [1, 1, 128], strides = [1, 1, 1]} : vector<9x1x128xf32> to vector<1x1x128xf32>
    %239 = vector.shape_cast %238 : vector<1x1x128xf32> to vector<1x128xf32>
    %240 = vector.broadcast %239 : vector<1x128xf32> to vector<32x128xf32>
    %241 = arith.mulf %237, %240 : vector<32x128xf32>
    %c1_i32_80 = arith.constant 1 : i32
    %242 = tpu.dynamic_rotate %220 by %c1_i32_80 dim 1 : vector<32x128xf32>, i32 -> vector<32x128xf32>
    %243 = vector.extract_strided_slice %4 {offsets = [3, 0, 0], sizes = [1, 1, 128], strides = [1, 1, 1]} : vector<9x1x128xf32> to vector<1x1x128xf32>
    %244 = vector.shape_cast %243 : vector<1x1x128xf32> to vector<1x128xf32>
    %245 = vector.broadcast %244 : vector<1x128xf32> to vector<32x128xf32>
    %246 = arith.mulf %242, %245 : vector<32x128xf32>
    %c127_i32_81 = arith.constant 127 : i32
    %247 = tpu.dynamic_rotate %220 by %c127_i32_81 dim 1 : vector<32x128xf32>, i32 -> vector<32x128xf32>
    %248 = vector.extract_strided_slice %4 {offsets = [5, 0, 0], sizes = [1, 1, 128], strides = [1, 1, 1]} : vector<9x1x128xf32> to vector<1x1x128xf32>
    %249 = vector.shape_cast %248 : vector<1x1x128xf32> to vector<1x128xf32>
    %250 = vector.broadcast %249 : vector<1x128xf32> to vector<32x128xf32>
    %251 = arith.mulf %247, %250 : vector<32x128xf32>
    %c121_i32_82 = arith.constant 121 : i32
    %252 = tpu.dynamic_rotate %220 by %c121_i32_82 dim 1 : vector<32x128xf32>, i32 -> vector<32x128xf32>
    %253 = vector.extract_strided_slice %4 {offsets = [6, 0, 0], sizes = [1, 1, 128], strides = [1, 1, 1]} : vector<9x1x128xf32> to vector<1x1x128xf32>
    %254 = vector.shape_cast %253 : vector<1x1x128xf32> to vector<1x128xf32>
    %255 = vector.broadcast %254 : vector<1x128xf32> to vector<32x128xf32>
    %256 = arith.mulf %252, %255 : vector<32x128xf32>
    %c120_i32_83 = arith.constant 120 : i32
    %257 = tpu.dynamic_rotate %220 by %c120_i32_83 dim 1 : vector<32x128xf32>, i32 -> vector<32x128xf32>
    %258 = vector.extract_strided_slice %4 {offsets = [7, 0, 0], sizes = [1, 1, 128], strides = [1, 1, 1]} : vector<9x1x128xf32> to vector<1x1x128xf32>
    %259 = vector.shape_cast %258 : vector<1x1x128xf32> to vector<1x128xf32>
    %260 = vector.broadcast %259 : vector<1x128xf32> to vector<32x128xf32>
    %261 = arith.mulf %257, %260 : vector<32x128xf32>
    %c119_i32_84 = arith.constant 119 : i32
    %262 = tpu.dynamic_rotate %220 by %c119_i32_84 dim 1 : vector<32x128xf32>, i32 -> vector<32x128xf32>
    %263 = vector.extract_strided_slice %4 {offsets = [8, 0, 0], sizes = [1, 1, 128], strides = [1, 1, 1]} : vector<9x1x128xf32> to vector<1x1x128xf32>
    %264 = vector.shape_cast %263 : vector<1x1x128xf32> to vector<1x128xf32>
    %265 = vector.broadcast %264 : vector<1x128xf32> to vector<32x128xf32>
    %266 = arith.mulf %262, %265 : vector<32x128xf32>
    %267 = tpu.concatenate %231, %236, %241, %246, %220, %251, %256, %261, %266 in 0 : vector<32x128xf32>, vector<32x128xf32>, vector<32x128xf32>, vector<32x128xf32>, vector<32x128xf32>, vector<32x128xf32>, vector<32x128xf32>, vector<32x128xf32>, vector<32x128xf32> -> vector<288x128xf32>
    %cst_85 = arith.constant dense<0.000000e+00> : vector<32x128xf32>
    %268 = tpu.matmul %222, %267, %cst_85 {dimension_numbers = #tpu.dot_dimension_numbers<[1], [0], [0], [1], [0, 0, 1, 1], [], []>} : vector<32x288xf32>, vector<288x128xf32>, vector<32x128xf32> -> vector<32x128xf32>
    %269 = vector.broadcast %224 : vector<32x1xf32> to vector<32x128xf32>
    %270 = arith.mulf %268, %269 : vector<32x128xf32>
    %271 = vector.broadcast %226 : vector<32x1xf32> to vector<32x128xf32>
    %272 = arith.addf %270, %271 : vector<32x128xf32>
    %273 = arith.addf %272, %166 : vector<32x128xf32>
    %cst_86 = arith.constant 0.000000e+00 : f32
    %274 = vector.broadcast %cst_86 : f32 to vector<32x128xf32>
    %275 = arith.maximumf %273, %274 : vector<32x128xf32>
    %c0_87 = arith.constant 0 : index
    %c0_88 = arith.constant 0 : index
    %276 = vector.load %arg9[%c0_87, %c0_88] : memref<12x32xf32, #tpu.memory_space<vmem>>, vector<12x32xf32>
    %cst_89 = arith.constant dense<0.000000e+00> : vector<12x128xf32>
    %277 = tpu.matmul %276, %275, %cst_89 {dimension_numbers = #tpu.dot_dimension_numbers<[1], [0], [0], [1], [0, 0, 1, 1], [], []>} : vector<12x32xf32>, vector<32x128xf32>, vector<12x128xf32> -> vector<12x128xf32>
    %c0_90 = arith.constant 0 : index
    %c0_91 = arith.constant 0 : index
    %278 = vector.load %arg10[%c0_90, %c0_91] : memref<12x1xf32, #tpu.memory_space<vmem>>, vector<12x1xf32>
    %279 = vector.broadcast %278 : vector<12x1xf32> to vector<12x128xf32>
    %280 = arith.mulf %277, %279 : vector<12x128xf32>
    %c0_92 = arith.constant 0 : index
    %c0_93 = arith.constant 0 : index
    %281 = vector.load %arg11[%c0_92, %c0_93] : memref<12x1xf32, #tpu.memory_space<vmem>>, vector<12x1xf32>
    %282 = vector.broadcast %281 : vector<12x1xf32> to vector<12x128xf32>
    %283 = arith.addf %280, %282 : vector<12x128xf32>
    %cst_94 = arith.constant 0.000000e+00 : f32
    %284 = vector.broadcast %cst_94 : f32 to vector<12x128xf32>
    %285 = arith.maximumf %283, %284 : vector<12x128xf32>
    %286 = vector.extract_strided_slice %285 {offsets = [0, 0], sizes = [8, 128], strides = [1, 1]} : vector<12x128xf32> to vector<8x128xf32>
    %287 = vector.extract_strided_slice %285 {offsets = [8, 0], sizes = [4, 128], strides = [1, 1]} : vector<12x128xf32> to vector<4x128xf32>
    %c0_i32_95 = arith.constant 0 : i32
    %288 = tpu.memref_slice %arg22[%c0_i32_95] : memref<2x!tpu.dma_semaphore, #tpu.memory_space<semaphore_mem>> -> memref<1x!tpu.dma_semaphore, #tpu.memory_space<semaphore_mem>>
    %289 = tpu.memref_squeeze %288 : memref<1x!tpu.dma_semaphore, #tpu.memory_space<semaphore_mem>> -> memref<!tpu.dma_semaphore, #tpu.memory_space<semaphore_mem>>
    tpu.wait_dma2 semaphore(%289 : memref<!tpu.dma_semaphore, #tpu.memory_space<semaphore_mem>>) src(%arg12 : memref<8x65x128xf32, #tpu.memory_space<any>>) dst(%arg20 : memref<8x65x128xf32, #tpu.memory_space<vmem>>)
    %c0_96 = arith.constant 0 : index
    %c0_97 = arith.constant 0 : index
    %290 = vector.load %arg13[%c0_96, %c0_97] : memref<65x1xf32, #tpu.memory_space<vmem>>, vector<65x1xf32>
    %c0_98 = arith.constant 0 : index
    %c0_99 = arith.constant 0 : index
    %c0_100 = arith.constant 0 : index
    %291 = vector.load %arg20[%c0_98, %c0_99, %c0_100] : memref<8x65x128xf32, #tpu.memory_space<vmem>>, vector<1x65x128xf32>
    %292 = vector.shape_cast %291 : vector<1x65x128xf32> to vector<65x128xf32>
    %293 = vector.extract_strided_slice %286 {offsets = [0, 0], sizes = [1, 128], strides = [1, 1]} : vector<8x128xf32> to vector<1x128xf32>
    %294 = vector.broadcast %293 : vector<1x128xf32> to vector<65x128xf32>
    %295 = arith.mulf %292, %294 : vector<65x128xf32>
    %c1_101 = arith.constant 1 : index
    %c0_102 = arith.constant 0 : index
    %c0_103 = arith.constant 0 : index
    %296 = vector.load %arg20[%c1_101, %c0_102, %c0_103] : memref<8x65x128xf32, #tpu.memory_space<vmem>>, vector<1x65x128xf32>
    %297 = vector.shape_cast %296 : vector<1x65x128xf32> to vector<65x128xf32>
    %298 = vector.extract_strided_slice %286 {offsets = [1, 0], sizes = [1, 128], strides = [1, 1]} : vector<8x128xf32> to vector<1x128xf32>
    %299 = vector.broadcast %298 : vector<1x128xf32> to vector<65x128xf32>
    %300 = arith.mulf %297, %299 : vector<65x128xf32>
    %301 = arith.addf %295, %300 : vector<65x128xf32>
    %c2_104 = arith.constant 2 : index
    %c0_105 = arith.constant 0 : index
    %c0_106 = arith.constant 0 : index
    %302 = vector.load %arg20[%c2_104, %c0_105, %c0_106] : memref<8x65x128xf32, #tpu.memory_space<vmem>>, vector<1x65x128xf32>
    %303 = vector.shape_cast %302 : vector<1x65x128xf32> to vector<65x128xf32>
    %304 = vector.extract_strided_slice %286 {offsets = [2, 0], sizes = [1, 128], strides = [1, 1]} : vector<8x128xf32> to vector<1x128xf32>
    %305 = vector.broadcast %304 : vector<1x128xf32> to vector<65x128xf32>
    %306 = arith.mulf %303, %305 : vector<65x128xf32>
    %307 = arith.addf %301, %306 : vector<65x128xf32>
    %c3_107 = arith.constant 3 : index
    %c0_108 = arith.constant 0 : index
    %c0_109 = arith.constant 0 : index
    %308 = vector.load %arg20[%c3_107, %c0_108, %c0_109] : memref<8x65x128xf32, #tpu.memory_space<vmem>>, vector<1x65x128xf32>
    %309 = vector.shape_cast %308 : vector<1x65x128xf32> to vector<65x128xf32>
    %310 = vector.extract_strided_slice %286 {offsets = [3, 0], sizes = [1, 128], strides = [1, 1]} : vector<8x128xf32> to vector<1x128xf32>
    %311 = vector.broadcast %310 : vector<1x128xf32> to vector<65x128xf32>
    %312 = arith.mulf %309, %311 : vector<65x128xf32>
    %313 = arith.addf %307, %312 : vector<65x128xf32>
    %c4 = arith.constant 4 : index
    %c0_110 = arith.constant 0 : index
    %c0_111 = arith.constant 0 : index
    %314 = vector.load %arg20[%c4, %c0_110, %c0_111] : memref<8x65x128xf32, #tpu.memory_space<vmem>>, vector<1x65x128xf32>
    %315 = vector.shape_cast %314 : vector<1x65x128xf32> to vector<65x128xf32>
    %316 = vector.extract_strided_slice %286 {offsets = [4, 0], sizes = [1, 128], strides = [1, 1]} : vector<8x128xf32> to vector<1x128xf32>
    %317 = vector.broadcast %316 : vector<1x128xf32> to vector<65x128xf32>
    %318 = arith.mulf %315, %317 : vector<65x128xf32>
    %319 = arith.addf %313, %318 : vector<65x128xf32>
    %c5 = arith.constant 5 : index
    %c0_112 = arith.constant 0 : index
    %c0_113 = arith.constant 0 : index
    %320 = vector.load %arg20[%c5, %c0_112, %c0_113] : memref<8x65x128xf32, #tpu.memory_space<vmem>>, vector<1x65x128xf32>
    %321 = vector.shape_cast %320 : vector<1x65x128xf32> to vector<65x128xf32>
    %322 = vector.extract_strided_slice %286 {offsets = [5, 0], sizes = [1, 128], strides = [1, 1]} : vector<8x128xf32> to vector<1x128xf32>
    %323 = vector.broadcast %322 : vector<1x128xf32> to vector<65x128xf32>
    %324 = arith.mulf %321, %323 : vector<65x128xf32>
    %325 = arith.addf %319, %324 : vector<65x128xf32>
    %c6 = arith.constant 6 : index
    %c0_114 = arith.constant 0 : index
    %c0_115 = arith.constant 0 : index
    %326 = vector.load %arg20[%c6, %c0_114, %c0_115] : memref<8x65x128xf32, #tpu.memory_space<vmem>>, vector<1x65x128xf32>
    %327 = vector.shape_cast %326 : vector<1x65x128xf32> to vector<65x128xf32>
    %328 = vector.extract_strided_slice %286 {offsets = [6, 0], sizes = [1, 128], strides = [1, 1]} : vector<8x128xf32> to vector<1x128xf32>
    %329 = vector.broadcast %328 : vector<1x128xf32> to vector<65x128xf32>
    %330 = arith.mulf %327, %329 : vector<65x128xf32>
    %331 = arith.addf %325, %330 : vector<65x128xf32>
    %c7 = arith.constant 7 : index
    %c0_116 = arith.constant 0 : index
    %c0_117 = arith.constant 0 : index
    %332 = vector.load %arg20[%c7, %c0_116, %c0_117] : memref<8x65x128xf32, #tpu.memory_space<vmem>>, vector<1x65x128xf32>
    %333 = vector.shape_cast %332 : vector<1x65x128xf32> to vector<65x128xf32>
    %334 = vector.extract_strided_slice %286 {offsets = [7, 0], sizes = [1, 128], strides = [1, 1]} : vector<8x128xf32> to vector<1x128xf32>
    %335 = vector.broadcast %334 : vector<1x128xf32> to vector<65x128xf32>
    %336 = arith.mulf %333, %335 : vector<65x128xf32>
    %337 = arith.addf %331, %336 : vector<65x128xf32>
    %cst_118 = arith.constant dense<0.000000e+00> : vector<65x2xf32>
    %338 = tpu.matmul %337, %5, %cst_118 {dimension_numbers = #tpu.dot_dimension_numbers<[1], [0], [0], [1], [0, 0, 1, 1], [], []>} : vector<65x128xf32>, vector<128x2xf32>, vector<65x2xf32> -> vector<65x2xf32>
    %339 = vector.broadcast %290 : vector<65x1xf32> to vector<65x2xf32>
    %340 = arith.addf %338, %339 : vector<65x2xf32>
    %c0_119 = arith.constant 0 : index
    %c0_120 = arith.constant 0 : index
    %341 = vector.load %arg18[%c0_119, %c0_120] : memref<65x2xf32, #tpu.memory_space<vmem>>, vector<65x2xf32>
    tpu.vector_store %arg18[%c0_119, %c0_120], %340 {strides = array<i32>} : memref<65x2xf32, #tpu.memory_space<vmem>>, vector<65x2xf32>,
    %c1_i32_121 = arith.constant 1 : i32
    %342 = tpu.memref_slice %arg22[%c1_i32_121] : memref<2x!tpu.dma_semaphore, #tpu.memory_space<semaphore_mem>> -> memref<1x!tpu.dma_semaphore, #tpu.memory_space<semaphore_mem>>
    %343 = tpu.memref_squeeze %342 : memref<1x!tpu.dma_semaphore, #tpu.memory_space<semaphore_mem>> -> memref<!tpu.dma_semaphore, #tpu.memory_space<semaphore_mem>>
    tpu.wait_dma2 semaphore(%343 : memref<!tpu.dma_semaphore, #tpu.memory_space<semaphore_mem>>) src(%arg14 : memref<4x256x128xf32, #tpu.memory_space<any>>) dst(%arg21 : memref<4x256x128xf32, #tpu.memory_space<vmem>>)
    %c0_122 = arith.constant 0 : index
    %c0_123 = arith.constant 0 : index
    %344 = vector.load %arg15[%c0_122, %c0_123] : memref<256x1xf32, #tpu.memory_space<vmem>>, vector<256x1xf32>
    %c0_124 = arith.constant 0 : index
    %c0_125 = arith.constant 0 : index
    %c0_126 = arith.constant 0 : index
    %345 = vector.load %arg21[%c0_124, %c0_125, %c0_126] : memref<4x256x128xf32, #tpu.memory_space<vmem>>, vector<1x256x128xf32>
    %346 = vector.shape_cast %345 : vector<1x256x128xf32> to vector<256x128xf32>
    %347 = vector.extract_strided_slice %287 {offsets = [0, 0], sizes = [1, 128], strides = [1, 1]} : vector<4x128xf32> to vector<1x128xf32>
    %348 = vector.broadcast %347 : vector<1x128xf32> to vector<256x128xf32>
    %349 = arith.mulf %346, %348 : vector<256x128xf32>
    %c1_127 = arith.constant 1 : index
    %c0_128 = arith.constant 0 : index
    %c0_129 = arith.constant 0 : index
    %350 = vector.load %arg21[%c1_127, %c0_128, %c0_129] : memref<4x256x128xf32, #tpu.memory_space<vmem>>, vector<1x256x128xf32>
    %351 = vector.shape_cast %350 : vector<1x256x128xf32> to vector<256x128xf32>
    %352 = vector.extract_strided_slice %287 {offsets = [1, 0], sizes = [1, 128], strides = [1, 1]} : vector<4x128xf32> to vector<1x128xf32>
    %353 = vector.broadcast %352 : vector<1x128xf32> to vector<256x128xf32>
    %354 = arith.mulf %351, %353 : vector<256x128xf32>
    %355 = arith.addf %349, %354 : vector<256x128xf32>
    %c2_130 = arith.constant 2 : index
    %c0_131 = arith.constant 0 : index
    %c0_132 = arith.constant 0 : index
    %356 = vector.load %arg21[%c2_130, %c0_131, %c0_132] : memref<4x256x128xf32, #tpu.memory_space<vmem>>, vector<1x256x128xf32>
    %357 = vector.shape_cast %356 : vector<1x256x128xf32> to vector<256x128xf32>
    %358 = vector.extract_strided_slice %287 {offsets = [2, 0], sizes = [1, 128], strides = [1, 1]} : vector<4x128xf32> to vector<1x128xf32>
    %359 = vector.broadcast %358 : vector<1x128xf32> to vector<256x128xf32>
    %360 = arith.mulf %357, %359 : vector<256x128xf32>
    %361 = arith.addf %355, %360 : vector<256x128xf32>
    %c3_133 = arith.constant 3 : index
    %c0_134 = arith.constant 0 : index
    %c0_135 = arith.constant 0 : index
    %362 = vector.load %arg21[%c3_133, %c0_134, %c0_135] : memref<4x256x128xf32, #tpu.memory_space<vmem>>, vector<1x256x128xf32>
    %363 = vector.shape_cast %362 : vector<1x256x128xf32> to vector<256x128xf32>
    %364 = vector.extract_strided_slice %287 {offsets = [3, 0], sizes = [1, 128], strides = [1, 1]} : vector<4x128xf32> to vector<1x128xf32>
    %365 = vector.broadcast %364 : vector<1x128xf32> to vector<256x128xf32>
    %366 = arith.mulf %363, %365 : vector<256x128xf32>
    %367 = arith.addf %361, %366 : vector<256x128xf32>
    %cst_136 = arith.constant dense<0.000000e+00> : vector<256x2xf32>
    %368 = tpu.matmul %367, %5, %cst_136 {dimension_numbers = #tpu.dot_dimension_numbers<[1], [0], [0], [1], [0, 0, 1, 1], [], []>} : vector<256x128xf32>, vector<128x2xf32>, vector<256x2xf32> -> vector<256x2xf32>
    %369 = vector.broadcast %344 : vector<256x1xf32> to vector<256x2xf32>
    %370 = arith.addf %368, %369 : vector<256x2xf32>
    %cst_137 = arith.constant 0.000000e+00 : f32
    %371 = vector.broadcast %cst_137 : f32 to vector<256x2xf32>
    %372 = arith.maximumf %370, %371 : vector<256x2xf32>
    %c0_138 = arith.constant 0 : index
    %c0_139 = arith.constant 0 : index
    %373 = vector.load %arg16[%c0_138, %c0_139] : memref<1x256xf32, #tpu.memory_space<vmem>>, vector<1x256xf32>
    %cst_140 = arith.constant dense<0.000000e+00> : vector<1x2xf32>
    %374 = tpu.matmul %373, %372, %cst_140 {dimension_numbers = #tpu.dot_dimension_numbers<[1], [0], [0], [1], [0, 0, 1, 1], [], []>} : vector<1x256xf32>, vector<256x2xf32>, vector<1x2xf32> -> vector<1x2xf32>
    %c0_141 = arith.constant 0 : index
    %c0_142 = arith.constant 0 : index
    %375 = vector.load %arg17[%c0_141, %c0_142] : memref<1x1xf32, #tpu.memory_space<vmem>>, vector<1x1xf32>
    %376 = vector.broadcast %375 : vector<1x1xf32> to vector<1x2xf32>
    %377 = arith.addf %374, %376 : vector<1x2xf32>
    %378 = math.tanh %377 : vector<1x2xf32>
    %c0_143 = arith.constant 0 : index
    %c0_144 = arith.constant 0 : index
    %379 = vector.load %arg19[%c0_143, %c0_144] : memref<1x2xf32, #tpu.memory_space<vmem>>, vector<1x2xf32>
    tpu.vector_store %arg19[%c0_143, %c0_144], %378 {strides = array<i32>} : memref<1x2xf32, #tpu.memory_space<vmem>>, vector<1x2xf32>,
    return
  }
}

</mosaic_0001>

<bundles_post_ra>
// kernel: network_forward.1
= control target key start
LH: loop header
LB: loop body
LE: loop exit
PB: predicated region body
PF: predicated region fallthrough
CT: control target
= control target key end

     0   :  { %s7193_s0 = inlined_call_operand.vmem [shape: f32[8,128], index: 0, kind: input, shape index: {}]   ;;  %s7194_s1 = inlined_call_operand.vmem [shape: f32[9,1,128], index: 1, kind: input, shape index: {}]   ;;  %s7195_s2 = inlined_call_operand.vmem [shape: f32[128,2], index: 2, kind: input, shape index: {}]   ;;  %s7196_s3 = inlined_call_operand.vmem [shape: f32[32,72], index: 3, kind: input, shape index: {}]   ;;  %s7197_s4 = inlined_call_operand.vmem [shape: f32[32,1], index: 4, kind: input, shape index: {}]   ;;  %s7198_s5 = inlined_call_operand.vmem [shape: f32[32,1], index: 5, kind: input, shape index: {}]   ;;  %s7199_s6 = inlined_call_operand.vmem [shape: f32[4,32,288], index: 6, kind: input, shape index: {}]   ;;  %s7200_s7 = inlined_call_operand.vmem [shape: f32[4,32,1], index: 7, kind: input, shape index: {}]   ;;  %s7201_s8 = inlined_call_operand.vmem [shape: f32[4,32,1], index: 8, kind: input, shape index: {}]   ;;  %s7202_s9 = inlined_call_operand.vmem [shape: f32[12,32], index: 9, kind: input, shape index: {}]   ;;  %s7203_s10 = inlined_call_operand.vmem [shape: f32[12,1], index: 10, kind: input, shape index: {}]   ;;  %s7204_s11 = inlined_call_operand.vmem [shape: f32[12,1], index: 11, kind: input, shape index: {}]   ;;  %s7205_s12 = inlined_call_operand.vmem [shape: f32[8,65,128], index: 12, kind: input, shape index: {}]   ;;  %s7206_s13 = inlined_call_operand.vmem [shape: f32[65,1], index: 13, kind: input, shape index: {}]   ;;  %s7207_s14 = inlined_call_operand.vmem [shape: f32[4,256,128], index: 14, kind: input, shape index: {}]   ;;  %s7208_s15 = inlined_call_operand.vmem [shape: f32[256,1], index: 15, kind: input, shape index: {}]   ;;  %s7209_s16 = inlined_call_operand.vmem [shape: f32[1,256], index: 16, kind: input, shape index: {}]   ;;  %s7210_s17 = inlined_call_operand.<no memory space> [shape: f32[1,1], index: 17, kind: input, shape index: {}]   ;;  %s7211_s18 = inlined_call_operand.vmem [shape: f32[65,2], index: 18, kind: output, shape index: {0}]   ;;  %s7212_s19 = inlined_call_operand.hbm [shape: f32[1,2], index: 19, kind: output, shape index: {1}]  }
   0x1   :  { %7243 = sst [smem:[#allocation143_spill]] %s7193_s0  ;;  %v25_v0 = vstv %s7210_s17 }
   0x2   :  { %7244 = sst [smem:[#allocation144_spill]] %s7194_s1  ;;  %26 = vst [vmem:[#allocation5] sm:$0x1] %v25_v0 }
   0x3   :  { %7245 = sst [smem:[#allocation145_spill]] %s7195_s2 }
   0x4   :  { %7246 = sst [smem:[#allocation146_spill]] %s7196_s3 }
   0x5   :  { %27 = vsyncpa [#allocation7], 0  ;;  %v112_v1 = vld [vmem:[%s7205_s12] sm:$0xff]  ;;  %v114_v2 = vld [vmem:[%s7205_s12 + $0x8] sm:$0xff] }
   0x6   :  { %113 = vst [vmem:[#allocation2 + $0xe0] sm:$0xff] %v112_v1  ;;  %115 = vst [vmem:[#allocation2 + $0x8] sm:$0xff] %v114_v2  ;;  %v116_v3 = vld [vmem:[%s7205_s12 + $0x10] sm:$0xff]  ;;  %v118_v4 = vld [vmem:[%s7205_s12 + $0x18] sm:$0xff] }
   0x7   :  { %v120_v5 = vld [vmem:[%s7205_s12 + $0x20] sm:$0xff]  ;;  %117 = vst [vmem:[#allocation2 + $0x48] sm:$0xff] %v116_v3  ;;  %119 = vst [vmem:[#allocation2 + $0x28] sm:$0xff] %v118_v4  ;;  %v122_v6 = vld [vmem:[%s7205_s12 + $0x28] sm:$0xff] }
   0x8   :  { %121 = vst [vmem:[#allocation2 + $0x100] sm:$0xff] %v120_v5  ;;  %v124_v7 = vld [vmem:[%s7205_s12 + $0x30] sm:$0xff]  ;;  %v126_v8 = vld [vmem:[%s7205_s12 + $0x38] sm:$0xff]  ;;  %123 = vst [vmem:[#allocation2 + $0x108] sm:$0xff] %v122_v6 }
   0x9   :  { %125 = vst [vmem:[#allocation2 + $0x78] sm:$0xff] %v124_v7  ;;  %127 = vst [vmem:[#allocation2 + $0x140] sm:$0xff] %v126_v8  ;;  %v128_v9 = vld [vmem:[%s7205_s12 + $0x48] sm:$0xff]  ;;  %v130_v10 = vld [vmem:[%s7205_s12 + $0x50] sm:$0xff] }
   0xa   :  { %v132_v11 = vld [vmem:[%s7205_s12 + $0x58] sm:$0xff]  ;;  %129 = vst [vmem:[#allocation2 + $0xf0] sm:$0xff] %v128_v9  ;;  %131 = vst [vmem:[#allocation2 + $0x18] sm:$0xff] %v130_v10  ;;  %v134_v12 = vld [vmem:[%s7205_s12 + $0x60] sm:$0xff] }
   0xb   :  { %133 = vst [vmem:[#allocation2 + $0xc0] sm:$0xff] %v132_v11  ;;  %v136_v13 = vld [vmem:[%s7205_s12 + $0x68] sm:$0xff]  ;;  %v138_v14 = vld [vmem:[%s7205_s12 + $0x70] sm:$0xff]  ;;  %135 = vst [vmem:[#allocation2 + $0x180] sm:$0xff] %v134_v12 }
   0xc   :  { %137 = vst [vmem:[#allocation2 + $0x128] sm:$0xff] %v136_v13  ;;  %139 = vst [vmem:[#allocation2 + $0x130] sm:$0xff] %v138_v14  ;;  %v140_v15 = vld [vmem:[%s7205_s12 + $0x78] sm:$0xff]  ;;  %v142_v16 = vld [vmem:[%s7205_s12 + $0x80] sm:$0xff] }
   0xd   :  { %v144_v17 = vld [vmem:[%s7205_s12 + $0x90] sm:$0xff]  ;;  %141 = vst [vmem:[#allocation2 + $0x230] sm:$0xff] %v140_v15  ;;  %143 = vst [vmem:[#allocation2 + $0xc8] sm:$0xff] %v142_v16  ;;  %v146_v18 = vld [vmem:[%s7205_s12 + $0x98] sm:$0xff] }
   0xe   :  { %145 = vst [vmem:[#allocation2 + $0x1b0] sm:$0xff] %v144_v17  ;;  %v148_v19 = vld [vmem:[%s7205_s12 + $0xa0] sm:$0xff]  ;;  %v150_v20 = vld [vmem:[%s7205_s12 + $0xa8] sm:$0xff]  ;;  %147 = vst [vmem:[#allocation2 + $0x1c0] sm:$0xff] %v146_v18 }
   0xf   :  { %149 = vst [vmem:[#allocation2 + $0x168] sm:$0xff] %v148_v19  ;;  %151 = vst [vmem:[#allocation2 + $0x1f8] sm:$0xff] %v150_v20  ;;  %v152_v21 = vld [vmem:[%s7205_s12 + $0xb0] sm:$0xff]  ;;  %v154_v22 = vld [vmem:[%s7205_s12 + $0xb8] sm:$0xff] }
  0x10   :  { %v156_v23 = vld [vmem:[%s7205_s12 + $0xc0] sm:$0xff]  ;;  %153 = vst [vmem:[#allocation2 + $0xe8] sm:$0xff] %v152_v21  ;;  %155 = vst [vmem:[#allocation2 + $0x158] sm:$0xff] %v154_v22  ;;  %v158_v24 = vld [vmem:[%s7205_s12 + $0xc8] sm:$0xff] }
  0x11   :  { %157 = vst [vmem:[#allocation2 + $0x68] sm:$0xff] %v156_v23  ;;  %v160_v25 = vld [vmem:[%s7205_s12 + $0xd8] sm:$0xff]  ;;  %v162_v26 = vld [vmem:[%s7205_s12 + $0xe0] sm:$0xff]  ;;  %159 = vst [vmem:[#allocation2 + $0x1e8] sm:$0xff] %v158_v24 }
  0x12   :  { %161 = vst [vmem:[#allocation2 + $0x98] sm:$0xff] %v160_v25  ;;  %163 = vst [vmem:[#allocation2] sm:$0xff] %v162_v26  ;;  %v164_v27 = vld [vmem:[%s7205_s12 + $0xe8] sm:$0xff]  ;;  %v166_v28 = vld [vmem:[%s7205_s12 + $0xf0] sm:$0xff] }
  0x13   :  { %v168_v29 = vld [vmem:[%s7205_s12 + $0xf8] sm:$0xff]  ;;  %165 = vst [vmem:[#allocation2 + $0x1b8] sm:$0xff] %v164_v27  ;;  %167 = vst [vmem:[#allocation2 + $0x38] sm:$0xff] %v166_v28  ;;  %v170_v30 = vld [vmem:[%s7205_s12 + $0x100] sm:$0xff] }
  0x14   :  { %169 = vst [vmem:[#allocation2 + $0x1d8] sm:$0xff] %v168_v29  ;;  %v172_v31 = vld [vmem:[%s7205_s12 + $0x108] sm:$0xff]  ;;  %v174_v32 = vld [vmem:[%s7205_s12 + $0x110] sm:$0xff]  ;;  %171 = vst [vmem:[#allocation2 + $0x160] sm:$0xff] %v170_v30 }
  0x15   :  { %173 = vst [vmem:[#allocation2 + $0x220] sm:$0xff] %v172_v31  ;;  %175 = vst [vmem:[#allocation2 + $0x200] sm:$0xff] %v174_v32  ;;  %v176_v33 = vld [vmem:[%s7205_s12 + $0x120] sm:$0xff]  ;;  %v178_v34 = vld [vmem:[%s7205_s12 + $0x128] sm:$0xff] }
  0x16   :  { %v180_v35 = vld [vmem:[%s7205_s12 + $0x130] sm:$0xff]  ;;  %177 = vst [vmem:[#allocation2 + $0x90] sm:$0xff] %v176_v33  ;;  %179 = vst [vmem:[#allocation2 + $0x110] sm:$0xff] %v178_v34  ;;  %v182_v36 = vld [vmem:[%s7205_s12 + $0x138] sm:$0xff] }
  0x17   :  { %181 = vst [vmem:[#allocation2 + $0x80] sm:$0xff] %v180_v35  ;;  %v184_v37 = vld [vmem:[%s7205_s12 + $0x140] sm:$0xff]  ;;  %v186_v38 = vld [vmem:[%s7205_s12 + $0x148] sm:$0xff]  ;;  %183 = vst [vmem:[#allocation2 + $0x198] sm:$0xff] %v182_v36 }
  0x18   :  { %185 = vst [vmem:[#allocation2 + $0x1c8] sm:$0xff] %v184_v37  ;;  %187 = vst [vmem:[#allocation2 + $0xf8] sm:$0xff] %v186_v38  ;;  %v188_v39 = vld [vmem:[%s7205_s12 + $0x150] sm:$0xff]  ;;  %v190_v40 = vld [vmem:[%s7205_s12 + $0x158] sm:$0xff] }
  0x19   :  { %v192_v41 = vld [vmem:[%s7205_s12 + $0x168] sm:$0xff]  ;;  %189 = vst [vmem:[#allocation2 + $0x218] sm:$0xff] %v188_v39  ;;  %191 = vst [vmem:[#allocation2 + $0x228] sm:$0xff] %v190_v40  ;;  %v194_v42 = vld [vmem:[%s7205_s12 + $0x170] sm:$0xff] }
  0x1a   :  { %193 = vst [vmem:[#allocation2 + $0x50] sm:$0xff] %v192_v41  ;;  %v196_v43 = vld [vmem:[%s7205_s12 + $0x178] sm:$0xff]  ;;  %v198_v44 = vld [vmem:[%s7205_s12 + $0x180] sm:$0xff]  ;;  %195 = vst [vmem:[#allocation2 + $0xa8] sm:$0xff] %v194_v42 }
  0x1b   :  { %197 = vst [vmem:[#allocation2 + $0x238] sm:$0xff] %v196_v43  ;;  %199 = vst [vmem:[#allocation2 + $0x188] sm:$0xff] %v198_v44  ;;  %v200_v45 = vld [vmem:[%s7205_s12 + $0x188] sm:$0xff]  ;;  %v202_v46 = vld [vmem:[%s7205_s12 + $0x190] sm:$0xff] }
  0x1c   :  { %v204_v47 = vld [vmem:[%s7205_s12 + $0x198] sm:$0xff]  ;;  %201 = vst [vmem:[#allocation2 + $0x58] sm:$0xff] %v200_v45  ;;  %203 = vst [vmem:[#allocation2 + $0x120] sm:$0xff] %v202_v46  ;;  %v206_v48 = vld [vmem:[%s7205_s12 + $0x1a0] sm:$0xff] }
  0x1d   :  { %205 = vst [vmem:[#allocation2 + $0x30] sm:$0xff] %v204_v47  ;;  %v208_v49 = vld [vmem:[%s7205_s12 + $0x1b0] sm:$0xff]  ;;  %v210_v50 = vld [vmem:[%s7205_s12 + $0x1b8] sm:$0xff]  ;;  %207 = vst [vmem:[#allocation2 + $0x1e0] sm:$0xff] %v206_v48 }
  0x1e   :  { %209 = vst [vmem:[#allocation2 + $0xa0] sm:$0xff] %v208_v49  ;;  %211 = vst [vmem:[#allocation2 + $0x150] sm:$0xff] %v210_v50  ;;  %v212_v51 = vld [vmem:[%s7205_s12 + $0x1c0] sm:$0xff]  ;;  %v214_v52 = vld [vmem:[%s7205_s12 + $0x1c8] sm:$0xff] }
  0x1f   :  { %v216_v53 = vld [vmem:[%s7205_s12 + $0x1d0] sm:$0xff]  ;;  %213 = vst [vmem:[#allocation2 + $0x70] sm:$0xff] %v212_v51  ;;  %215 = vst [vmem:[#allocation2 + $0x1f0] sm:$0xff] %v214_v52  ;;  %v218_v54 = vld [vmem:[%s7205_s12 + $0x1d8] sm:$0xff] }
  0x20   :  { %217 = vst [vmem:[#allocation2 + $0x210] sm:$0xff] %v216_v53  ;;  %v220_v55 = vld [vmem:[%s7205_s12 + $0x1e0] sm:$0xff]  ;;  %v222_v56 = vld [vmem:[%s7205_s12 + $0x1e8] sm:$0xff]  ;;  %219 = vst [vmem:[#allocation2 + $0x1a8] sm:$0xff] %v218_v54 }
  0x21   :  { %221 = vst [vmem:[#allocation2 + $0x118] sm:$0xff] %v220_v55  ;;  %223 = vst [vmem:[#allocation2 + $0x40] sm:$0xff] %v222_v56  ;;  %v224_v57 = vld [vmem:[%s7205_s12 + $0x1f8] sm:$0xff]  ;;  %v226_v58 = vld [vmem:[%s7205_s12 + $0x200] sm:$0xff] }
  0x22   :  { %v228_v59 = vld [vmem:[%s7205_s12 + $0x208] sm:$0xff]  ;;  %225 = vst [vmem:[#allocation2 + $0x10] sm:$0xff] %v224_v57  ;;  %227 = vst [vmem:[#allocation2 + $0x148] sm:$0xff] %v226_v58  ;;  %v230_v60 = vld [vmem:[%s7205_s12 + $0x210] sm:$0xff] }
  0x23   :  { %229 = vst [vmem:[#allocation2 + $0x1a0] sm:$0xff] %v228_v59  ;;  %v232_v61 = vld [vmem:[%s7205_s12 + $0x218] sm:$0xff]  ;;  %v234_v62 = vld [vmem:[%s7205_s12 + $0x220] sm:$0xff]  ;;  %231 = vst [vmem:[#allocation2 + $0x88] sm:$0xff] %v230_v60 }
  0x24   :  { %233 = vst [vmem:[#allocation2 + $0xd0] sm:$0xff] %v232_v61  ;;  %235 = vst [vmem:[#allocation2 + $0x208] sm:$0xff] %v234_v62  ;;  %v236_v63 = vld [vmem:[%s7205_s12 + $0x228] sm:$0xff]  ;;  %v238_v0 = vld [vmem:[%s7205_s12 + $0x230] sm:$0xff] }
  0x25   :  { %v3754_v1 = vld [vmem:[%s7205_s12 + $0x40] sm:$0x1]  ;;  %237 = vst [vmem:[#allocation2 + $0x190] sm:$0xff] %v236_v63  ;;  %239 = vst [vmem:[#allocation2 + $0xd8] sm:$0xff] %v238_v0  ;;  %v3755_v2 = vld [vmem:[%s7205_s12 + $0x88] sm:$0x1] }
  0x26   :  { %251 = vst [vmem:[#allocation2 + $0x1d0] sm:$0x1] %v3754_v1  ;;  %v3756_v3 = vld [vmem:[%s7205_s12 + $0xd0] sm:$0x1]  ;;  %v3757_v4 = vld [vmem:[%s7205_s12 + $0x118] sm:$0x1] }
  0x27   :  { %253 = vst [vmem:[#allocation2 + $0x60] sm:$0x1] %v3755_v2  ;;  %255 = vst [vmem:[#allocation2 + $0x138] sm:$0x1] %v3756_v3  ;;  %v3758_v5 = vld [vmem:[%s7205_s12 + $0x160] sm:$0x1] }
  0x28   :  { %257 = vst [vmem:[#allocation2 + $0x20] sm:$0x1] %v3757_v4  ;;  %v3759_v6 = vld [vmem:[%s7205_s12 + $0x1a8] sm:$0x1]  ;;  %v3760_v7 = vld [vmem:[%s7205_s12 + $0x1f0] sm:$0x1] }
  0x29   :  { %259 = vst [vmem:[#allocation2 + $0x170] sm:$0x1] %v3758_v5  ;;  %261 = vst [vmem:[#allocation2 + $0xb8] sm:$0x1] %v3759_v6  ;;  %v3761_v8 = vld [vmem:[%s7205_s12 + $0x238] sm:$0x1] }
  0x2a   :  { %263 = vst [vmem:[#allocation2 + $0x178] sm:$0x1] %v3760_v7  ;;  %265 = vst [vmem:[#allocation2 + $0xb0] sm:$0x1] %v3761_v8 }
  0x2b   :  { %269 = vsyncadd [#allocation4], 8320  ;;  %v4807_v9 = vld [vmem:[%s7207_s14] sm:$0xff]  ;;  %v4812_v10 = vld [vmem:[%s7207_s14 + $0x8] sm:$0xff]  ;;  %s7368_s22 = sld [smem:[#allocation143_spill]] }
  0x2c   :  { %v4817_v11 = vld [vmem:[%s7207_s14 + $0x10] sm:$0xff]  ;;  %v4822_v12 = vld [vmem:[%s7207_s14 + $0x18] sm:$0xff]  ;;  %v4827_v13 = vld [vmem:[%s7207_s14 + $0x20] sm:$0xff] }
  0x2d   :  { %7247 = vst [vmem:[#allocation13_spill] sm:$0xff] %v4822_v12  ;;  %7248 = vst [vmem:[#allocation14_spill] sm:$0xff] %v4827_v13  ;;  %v4832_v14 = vld [vmem:[%s7207_s14 + $0x28] sm:$0xff]  ;;  %v4837_v15 = vld [vmem:[%s7207_s14 + $0x30] sm:$0xff] }
  0x2e   :  { %7249 = vst [vmem:[#allocation15_spill] sm:$0xff] %v4832_v14  ;;  %7250 = vst [vmem:[#allocation16_spill] sm:$0xff] %v4837_v15  ;;  %v4842_v16 = vld [vmem:[%s7207_s14 + $0x38] sm:$0xff]  ;;  %v4847_v17 = vld [vmem:[%s7207_s14 + $0x40] sm:$0xff] }
  0x2f   :  { %7251 = vst [vmem:[#allocation17_spill] sm:$0xff] %v4842_v16  ;;  %7252 = vst [vmem:[#allocation18_spill] sm:$0xff] %v4847_v17  ;;  %v4852_v18 = vld [vmem:[%s7207_s14 + $0x48] sm:$0xff]  ;;  %v4857_v19 = vld [vmem:[%s7207_s14 + $0x50] sm:$0xff] }
  0x30   :  { %7253 = vst [vmem:[#allocation19_spill] sm:$0xff] %v4852_v18  ;;  %7254 = vst [vmem:[#allocation20_spill] sm:$0xff] %v4857_v19  ;;  %v4862_v20 = vld [vmem:[%s7207_s14 + $0x58] sm:$0xff]  ;;  %v4867_v21 = vld [vmem:[%s7207_s14 + $0x60] sm:$0xff] }
  0x31   :  { %7255 = vst [vmem:[#allocation21_spill] sm:$0xff] %v4862_v20  ;;  %7256 = vst [vmem:[#allocation22_spill] sm:$0xff] %v4867_v21  ;;  %v4872_v22 = vld [vmem:[%s7207_s14 + $0x68] sm:$0xff]  ;;  %v4877_v23 = vld [vmem:[%s7207_s14 + $0x70] sm:$0xff] }
  0x32   :  { %7257 = vst [vmem:[#allocation23_spill] sm:$0xff] %v4872_v22  ;;  %7258 = vst [vmem:[#allocation24_spill] sm:$0xff] %v4877_v23  ;;  %v4882_v24 = vld [vmem:[%s7207_s14 + $0x78] sm:$0xff]  ;;  %v4887_v25 = vld [vmem:[%s7207_s14 + $0x80] sm:$0xff] }
  0x33   :  { %7259 = vst [vmem:[#allocation25_spill] sm:$0xff] %v4882_v24  ;;  %7260 = vst [vmem:[#allocation26_spill] sm:$0xff] %v4887_v25  ;;  %v4892_v26 = vld [vmem:[%s7207_s14 + $0x88] sm:$0xff]  ;;  %v4897_v27 = vld [vmem:[%s7207_s14 + $0x90] sm:$0xff] }
  0x34   :  { %7261 = vst [vmem:[#allocation27_spill] sm:$0xff] %v4892_v26  ;;  %7262 = vst [vmem:[#allocation28_spill] sm:$0xff] %v4897_v27  ;;  %v4902_v28 = vld [vmem:[%s7207_s14 + $0x98] sm:$0xff]  ;;  %v4907_v29 = vld [vmem:[%s7207_s14 + $0xa0] sm:$0xff] }
  0x35   :  { %7263 = vst [vmem:[#allocation29_spill] sm:$0xff] %v4902_v28  ;;  %7264 = vst [vmem:[#allocation30_spill] sm:$0xff] %v4907_v29  ;;  %v4912_v30 = vld [vmem:[%s7207_s14 + $0xa8] sm:$0xff]  ;;  %v4917_v31 = vld [vmem:[%s7207_s14 + $0xb0] sm:$0xff] }
  0x36   :  { %7265 = vst [vmem:[#allocation31_spill] sm:$0xff] %v4912_v30  ;;  %7266 = vst [vmem:[#allocation32_spill] sm:$0xff] %v4917_v31  ;;  %v4922_v32 = vld [vmem:[%s7207_s14 + $0xb8] sm:$0xff]  ;;  %v4927_v33 = vld [vmem:[%s7207_s14 + $0xc0] sm:$0xff] }
  0x37   :  { %7267 = vst [vmem:[#allocation33_spill] sm:$0xff] %v4922_v32  ;;  %7268 = vst [vmem:[#allocation34_spill] sm:$0xff] %v4927_v33  ;;  %v4932_v34 = vld [vmem:[%s7207_s14 + $0xc8] sm:$0xff]  ;;  %v4937_v35 = vld [vmem:[%s7207_s14 + $0xd0] sm:$0xff] }
  0x38   :  { %7269 = vst [vmem:[#allocation35_spill] sm:$0xff] %v4932_v34  ;;  %7270 = vst [vmem:[#allocation36_spill] sm:$0xff] %v4937_v35  ;;  %v4942_v36 = vld [vmem:[%s7207_s14 + $0xd8] sm:$0xff]  ;;  %v4947_v37 = vld [vmem:[%s7207_s14 + $0xe0] sm:$0xff] }
  0x39   :  { %7271 = vst [vmem:[#allocation37_spill] sm:$0xff] %v4942_v36  ;;  %7272 = vst [vmem:[#allocation38_spill] sm:$0xff] %v4947_v37  ;;  %v4952_v38 = vld [vmem:[%s7207_s14 + $0xe8] sm:$0xff]  ;;  %v4957_v39 = vld [vmem:[%s7207_s14 + $0xf0] sm:$0xff] }
  0x3a   :  { %7273 = vst [vmem:[#allocation39_spill] sm:$0xff] %v4952_v38  ;;  %7274 = vst [vmem:[#allocation40_spill] sm:$0xff] %v4957_v39  ;;  %v4962_v40 = vld [vmem:[%s7207_s14 + $0xf8] sm:$0xff]  ;;  %v4967_v41 = vld [vmem:[%s7207_s14 + $0x100] sm:$0xff] }
  0x3b   :  { %7275 = vst [vmem:[#allocation41_spill] sm:$0xff] %v4962_v40  ;;  %v4972_v42 = vld [vmem:[%s7207_s14 + $0x108] sm:$0xff]  ;;  %v4977_v43 = vld [vmem:[%s7207_s14 + $0x110] sm:$0xff]  ;;  %v4982_v44 = vld [vmem:[%s7207_s14 + $0x118] sm:$0xff] }
  0x3c   :  { %7276 = vst [vmem:[#allocation42_spill] sm:$0xff] %v4977_v43  ;;  %7277 = vst [vmem:[#allocation43_spill] sm:$0xff] %v4982_v44  ;;  %v4987_v45 = vld [vmem:[%s7207_s14 + $0x120] sm:$0xff]  ;;  %v4992_v46 = vld [vmem:[%s7207_s14 + $0x128] sm:$0xff] }
  0x3d   :  { %7278 = vst [vmem:[#allocation44_spill] sm:$0xff] %v4987_v45  ;;  %7279 = vst [vmem:[#allocation45_spill] sm:$0xff] %v4992_v46  ;;  %v4997_v47 = vld [vmem:[%s7207_s14 + $0x130] sm:$0xff]  ;;  %v5002_v48 = vld [vmem:[%s7207_s14 + $0x138] sm:$0xff] }
  0x3e   :  { %7280 = vst [vmem:[#allocation46_spill] sm:$0xff] %v4997_v47  ;;  %7281 = vst [vmem:[#allocation47_spill] sm:$0xff] %v5002_v48  ;;  %v5007_v49 = vld [vmem:[%s7207_s14 + $0x140] sm:$0xff]  ;;  %v5012_v50 = vld [vmem:[%s7207_s14 + $0x148] sm:$0xff] }
  0x3f   :  { %7282 = vst [vmem:[#allocation48_spill] sm:$0xff] %v5007_v49  ;;  %7283 = vst [vmem:[#allocation49_spill] sm:$0xff] %v5012_v50  ;;  %v5017_v51 = vld [vmem:[%s7207_s14 + $0x150] sm:$0xff]  ;;  %v5022_v52 = vld [vmem:[%s7207_s14 + $0x158] sm:$0xff] }
  0x40   :  { %7284 = vst [vmem:[#allocation50_spill] sm:$0xff] %v5017_v51  ;;  %7285 = vst [vmem:[#allocation51_spill] sm:$0xff] %v5022_v52  ;;  %v5027_v53 = vld [vmem:[%s7207_s14 + $0x160] sm:$0xff]  ;;  %v5032_v54 = vld [vmem:[%s7207_s14 + $0x168] sm:$0xff] }
  0x41   :  { %7286 = vst [vmem:[#allocation52_spill] sm:$0xff] %v5027_v53  ;;  %7287 = vst [vmem:[#allocation53_spill] sm:$0xff] %v5032_v54  ;;  %v5037_v55 = vld [vmem:[%s7207_s14 + $0x170] sm:$0xff]  ;;  %v5042_v56 = vld [vmem:[%s7207_s14 + $0x178] sm:$0xff] }
  0x42   :  { %7288 = vst [vmem:[#allocation54_spill] sm:$0xff] %v5037_v55  ;;  %7289 = vst [vmem:[#allocation55_spill] sm:$0xff] %v5042_v56  ;;  %v5047_v57 = vld [vmem:[%s7207_s14 + $0x180] sm:$0xff]  ;;  %v5052_v58 = vld [vmem:[%s7207_s14 + $0x188] sm:$0xff] }
  0x43   :  { %7290 = vst [vmem:[#allocation56_spill] sm:$0xff] %v5047_v57  ;;  %7291 = vst [vmem:[#allocation57_spill] sm:$0xff] %v5052_v58  ;;  %v5057_v59 = vld [vmem:[%s7207_s14 + $0x190] sm:$0xff]  ;;  %v5062_v60 = vld [vmem:[%s7207_s14 + $0x198] sm:$0xff] }
  0x44   :  { %7292 = vst [vmem:[#allocation58_spill] sm:$0xff] %v5057_v59  ;;  %7293 = vst [vmem:[#allocation59_spill] sm:$0xff] %v5062_v60  ;;  %v5067_v61 = vld [vmem:[%s7207_s14 + $0x1a0] sm:$0xff]  ;;  %v5072_v62 = vld [vmem:[%s7207_s14 + $0x1a8] sm:$0xff] }
  0x45   :  { %7294 = vst [vmem:[#allocation60_spill] sm:$0xff] %v5067_v61  ;;  %7295 = vst [vmem:[#allocation61_spill] sm:$0xff] %v5072_v62  ;;  %v5077_v63 = vld [vmem:[%s7207_s14 + $0x1b0] sm:$0xff]  ;;  %v5082_v0 = vld [vmem:[%s7207_s14 + $0x1b8] sm:$0xff] }
  0x46   :  { %7296 = vst [vmem:[#allocation62_spill] sm:$0xff] %v5077_v63  ;;  %7297 = vst [vmem:[#allocation63_spill] sm:$0xff] %v5082_v0  ;;  %v5087_v1 = vld [vmem:[%s7207_s14 + $0x1c0] sm:$0xff]  ;;  %v5092_v2 = vld [vmem:[%s7207_s14 + $0x1c8] sm:$0xff] }
  0x47   :  { %7298 = vst [vmem:[#allocation64_spill] sm:$0xff] %v5087_v1  ;;  %7299 = vst [vmem:[#allocation65_spill] sm:$0xff] %v5092_v2  ;;  %v5097_v3 = vld [vmem:[%s7207_s14 + $0x1d0] sm:$0xff]  ;;  %v5102_v4 = vld [vmem:[%s7207_s14 + $0x1d8] sm:$0xff] }
  0x48   :  { %7300 = vst [vmem:[#allocation66_spill] sm:$0xff] %v5097_v3  ;;  %7301 = vst [vmem:[#allocation67_spill] sm:$0xff] %v5102_v4  ;;  %v5107_v5 = vld [vmem:[%s7207_s14 + $0x1e0] sm:$0xff]  ;;  %v5112_v6 = vld [vmem:[%s7207_s14 + $0x1e8] sm:$0xff] }
  0x49   :  { %7302 = vst [vmem:[#allocation68_spill] sm:$0xff] %v5107_v5  ;;  %7303 = vst [vmem:[#allocation69_spill] sm:$0xff] %v5112_v6  ;;  %v5117_v7 = vld [vmem:[%s7207_s14 + $0x1f0] sm:$0xff]  ;;  %v5122_v8 = vld [vmem:[%s7207_s14 + $0x1f8] sm:$0xff] }
  0x4a   :  { %7304 = vst [vmem:[#allocation70_spill] sm:$0xff] %v5117_v7  ;;  %7305 = vst [vmem:[#allocation71_spill] sm:$0xff] %v5122_v8  ;;  %v5127_v40 = vld [vmem:[%s7207_s14 + $0x200] sm:$0xff]  ;;  %v5132_v39 = vld [vmem:[%s7207_s14 + $0x208] sm:$0xff] }
  0x4b   :  { %7306 = vst [vmem:[#allocation72_spill] sm:$0xff] %v5132_v39  ;;  %v5137_v6 = vld [vmem:[%s7207_s14 + $0x210] sm:$0xff]  ;;  %v5142_v7 = vld [vmem:[%s7207_s14 + $0x218] sm:$0xff]  ;;  %v5147_v8 = vld [vmem:[%s7207_s14 + $0x220] sm:$0xff] }
  0x4c   :  { %7307 = vst [vmem:[#allocation73_spill] sm:$0xff] %v5137_v6  ;;  %7308 = vst [vmem:[#allocation74_spill] sm:$0xff] %v5142_v7  ;;  %v5152_v38 = vld [vmem:[%s7207_s14 + $0x228] sm:$0xff]  ;;  %v5157_v5 = vld [vmem:[%s7207_s14 + $0x230] sm:$0xff] }
  0x4d   :  { %7309 = vst [vmem:[#allocation75_spill] sm:$0xff] %v5147_v8  ;;  %7310 = vst [vmem:[#allocation76_spill] sm:$0xff] %v5152_v38  ;;  %v5162_v37 = vld [vmem:[%s7207_s14 + $0x238] sm:$0xff]  ;;  %v5167_v4 = vld [vmem:[%s7207_s14 + $0x240] sm:$0xff] }
  0x4e   :  { %7311 = vst [vmem:[#allocation77_spill] sm:$0xff] %v5157_v5  ;;  %7312 = vst [vmem:[#allocation78_spill] sm:$0xff] %v5162_v37  ;;  %v5172_v36 = vld [vmem:[%s7207_s14 + $0x248] sm:$0xff]  ;;  %v5177_v3 = vld [vmem:[%s7207_s14 + $0x250] sm:$0xff] }
  0x4f   :  { %7313 = vst [vmem:[#allocation79_spill] sm:$0xff] %v5167_v4  ;;  %7314 = vst [vmem:[#allocation80_spill] sm:$0xff] %v5172_v36  ;;  %v5182_v35 = vld [vmem:[%s7207_s14 + $0x258] sm:$0xff]  ;;  %v5187_v2 = vld [vmem:[%s7207_s14 + $0x260] sm:$0xff] }
  0x50   :  { %7315 = vst [vmem:[#allocation81_spill] sm:$0xff] %v5177_v3  ;;  %7316 = vst [vmem:[#allocation82_spill] sm:$0xff] %v5182_v35  ;;  %v5192_v34 = vld [vmem:[%s7207_s14 + $0x268] sm:$0xff]  ;;  %v5197_v1 = vld [vmem:[%s7207_s14 + $0x270] sm:$0xff] }
  0x51   :  { %7317 = vst [vmem:[#allocation83_spill] sm:$0xff] %v5187_v2  ;;  %7318 = vst [vmem:[#allocation84_spill] sm:$0xff] %v5192_v34  ;;  %v5202_v33 = vld [vmem:[%s7207_s14 + $0x278] sm:$0xff]  ;;  %v5207_v0 = vld [vmem:[%s7207_s14 + $0x280] sm:$0xff] }
  0x52   :  { %7319 = vst [vmem:[#allocation85_spill] sm:$0xff] %v5197_v1  ;;  %7320 = vst [vmem:[#allocation86_spill] sm:$0xff] %v5202_v33  ;;  %v5212_v32 = vld [vmem:[%s7207_s14 + $0x288] sm:$0xff]  ;;  %v5217_v62 = vld [vmem:[%s7207_s14 + $0x290] sm:$0xff] }
  0x53   :  { %7321 = vst [vmem:[#allocation87_spill] sm:$0xff] %v5207_v0  ;;  %7322 = vst [vmem:[#allocation88_spill] sm:$0xff] %v5212_v32  ;;  %v5222_v63 = vld [vmem:[%s7207_s14 + $0x298] sm:$0xff]  ;;  %v5227_v30 = vld [vmem:[%s7207_s14 + $0x2a0] sm:$0xff] }
  0x54   :  { %7323 = vst [vmem:[#allocation89_spill] sm:$0xff] %v5217_v62  ;;  %7324 = vst [vmem:[#allocation90_spill] sm:$0xff] %v5222_v63  ;;  %v5232_v31 = vld [vmem:[%s7207_s14 + $0x2a8] sm:$0xff]  ;;  %v5237_v61 = vld [vmem:[%s7207_s14 + $0x2b0] sm:$0xff] }
  0x55   :  { %7325 = vst [vmem:[#allocation91_spill] sm:$0xff] %v5227_v30  ;;  %7326 = vst [vmem:[#allocation92_spill] sm:$0xff] %v5232_v31  ;;  %v5242_v29 = vld [vmem:[%s7207_s14 + $0x2b8] sm:$0xff]  ;;  %v5247_v63 = vld [vmem:[%s7207_s14 + $0x2c0] sm:$0xff] }
  0x56   :  { %7327 = vst [vmem:[#allocation93_spill] sm:$0xff] %v5237_v61  ;;  %7328 = vst [vmem:[#allocation94_spill] sm:$0xff] %v5242_v29  ;;  %v5252_v30 = vld [vmem:[%s7207_s14 + $0x2c8] sm:$0xff]  ;;  %v5257_v31 = vld [vmem:[%s7207_s14 + $0x2d0] sm:$0xff] }
  0x57   :  { %7329 = vst [vmem:[#allocation95_spill] sm:$0xff] %v5247_v63  ;;  %7330 = vst [vmem:[#allocation96_spill] sm:$0xff] %v5252_v30  ;;  %v5262_v61 = vld [vmem:[%s7207_s14 + $0x2d8] sm:$0xff]  ;;  %v5267_v29 = vld [vmem:[%s7207_s14 + $0x2e0] sm:$0xff] }
  0x58   :  { %7331 = vst [vmem:[#allocation97_spill] sm:$0xff] %v5257_v31  ;;  %7332 = vst [vmem:[#allocation98_spill] sm:$0xff] %v5262_v61  ;;  %v5272_v63 = vld [vmem:[%s7207_s14 + $0x2e8] sm:$0xff]  ;;  %v5277_v30 = vld [vmem:[%s7207_s14 + $0x2f0] sm:$0xff] }
  0x59   :  { %7333 = vst [vmem:[#allocation99_spill] sm:$0xff] %v5267_v29  ;;  %7334 = vst [vmem:[#allocation100_spill] sm:$0xff] %v5272_v63  ;;  %v5282_v31 = vld [vmem:[%s7207_s14 + $0x2f8] sm:$0xff]  ;;  %v5287_v61 = vld [vmem:[%s7207_s14 + $0x300] sm:$0xff] }
  0x5a   :  { %7335 = vst [vmem:[#allocation101_spill] sm:$0xff] %v5277_v30  ;;  %7336 = vst [vmem:[#allocation102_spill] sm:$0xff] %v5282_v31  ;;  %v5292_v29 = vld [vmem:[%s7207_s14 + $0x308] sm:$0xff]  ;;  %v5297_v63 = vld [vmem:[%s7207_s14 + $0x310] sm:$0xff] }
  0x5b   :  { %7337 = vst [vmem:[#allocation103_spill] sm:$0xff] %v5292_v29  ;;  %7338 = vst [vmem:[#allocation104_spill] sm:$0xff] %v5297_v63  ;;  %v5302_v30 = vld [vmem:[%s7207_s14 + $0x318] sm:$0xff]  ;;  %v5307_v31 = vld [vmem:[%s7207_s14 + $0x320] sm:$0xff] }
  0x5c   :  { %7339 = vst [vmem:[#allocation105_spill] sm:$0xff] %v5302_v30  ;;  %7340 = vst [vmem:[#allocation106_spill] sm:$0xff] %v5307_v31  ;;  %v5312_v62 = vld [vmem:[%s7207_s14 + $0x328] sm:$0xff]  ;;  %v5317_v60 = vld [vmem:[%s7207_s14 + $0x330] sm:$0xff] }
  0x5d   :  { %7341 = vst [vmem:[#allocation107_spill] sm:$0xff] %v5312_v62  ;;  %7342 = vst [vmem:[#allocation108_spill] sm:$0xff] %v5317_v60  ;;  %v5322_v28 = vld [vmem:[%s7207_s14 + $0x338] sm:$0xff]  ;;  %v5327_v59 = vld [vmem:[%s7207_s14 + $0x340] sm:$0xff] }
  0x5e   :  { %7343 = vst [vmem:[#allocation109_spill] sm:$0xff] %v5322_v28  ;;  %7344 = vst [vmem:[#allocation110_spill] sm:$0xff] %v5327_v59  ;;  %v5332_v27 = vld [vmem:[%s7207_s14 + $0x348] sm:$0xff]  ;;  %v5337_v32 = vld [vmem:[%s7207_s14 + $0x350] sm:$0xff] }
  0x5f   :  { %7345 = vst [vmem:[#allocation111_spill] sm:$0xff] %v5332_v27  ;;  %7346 = vst [vmem:[#allocation112_spill] sm:$0xff] %v5337_v32  ;;  %v5342_v58 = vld [vmem:[%s7207_s14 + $0x358] sm:$0xff]  ;;  %v5347_v26 = vld [vmem:[%s7207_s14 + $0x360] sm:$0xff] }
  0x60   :  { %7347 = vst [vmem:[#allocation113_spill] sm:$0xff] %v5342_v58  ;;  %7348 = vst [vmem:[#allocation114_spill] sm:$0xff] %v5347_v26  ;;  %v5352_v0 = vld [vmem:[%s7207_s14 + $0x368] sm:$0xff]  ;;  %v5357_v33 = vld [vmem:[%s7207_s14 + $0x370] sm:$0xff] }
  0x61   :  { %7349 = vst [vmem:[#allocation115_spill] sm:$0xff] %v5352_v0  ;;  %7350 = vst [vmem:[#allocation116_spill] sm:$0xff] %v5357_v33  ;;  %v5362_v57 = vld [vmem:[%s7207_s14 + $0x378] sm:$0xff]  ;;  %v5367_v25 = vld [vmem:[%s7207_s14 + $0x380] sm:$0xff] }
  0x62   :  { %7351 = vst [vmem:[#allocation117_spill] sm:$0xff] %v5362_v57  ;;  %7352 = vst [vmem:[#allocation118_spill] sm:$0xff] %v5367_v25  ;;  %v5372_v1 = vld [vmem:[%s7207_s14 + $0x388] sm:$0xff]  ;;  %v5377_v0 = vld [vmem:[%s7207_s14 + $0x390] sm:$0xff] }
  0x63   :  { %7353 = vst [vmem:[#allocation119_spill] sm:$0xff] %v5372_v1  ;;  %7354 = vst [vmem:[#allocation120_spill] sm:$0xff] %v5377_v0  ;;  %v5382_v33 = vld [vmem:[%s7207_s14 + $0x398] sm:$0xff]  ;;  %v5387_v57 = vld [vmem:[%s7207_s14 + $0x3a0] sm:$0xff] }
  0x64   :  { %7355 = vst [vmem:[#allocation121_spill] sm:$0xff] %v5382_v33  ;;  %7356 = vst [vmem:[#allocation122_spill] sm:$0xff] %v5387_v57  ;;  %v5392_v25 = vld [vmem:[%s7207_s14 + $0x3a8] sm:$0xff]  ;;  %v5397_v1 = vld [vmem:[%s7207_s14 + $0x3b0] sm:$0xff] }
  0x65   :  { %7357 = vst [vmem:[#allocation123_spill] sm:$0xff] %v5392_v25  ;;  %7358 = vst [vmem:[#allocation124_spill] sm:$0xff] %v5397_v1  ;;  %v5402_v0 = vld [vmem:[%s7207_s14 + $0x3b8] sm:$0xff]  ;;  %v5407_v33 = vld [vmem:[%s7207_s14 + $0x3c0] sm:$0xff] }
  0x66   :  { %7359 = vst [vmem:[#allocation125_spill] sm:$0xff] %v5402_v0  ;;  %7360 = vst [vmem:[#allocation126_spill] sm:$0xff] %v5407_v33  ;;  %v5412_v57 = vld [vmem:[%s7207_s14 + $0x3c8] sm:$0xff]  ;;  %v5417_v25 = vld [vmem:[%s7207_s14 + $0x3d0] sm:$0xff] }
  0x67   :  { %7361 = vst [vmem:[#allocation127_spill] sm:$0xff] %v5412_v57  ;;  %7362 = vst [vmem:[#allocation128_spill] sm:$0xff] %v5417_v25  ;;  %v5422_v1 = vld [vmem:[%s7207_s14 + $0x3d8] sm:$0xff]  ;;  %v5427_v0 = vld [vmem:[%s7207_s14 + $0x3e0] sm:$0xff] }
  0x68   :  { %7363 = vst [vmem:[#allocation129_spill] sm:$0xff] %v5422_v1  ;;  %7364 = vst [vmem:[#allocation130_spill] sm:$0xff] %v5427_v0  ;;  %v5432_v33 = vld [vmem:[%s7207_s14 + $0x3e8] sm:$0xff]  ;;  %v5437_v57 = vld [vmem:[%s7207_s14 + $0x3f0] sm:$0xff] }
  0x69   :  { %7365 = vst [vmem:[#allocation131_spill] sm:$0xff] %v5432_v33  ;;  %7366 = vst [vmem:[#allocation132_spill] sm:$0xff] %v5437_v57  ;;  %v5442_v25 = vld [vmem:[%s7207_s14 + $0x3f8] sm:$0xff]  ;;  %v5447_v1 = vld [vmem:[%s7368_s22] sm:$0xff] }
  0x6a   :  { %7367 = vst [vmem:[#allocation133_spill] sm:$0xff] %v5442_v25 }
  0x6b   :  { %567 = vsyncadd [#allocation4 + $0x1], 16384  ;;  %s7369_s24 = sld [smem:[#allocation145_spill]]  ;;  %s7218_s25 = smov 119   ;;  %vm677_vm0 = vcmask 588800   ;;  %v599_v35 = vld [vmem:[%s7197_s4 + $0x10] sm:$0xff] }
  0x6c   :  { %668 = vrot.lane.b32.xlu0 %v5447_v1, %s7218_s25  ;;  %s4474_s12 = smov 121   ;;  %s4475_s28 = smov 120   ;;  %v600_v21 = vld [vmem:[%s7197_s4 + $0x18] sm:$0xff]  ;;  %v7216_v3 = vmov 0   ;;  %v598_v36 = vld [vmem:[%s7197_s4 + $0x8] sm:$0xff]  ;;  %v603_v59 = vld [vmem:[%s7198_s5 + $0x10] sm:$0xff] }
  0x6d   :  { %650 = vrot.lane.b32.xlu1 %v5447_v1, %s4474_s12  ;;  %s4476_s29 = smov 127   ;;  %s4477_s3 = smov 1   ;;  %4431 = vset.pattern.permute.xlu0 %v7216_v3  ;;  %vm943_vm1 = vcmask 261120  }
  0x6e   :  { %s4478_s26 = smov 7   ;;  %s7378_s30 = sld [smem:[#allocation146_spill]]  ;;  %4432 = vset.pattern.permute.xlu1 %v7216_v3  ;;  %v597_v3 = vld [vmem:[%s7197_s4] sm:$0xff] }
  0x6f   :  { %s4479_s20 = smov 8   ;;  %s7379_s0 = sld [smem:[#allocation144_spill]] }
  0x70   :  { %659 = vrot.lane.b32.xlu0 %v5447_v1, %s4475_s28  ;;  %s7380_s21 = smov 119  }
  0x71   :  { %v5452_v33 = vld [vmem:[%s7369_s24] sm:$0xff]  ;;  %v5461_v25 = vld [vmem:[%s7369_s24 + $0x8] sm:$0xff]  ;;  %v5466_v57 = vld [vmem:[%s7369_s24 + $0x10] sm:$0xff]  ;;  %641 = vrot.lane.b32.xlu1 %v5447_v1, %s4476_s29 }
  0x72   :  { %7370 = vst [vmem:[#allocation134_spill] sm:$0xff] %v5452_v33  ;;  %v5471_v0 = vld [vmem:[%s7369_s24 + $0x18] sm:$0xff]  ;;  %v5476_v56 = vld [vmem:[%s7369_s24 + $0x20] sm:$0xff]  ;;  %v5481_v24 = vld [vmem:[%s7369_s24 + $0x28] sm:$0xff] }
  0x73   :  { %7371 = vst [vmem:[#allocation135_spill] sm:$0xff] %v5471_v0  ;;  %7372 = vst [vmem:[#allocation136_spill] sm:$0xff] %v5476_v56  ;;  %v5486_v34 = vld [vmem:[%s7369_s24 + $0x30] sm:$0xff]  ;;  %v5491_v26 = vld [vmem:[%s7369_s24 + $0x38] sm:$0xff] }
  0x74   :  { %7373 = vst [vmem:[#allocation137_spill] sm:$0xff] %v5481_v24  ;;  %7374 = vst [vmem:[#allocation138_spill] sm:$0xff] %v5486_v34  ;;  %v5496_v55 = vld [vmem:[%s7369_s24 + $0x40] sm:$0xff]  ;;  %v5501_v58 = vld [vmem:[%s7369_s24 + $0x48] sm:$0xff]  ;;  %632 = vrot.lane.b32.xlu0 %v5447_v1, %s4477_s3 }
  0x75   :  { %7375 = vst [vmem:[#allocation139_spill] sm:$0xff] %v5491_v26  ;;  %7376 = vst [vmem:[#allocation140_spill] sm:$0xff] %v5496_v55  ;;  %v5506_v23 = vld [vmem:[%s7369_s24 + $0x50] sm:$0xff]  ;;  %v5515_v32 = vld [vmem:[%s7369_s24 + $0x58] sm:$0xff]  ;;  %623 = vrot.lane.b32.xlu1 %v5447_v1, %s4478_s26 }
  0x76   :  { %7377 = vst [vmem:[#allocation141_spill] sm:$0xff] %v5501_v58  ;;  %v5520_v54 = vld [vmem:[%s7369_s24 + $0x60] sm:$0xff]  ;;  %v5525_v22 = vld [vmem:[%s7369_s24 + $0x68] sm:$0xff]  ;;  %v5530_v2 = vld [vmem:[%s7369_s24 + $0x70] sm:$0xff] }
  0x77   :  { %v5535_v27 = vld [vmem:[%s7369_s24 + $0x78] sm:$0xff]  ;;  %v593_v53 = vld [vmem:[%s7378_s30] sm:$0xff]  ;;  %s4480_s24 = smov 9  }
  0x78   :  { %4207 = vmatprep.mubr.msk.f32.mxu0 %vm677_vm0, %v593_v53  ;;  %614 = vrot.lane.b32.xlu0 %v5447_v1, %s4479_s20  ;;  %v604_v53 = vld [vmem:[%s7198_s5 + $0x18] sm:$0xff]  ;;  %v5594_v51 = vld [vmem:[%s7379_s0 + $0x5] ss:$0 sm:$0xff]  ;;  %v5602_v18 = vld [vmem:[%s7379_s0 + $0x3] ss:$0 sm:$0xff] }
  0x79   :  { %605 = vrot.lane.b32.xlu1 %v5447_v1, %s4480_s24  ;;  %v5607_v4 = vld [vmem:[%s7379_s0 + $0x2] ss:$0 sm:$0xff]  ;;  %v5621_v60 = vld [vmem:[%s7379_s0] ss:$0 sm:$0xff] }
  0x7c   :  { %792 = vperm.xlu0 %4431, %v600_v21   ;;  %v602_v21 = vld [vmem:[%s7198_s5 + $0x8] sm:$0xff] }
  0x7d   :  { %787 = vperm.xlu1 %4432, %v599_v35   ;;  %v601_v35 = vld [vmem:[%s7198_s5] sm:$0xff] }
  0x80   :  { %782 = vperm.xlu0 %4431, %v598_v36   ;;  %v5578_v36 = vld [vmem:[%s7379_s0 + $0x8] ss:$0 sm:$0xff] }
  0x81   :  { %816 = vperm.xlu1 %4432, %v604_v53  }
  0x84   :  { %777 = vperm.xlu0 %4431, %v597_v3   ;;  %v5584_v3 = vld [vmem:[%s7379_s0 + $0x7] ss:$0 sm:$0xff] }
  0x85   :  { %811 = vperm.xlu1 %4432, %v603_v59  }
  0x88   :  { %801 = vperm.xlu0 %4431, %v601_v35  }
  0x89   :  { %806 = vperm.xlu1 %4432, %v602_v21   ;;  %v5589_v21 = vld [vmem:[%s7379_s0 + $0x6] ss:$0 sm:$0xff] }
  0xde   :  { %v669_v53 = vpop.permute.xlu0 %668 }
  0xdf   :  { %v651_v52 = vpop.permute.xlu1 %650  ;;  %v676_v59 = vmul.f32 %v5578_v36, %v669_v53 }
  0xe0   :  { %v658_v19 = vmul.f32 %v5589_v21, %v651_v52 }
  0xe1   :  { %4189 = vmatprep.subr.mxu0 %v676_v59 }
  0xe2   :  { %v660_v35 = vpop.permute.xlu0 %659  ;;  %4190 = vmatpush3.msra.mxu0 %v676_v59 }
  0xe3   :  { %v642_v20 = vpop.permute.xlu1 %641  ;;  %v667_v53 = vmul.f32 %v5584_v3, %v660_v35  ;;  %v5613_v35 = vld [vmem:[%s7379_s0 + $0x1] ss:$0 sm:$0xff] }
  0xe4   :  { %v649_v28 = vmul.f32 %v5594_v51, %v642_v20 }
  0xe5   :  { %4191 = vmatprep.subr.mxu0 %v667_v53 }
  0xe6   :  { %4192 = vmatpush3.msra.mxu0 %v667_v53  ;;  %v633_v50 = vpop.permute.xlu0 %632 }
  0xe7   :  { %v624_v59 = vpop.permute.xlu1 %623  ;;  %4193 = vmatprep.subr.mxu0 %v658_v19  ;;  %v640_v52 = vmul.f32 %v5602_v18, %v633_v50 }
  0xe8   :  { %4194 = vmatpush3.msra.mxu0 %v658_v19  ;;  %v631_v53 = vmul.f32 %v5607_v4, %v624_v59  ;;  %v595_v59 = vld [vmem:[%s7378_s30 + $0x10] sm:$0xff] }
  0xe9   :  { %4195 = vmatprep.subr.mxu0 %v649_v28 }
  0xea   :  { %4196 = vmatpush3.msra.mxu0 %v649_v28  ;;  %v615_v20 = vpop.permute.xlu0 %614 }
  0xeb   :  { %4197 = vmatprep.subr.mxu0 %v5447_v1  ;;  %v606_v19 = vpop.permute.xlu1 %605  ;;  %v622_v28 = vmul.f32 %v5613_v35, %v615_v20 }
  0xec   :  { %4198 = vmatpush3.msra.mxu0 %v5447_v1  ;;  %v613_v50 = vmul.f32 %v5621_v60, %v606_v19  ;;  %v594_v1 = vld [vmem:[%s7378_s30 + $0x8] sm:$0xff] }
  0xed   :  { %4199 = vmatprep.subr.mxu0 %v640_v52 }
  0xee   :  { %4200 = vmatpush3.msra.mxu0 %v640_v52  ;;  %v596_v52 = vld [vmem:[%s7378_s30 + $0x18] sm:$0xff] }
  0xef   :  { %4201 = vmatprep.subr.mxu0 %v631_v53 }
  0xf0   :  { %4202 = vmatpush3.msra.mxu0 %v631_v53 }
  0xf1   :  { %4203 = vmatprep.subr.mxu0 %v622_v28 }
  0xf2   :  { %4204 = vmatpush3.msra.mxu0 %v622_v28 }
  0xf3   :  { %4205 = vmatprep.subr.mxu0 %v613_v50 }
  0xf4   :  { %4206 = vmatpush3.msra.mxu0 %v613_v50 }
  0xf5   :  { %4208 = vmatmul.mubr.msk.f32.vlgmr.msra.gmra.mxu0 %vm677_vm0, %v594_v1 }
  0xf6   :  { %4210 = vmatprep.mubr.msk.f32.mxu0 %vm677_vm0, %v595_v59 }
  0xf7   :  { %v793_v53 = vpop.permute.xlu0 %792 }
  0xf8   :  { %v788_v20 = vpop.permute.xlu1 %787 }
  0xf9   :  { %4211 = vmatmul.mubr.msk.f32.gmra.mxu0 %vm677_vm0, %v596_v52 }
  0xfb   :  { %v783_v28 = vpop.permute.xlu0 %782 }
  0xfc   :  { %v817_v19 = vpop.permute.xlu1 %816 }
  0xff   :  { %v778_v5 = vpop.permute.xlu0 %777 }
 0x100   :  { %v812_v62 = vpop.permute.xlu1 %811 }
 0x103   :  { %v802_v52 = vpop.permute.xlu0 %801 }
 0x104   :  { %v807_v17 = vpop.permute.xlu1 %806 }
 0x1b5   :  { %v4209_v37 = vpop.f32.mrf.mxu0 }
 0x1b6   :  { %v796_v49 = vmul.f32 %v4209_v37, %v783_v28 }
 0x1b7   :  { %v756_v50 = vpop.f32.mrf.mxu0 }
 0x1b8   :  { %v820_v31 = vadd.f32 %v807_v17, %v796_v49  ;;  %v795_v59 = vmul.f32 %v778_v5, %v756_v50  ;;  %v840_v50 = vld [vmem:[%s7200_s7 + $0x8] sm:$0xff] }
 0x1b9   :  { %v4212_v16 = vpop.f32.mrf.mxu0 }
 0x1ba   :  { %v5637_v1 = vmax.f32 %v820_v31, 0.0  ;;  %v819_v48 = vadd.f32 %v802_v52, %v795_v59  ;;  %v798_v17 = vmul.f32 %v4212_v16, %v793_v53  ;;  %v841_v53 = vld [vmem:[%s7200_s7 + $0x10] sm:$0xff]  ;;  %v846_v59 = vld [vmem:[%s7201_s8 + $0x18] sm:$0xff]  ;;  %v839_v52 = vld [vmem:[%s7200_s7] sm:$0xff] }
 0x1bb   :  { %v766_v49 = vpop.f32.mrf.mxu0 }
 0x1bc   :  { %885 = vrot.lane.b32.xlu0 %v5637_v1, %s4477_s3  ;;  %921 = vrot.lane.b32.xlu1 %v5637_v1, %s4475_s28  ;;  %v5647_v37 = vmax.f32 %v819_v48, 0.0  ;;  %v822_v31 = vadd.f32 %v817_v19, %v798_v17  ;;  %v797_v28 = vmul.f32 %v788_v20, %v766_v49  ;;  %v829_v20 = vld [vmem:[%s7199_s6 + $0x10] sm:$0xff]  ;;  %v842_v19 = vld [vmem:[%s7200_s7 + $0x18] sm:$0xff] }
 0x1bd   :  { %4221 = vmatprep.mubr.msk.f32.mxu0 %vm943_vm1, %v829_v20  ;;  %v845_v17 = vld [vmem:[%s7201_s8 + $0x10] sm:$0xff]  ;;  %v844_v49 = vld [vmem:[%s7201_s8 + $0x8] sm:$0xff] }
 0x1be   :  { %v5657_v5 = vmax.f32 %v822_v31, 0.0  ;;  %v821_v16 = vadd.f32 %v812_v62, %v797_v28  ;;  %v828_v62 = vld [vmem:[%s7199_s6 + $0x8] sm:$0xff]  ;;  %v843_v31 = vld [vmem:[%s7201_s8] sm:$0xff] }
 0x1bf   :  { %1020 = vmatprep.mubr.f32.mxu1 %v828_v62 }
 0x1c0   :  { %873 = vrot.lane.b32.xlu0 %v5637_v1, %s4478_s26  ;;  %909 = vrot.lane.b32.xlu1 %v5637_v1, %s4474_s12  ;;  %v5667_v48 = vmax.f32 %v821_v16, 0.0 }
 0x1c4   :  { %883 = vrot.lane.b32.xlu0 %v5647_v37, %s4477_s3  ;;  %919 = vrot.lane.b32.xlu1 %v5647_v37, %s4475_s28 }
 0x1c8   :  { %871 = vrot.lane.b32.xlu0 %v5647_v37, %s4478_s26  ;;  %907 = vrot.lane.b32.xlu1 %v5647_v37, %s4474_s12 }
 0x1cc   :  { %889 = vrot.lane.b32.xlu0 %v5657_v5, %s4477_s3  ;;  %925 = vrot.lane.b32.xlu1 %v5657_v5, %s4475_s28 }
 0x1d0   :  { %877 = vrot.lane.b32.xlu0 %v5657_v5, %s4478_s26  ;;  %913 = vrot.lane.b32.xlu1 %v5657_v5, %s4474_s12 }
 0x1d4   :  { %887 = vrot.lane.b32.xlu0 %v5667_v48, %s4477_s3  ;;  %923 = vrot.lane.b32.xlu1 %v5667_v48, %s4475_s28 }
 0x1d8   :  { %865 = vrot.lane.b32.xlu0 %v5657_v5, %s4479_s20  ;;  %901 = vrot.lane.b32.xlu1 %v5657_v5, %s4476_s29 }
 0x1dc   :  { %875 = vrot.lane.b32.xlu0 %v5667_v48, %s4478_s26  ;;  %911 = vrot.lane.b32.xlu1 %v5667_v48, %s4474_s12 }
 0x1e0   :  { %861 = vrot.lane.b32.xlu0 %v5637_v1, %s4479_s20  ;;  %897 = vrot.lane.b32.xlu1 %v5637_v1, %s4476_s29 }
 0x1e4   :  { %863 = vrot.lane.b32.xlu0 %v5667_v48, %s4479_s20  ;;  %899 = vrot.lane.b32.xlu1 %v5667_v48, %s4476_s29 }
 0x1e8   :  { %859 = vrot.lane.b32.xlu0 %v5647_v37, %s4479_s20  ;;  %895 = vrot.lane.b32.xlu1 %v5647_v37, %s4476_s29 }
 0x1ec   :  { %851 = vrot.lane.b32.xlu0 %v5667_v48, %s4480_s24  ;;  %853 = vrot.lane.b32.xlu1 %v5657_v5, %s4480_s24 }
 0x1f0   :  { %847 = vrot.lane.b32.xlu0 %v5647_v37, %s4480_s24  ;;  %849 = vrot.lane.b32.xlu1 %v5637_v1, %s4480_s24 }
 0x1f4   :  { %935 = vrot.lane.b32.xlu0 %v5667_v48, %s7380_s21  ;;  %937 = vrot.lane.b32.xlu1 %v5657_v5, %s7380_s21 }
 0x1f8   :  { %931 = vrot.lane.b32.xlu0 %v5647_v37, %s7380_s21  ;;  %933 = vrot.lane.b32.xlu1 %v5637_v1, %s7380_s21 }
 0x1fc   :  { %1138 = vperm.xlu0 %4431, %v841_v53   ;;  %1143 = vperm.xlu1 %4432, %v842_v19  }
 0x200   :  { %1133 = vperm.xlu0 %4431, %v840_v50   ;;  %1167 = vperm.xlu1 %4432, %v846_v59  }
 0x204   :  { %1128 = vperm.xlu0 %4431, %v839_v52   ;;  %1162 = vperm.xlu1 %4432, %v845_v17  }
 0x208   :  { %1152 = vperm.xlu0 %4431, %v843_v31   ;;  %1157 = vperm.xlu1 %4432, %v844_v49  }
 0x22e   :  { %v886_v28 = vpop.permute.xlu0 %885  ;;  %v922_v16 = vpop.permute.xlu1 %921 }
 0x22f   :  { %v928_v14 = vmul.f32 %v5584_v3, %v922_v16  ;;  %v892_v63 = vmul.f32 %v5602_v18, %v886_v28 }
 0x232   :  { %v874_v62 = vpop.permute.xlu0 %873  ;;  %v910_v20 = vpop.permute.xlu1 %909 }
 0x236   :  { %v884_v53 = vpop.permute.xlu0 %883  ;;  %v920_v19 = vpop.permute.xlu1 %919 }
 0x23a   :  { %v872_v50 = vpop.permute.xlu0 %871  ;;  %v908_v59 = vpop.permute.xlu1 %907 }
 0x23e   :  { %v890_v52 = vpop.permute.xlu0 %889  ;;  %v926_v17 = vpop.permute.xlu1 %925 }
 0x23f   :  { %v930_v47 = vmul.f32 %v5584_v3, %v926_v17  ;;  %v894_v15 = vmul.f32 %v5602_v18, %v890_v52  ;;  %v927_v52 = vmul.f32 %v5584_v3, %v920_v19 }
 0x241   :  { %3867 = vmatprep.subr.mxu1 %v930_v47 }
 0x242   :  { %v878_v38 = vpop.permute.xlu0 %877  ;;  %3868 = vmatpush3.msra.mxu1 %v894_v15  ;;  %v914_v8 = vpop.permute.xlu1 %913  ;;  %v891_v15 = vmul.f32 %v5602_v18, %v884_v53  ;;  %v915_v53 = vmul.f32 %v5589_v21, %v908_v59 }
 0x243   :  { %v918_v47 = vmul.f32 %v5589_v21, %v914_v8 }
 0x246   :  { %v888_v31 = vpop.permute.xlu0 %887  ;;  %v924_v49 = vpop.permute.xlu1 %923 }
 0x247   :  { %v893_v30 = vmul.f32 %v5602_v18, %v888_v31  ;;  %v929_v46 = vmul.f32 %v5584_v3, %v924_v49  ;;  %v882_v31 = vmul.f32 %v5607_v4, %v878_v38  ;;  %v879_v38 = vmul.f32 %v5607_v4, %v872_v50 }
 0x249   :  { %3869 = vmatprep.subr.mxu1 %v929_v46 }
 0x24a   :  { %v866_v29 = vpop.permute.xlu0 %865  ;;  %3870 = vmatpush3.msra.mxu1 %v893_v30  ;;  %v902_v17 = vpop.permute.xlu1 %901  ;;  %v916_v30 = vmul.f32 %v5589_v21, %v910_v20 }
 0x24b   :  { %3871 = vmatprep.subr.mxu1 %v928_v14  ;;  %v880_v14 = vmul.f32 %v5607_v4, %v874_v62  ;;  %v906_v19 = vmul.f32 %v5594_v51, %v902_v17 }
 0x24c   :  { %3872 = vmatpush3.msra.mxu1 %v892_v63 }
 0x24d   :  { %3873 = vmatprep.subr.mxu1 %v927_v52  ;;  %v870_v52 = vmul.f32 %v5613_v35, %v866_v29 }
 0x24e   :  { %v876_v49 = vpop.permute.xlu0 %875  ;;  %3874 = vmatpush3.msra.mxu1 %v891_v15  ;;  %v912_v16 = vpop.permute.xlu1 %911 }
 0x24f   :  { %v881_v46 = vmul.f32 %v5607_v4, %v876_v49  ;;  %v917_v28 = vmul.f32 %v5589_v21, %v912_v16  ;;  %3875 = vmatprep.subr.mxu1 %v918_v47 }
 0x250   :  { %3876 = vmatpush3.msra.mxu1 %v882_v31 }
 0x251   :  { %3877 = vmatprep.subr.mxu1 %v917_v28 }
 0x252   :  { %v862_v63 = vpop.permute.xlu0 %861  ;;  %3878 = vmatpush3.msra.mxu1 %v881_v46  ;;  %v898_v8 = vpop.permute.xlu1 %897 }
 0x253   :  { %3879 = vmatprep.subr.mxu1 %v916_v30  ;;  %v904_v59 = vmul.f32 %v5594_v51, %v898_v8  ;;  %v868_v50 = vmul.f32 %v5613_v35, %v862_v63 }
 0x254   :  { %3880 = vmatpush3.msra.mxu1 %v880_v14 }
 0x255   :  { %3881 = vmatprep.subr.mxu1 %v915_v53 }
 0x256   :  { %v864_v15 = vpop.permute.xlu0 %863  ;;  %3882 = vmatpush3.msra.mxu1 %v879_v38  ;;  %v900_v20 = vpop.permute.xlu1 %899  ;;  %v827_v38 = vld [vmem:[%s7199_s6] sm:$0xff] }
 0x257   :  { %v869_v47 = vmul.f32 %v5613_v35, %v864_v15  ;;  %v905_v62 = vmul.f32 %v5594_v51, %v900_v20  ;;  %3883 = vmatprep.subr.mxu1 %v906_v19  ;;  %v831_v15 = vld [vmem:[%s7199_s6 + $0x20] sm:$0xff] }
 0x258   :  { %3884 = vmatpush3.msra.mxu1 %v870_v52 }
 0x259   :  { %3885 = vmatprep.subr.mxu1 %v905_v62  ;;  %v830_v62 = vld [vmem:[%s7199_s6 + $0x18] sm:$0xff] }
 0x25a   :  { %v860_v31 = vpop.permute.xlu0 %859  ;;  %3886 = vmatpush3.msra.mxu1 %v869_v47  ;;  %v896_v17 = vpop.permute.xlu1 %895 }
 0x25b   :  { %v867_v49 = vmul.f32 %v5613_v35, %v860_v31  ;;  %v903_v29 = vmul.f32 %v5594_v51, %v896_v17  ;;  %3887 = vmatprep.subr.mxu1 %v904_v59  ;;  %v834_v31 = vld [vmem:[%s7199_s6 + $0x38] sm:$0xff] }
 0x25c   :  { %3888 = vmatpush3.msra.mxu1 %v868_v50 }
 0x25d   :  { %3889 = vmatprep.subr.mxu1 %v903_v29  ;;  %v833_v29 = vld [vmem:[%s7199_s6 + $0x30] sm:$0xff] }
 0x25e   :  { %v852_v16 = vpop.permute.xlu0 %851  ;;  %3890 = vmatpush3.msra.mxu1 %v867_v49  ;;  %v854_v46 = vpop.permute.xlu1 %853 }
 0x25f   :  { %v858_v28 = vmul.f32 %v5621_v60, %v854_v46  ;;  %3891 = vmatprep.subr.mxu1 %v5657_v5  ;;  %v857_v30 = vmul.f32 %v5621_v60, %v852_v16  ;;  %v832_v16 = vld [vmem:[%s7199_s6 + $0x28] sm:$0xff]  ;;  %v837_v46 = vld [vmem:[%s7199_s6 + $0x50] sm:$0xff] }
 0x261   :  { %3892 = vmatpush3.msra.mxu1 %v858_v28  ;;  %v835_v28 = vld [vmem:[%s7199_s6 + $0x40] sm:$0xff] }
 0x262   :  { %v848_v14 = vpop.permute.xlu0 %847  ;;  %3893 = vmatprep.subr.mxu1 %v5667_v48  ;;  %v850_v63 = vpop.permute.xlu1 %849 }
 0x263   :  { %v856_v8 = vmul.f32 %v5621_v60, %v850_v63  ;;  %3894 = vmatpush3.msra.mxu1 %v857_v30  ;;  %v855_v53 = vmul.f32 %v5621_v60, %v848_v14  ;;  %v836_v30 = vld [vmem:[%s7199_s6 + $0x48] sm:$0xff]  ;;  %v838_v14 = vld [vmem:[%s7199_s6 + $0x58] sm:$0xff] }
 0x264   :  { %3895 = vmatprep.subr.mxu1 %v5637_v1 }
 0x265   :  { %3896 = vmatpush3.msra.mxu1 %v856_v8 }
 0x266   :  { %v936_v19 = vpop.permute.xlu0 %935  ;;  %3897 = vmatprep.subr.mxu1 %v5647_v37  ;;  %v938_v52 = vpop.permute.xlu1 %937 }
 0x267   :  { %v942_v20 = vmul.f32 %v5578_v36, %v938_v52  ;;  %3898 = vmatpush3.msra.mxu1 %v855_v53  ;;  %v941_v47 = vmul.f32 %v5578_v36, %v936_v19 }
 0x268   :  { %1021 = vmatmul.mubr.f32.vlgmr.msra.gmra.mxu1 %v827_v38 }
 0x269   :  { %4213 = vmatprep.subr.mxu0 %v942_v20  ;;  %1025 = vmatprep.mubr.f32.mxu1 %v831_v15 }
 0x26a   :  { %v932_v59 = vpop.permute.xlu0 %931  ;;  %4214 = vmatpush3.msra.mxu0 %v942_v20  ;;  %v934_v50 = vpop.permute.xlu1 %933 }
 0x26b   :  { %v940_v17 = vmul.f32 %v5578_v36, %v934_v50  ;;  %4215 = vmatprep.subr.mxu0 %v941_v47  ;;  %v939_v49 = vmul.f32 %v5578_v36, %v932_v59 }
 0x26c   :  { %1026 = vmatmul.mubr.f32.gmra.mxu1 %v830_v62  ;;  %4216 = vmatpush3.msra.mxu0 %v941_v47 }
 0x26d   :  { %4217 = vmatprep.subr.mxu0 %v940_v17  ;;  %1030 = vmatprep.mubr.f32.mxu1 %v834_v31 }
 0x26e   :  { %4218 = vmatpush3.msra.mxu0 %v940_v17 }
 0x26f   :  { %4219 = vmatprep.subr.mxu0 %v939_v49 }
 0x270   :  { %1031 = vmatmul.mubr.f32.gmra.mxu1 %v833_v29  ;;  %4220 = vmatpush3.msra.mxu0 %v939_v49 }
 0x271   :  { %4222 = vmatmul.mubr.msk.f32.vlgmr.msra.gmra.mxu0 %vm943_vm1, %v832_v16  ;;  %1035 = vmatprep.mubr.f32.mxu1 %v837_v46 }
 0x272   :  { %4224 = vmatprep.mubr.msk.f32.mxu0 %vm943_vm1, %v835_v28 }
 0x274   :  { %1036 = vmatmul.mubr.f32.gmra.mxu1 %v836_v30 }
 0x275   :  { %4225 = vmatmul.mubr.msk.f32.gmra.mxu0 %vm943_vm1, %v838_v14 }
 0x277   :  { %v1139_v63 = vpop.permute.xlu0 %1138  ;;  %v1144_v8 = vpop.permute.xlu1 %1143 }
 0x27b   :  { %v1134_v38 = vpop.permute.xlu0 %1133  ;;  %v1168_v52 = vpop.permute.xlu1 %1167 }
 0x27f   :  { %v1129_v62 = vpop.permute.xlu0 %1128  ;;  %v1163_v31 = vpop.permute.xlu1 %1162 }
 0x283   :  { %v1153_v30 = vpop.permute.xlu0 %1152  ;;  %v1158_v12 = vpop.permute.xlu1 %1157 }
 0x328   :  { %v3899_v53 = vpop.f32.mrf.mxu1 }
 0x32a   :  { %v3900_v19 = vpop.f32.mrf.mxu1 }
 0x32b   :  { %v3901_v17 = vadd.f32 %v3900_v19, %v3899_v53 }
 0x32c   :  { %v3902_v15 = vpop.f32.mrf.mxu1 }
 0x32e   :  { %v3903_v20 = vpop.f32.mrf.mxu1 }
 0x32f   :  { %v3904_v47 = vadd.f32 %v3903_v20, %v3902_v15 }
 0x330   :  { %v3905_v59 = vpop.f32.mrf.mxu1 }
 0x331   :  { %v4223_v50 = vpop.f32.mrf.mxu0 }
 0x332   :  { %v1113_v49 = vadd.f32 %v4223_v50, %v3904_v47  ;;  %v3906_v29 = vpop.f32.mrf.mxu1  ;;  %v3797_v47 = vld [vmem:[%s7201_s8 + $0x38] sm:$0xff]  ;;  %v3794_v50 = vld [vmem:[%s7201_s8 + $0x20] sm:$0xff] }
 0x333   :  { %v1107_v16 = vpop.f32.mrf.mxu0  ;;  %v3907_v45 = vadd.f32 %v3906_v29, %v3905_v59  ;;  %v3796_v59 = vld [vmem:[%s7201_s8 + $0x30] sm:$0xff] }
 0x334   :  { %v1108_v46 = vadd.f32 %v3901_v17, %v1107_v16  ;;  %v1147_v14 = vmul.f32 %v1134_v38, %v1113_v49  ;;  %v3908_v7 = vpop.f32.mrf.mxu1 }
 0x335   :  { %v4226_v28 = vpop.f32.mrf.mxu0 }
 0x336   :  { %v1146_v13 = vmul.f32 %v1129_v62, %v1108_v46  ;;  %v1171_v39 = vadd.f32 %v1158_v12, %v1147_v14  ;;  %v3909_v43 = vpop.f32.mrf.mxu1  ;;  %v3790_v62 = vld [vmem:[%s7200_s7 + $0x20] sm:$0xff] }
 0x337   :  { %v1117_v6 = vpop.f32.mrf.mxu0  ;;  %v3910_v38 = vadd.f32 %v3909_v43, %v3908_v7  ;;  %v3780_v7 = vld [vmem:[%s7199_s6 + $0x70] sm:$0xff] }
 0x338   :  { %v1170_v44 = vadd.f32 %v1153_v30, %v1146_v13  ;;  %v1118_v20 = vadd.f32 %v3907_v45, %v1117_v6  ;;  %v5815_v53 = vmax.f32 %v1171_v39, 0.0  ;;  %v3779_v6 = vld [vmem:[%s7199_s6 + $0x68] sm:$0xff]  ;;  %4235 = vmatprep.mubr.msk.f32.mxu1 %vm943_vm1, %v3780_v7 }
 0x339   :  { %v1123_v12 = vadd.f32 %v4226_v28, %v3910_v38  ;;  %1373 = vmatprep.mubr.f32.mxu0 %v3779_v6 }
 0x33a   :  { %v5809_v15 = vmax.f32 %v1170_v44, 0.0  ;;  %v1148_v19 = vmul.f32 %v1139_v63, %v1118_v20  ;;  %v3792_v63 = vld [vmem:[%s7200_s7 + $0x30] sm:$0xff] }
 0x33b   :  { %v1149_v44 = vmul.f32 %v1144_v8, %v1123_v12  ;;  %v3793_v8 = vld [vmem:[%s7200_s7 + $0x38] sm:$0xff] }
 0x33c   :  { %1237 = vrot.lane.b32.xlu0 %v5809_v15, %s4477_s3  ;;  %1273 = vrot.lane.b32.xlu1 %v5809_v15, %s4475_s28  ;;  %v1172_v13 = vadd.f32 %v1163_v31, %v1148_v19  ;;  %v3795_v31 = vld [vmem:[%s7201_s8 + $0x28] sm:$0xff] }
 0x33d   :  { %v1173_v39 = vadd.f32 %v1168_v52, %v1149_v44  ;;  %v3791_v52 = vld [vmem:[%s7200_s7 + $0x28] sm:$0xff] }
 0x33e   :  { %v5825_v45 = vmax.f32 %v1172_v13, 0.0 }
 0x33f   :  { %v5835_v43 = vmax.f32 %v1173_v39, 0.0 }
 0x340   :  { %1239 = vrot.lane.b32.xlu0 %v5815_v53, %s4477_s3  ;;  %1275 = vrot.lane.b32.xlu1 %v5815_v53, %s4475_s28 }
 0x344   :  { %1227 = vrot.lane.b32.xlu0 %v5815_v53, %s4478_s26  ;;  %1263 = vrot.lane.b32.xlu1 %v5815_v53, %s4474_s12 }
 0x348   :  { %1241 = vrot.lane.b32.xlu0 %v5825_v45, %s4477_s3  ;;  %1277 = vrot.lane.b32.xlu1 %v5825_v45, %s4475_s28 }
 0x34c   :  { %1229 = vrot.lane.b32.xlu0 %v5825_v45, %s4478_s26  ;;  %1265 = vrot.lane.b32.xlu1 %v5825_v45, %s4474_s12 }
 0x350   :  { %1243 = vrot.lane.b32.xlu0 %v5835_v43, %s4477_s3  ;;  %1279 = vrot.lane.b32.xlu1 %v5835_v43, %s4475_s28 }
 0x354   :  { %1225 = vrot.lane.b32.xlu0 %v5809_v15, %s4478_s26  ;;  %1261 = vrot.lane.b32.xlu1 %v5809_v15, %s4474_s12 }
 0x358   :  { %1231 = vrot.lane.b32.xlu0 %v5835_v43, %s4478_s26  ;;  %1267 = vrot.lane.b32.xlu1 %v5835_v43, %s4474_s12 }
 0x35c   :  { %1217 = vrot.lane.b32.xlu0 %v5825_v45, %s4479_s20  ;;  %1253 = vrot.lane.b32.xlu1 %v5825_v45, %s4476_s29 }
 0x360   :  { %1219 = vrot.lane.b32.xlu0 %v5835_v43, %s4479_s20  ;;  %1255 = vrot.lane.b32.xlu1 %v5835_v43, %s4476_s29 }
 0x364   :  { %1215 = vrot.lane.b32.xlu0 %v5815_v53, %s4479_s20  ;;  %1251 = vrot.lane.b32.xlu1 %v5815_v53, %s4476_s29 }
 0x368   :  { %1213 = vrot.lane.b32.xlu0 %v5809_v15, %s4479_s20  ;;  %1249 = vrot.lane.b32.xlu1 %v5809_v15, %s4476_s29 }
 0x36c   :  { %1205 = vrot.lane.b32.xlu0 %v5825_v45, %s4480_s24  ;;  %1207 = vrot.lane.b32.xlu1 %v5835_v43, %s4480_s24 }
 0x370   :  { %1201 = vrot.lane.b32.xlu0 %v5809_v15, %s4480_s24  ;;  %1203 = vrot.lane.b32.xlu1 %v5815_v53, %s4480_s24 }
 0x374   :  { %1289 = vrot.lane.b32.xlu0 %v5825_v45, %s7380_s21  ;;  %1291 = vrot.lane.b32.xlu1 %v5835_v43, %s7380_s21 }
 0x378   :  { %1285 = vrot.lane.b32.xlu0 %v5809_v15, %s7380_s21  ;;  %1287 = vrot.lane.b32.xlu1 %v5815_v53, %s7380_s21 }
 0x37c   :  { %1491 = vperm.xlu0 %4431, %v3792_v63   ;;  %1496 = vperm.xlu1 %4432, %v3793_v8  }
 0x380   :  { %1486 = vperm.xlu0 %4431, %v3791_v52   ;;  %1520 = vperm.xlu1 %4432, %v3797_v47  }
 0x384   :  { %1481 = vperm.xlu0 %4431, %v3790_v62   ;;  %1515 = vperm.xlu1 %4432, %v3796_v59  }
 0x388   :  { %1505 = vperm.xlu0 %4431, %v3794_v50   ;;  %1510 = vperm.xlu1 %4432, %v3795_v31  }
 0x3ae   :  { %v1238_v17 = vpop.permute.xlu0 %1237  ;;  %v1274_v49 = vpop.permute.xlu1 %1273 }
 0x3af   :  { %v1281_v47 = vmul.f32 %v5584_v3, %v1274_v49  ;;  %v1245_v62 = vmul.f32 %v5602_v18, %v1238_v17 }
 0x3b2   :  { %v1240_v29 = vpop.permute.xlu0 %1239  ;;  %v1276_v16 = vpop.permute.xlu1 %1275 }
 0x3b3   :  { %v1282_v8 = vmul.f32 %v5584_v3, %v1276_v16  ;;  %v1246_v52 = vmul.f32 %v5602_v18, %v1240_v29 }
 0x3b6   :  { %v1228_v46 = vpop.permute.xlu0 %1227  ;;  %v1264_v28 = vpop.permute.xlu1 %1263 }
 0x3b7   :  { %v1270_v49 = vmul.f32 %v5589_v21, %v1264_v28 }
 0x3ba   :  { %v1242_v30 = vpop.permute.xlu0 %1241  ;;  %v1278_v14 = vpop.permute.xlu1 %1277 }
 0x3bb   :  { %v1283_v39 = vmul.f32 %v5584_v3, %v1278_v14  ;;  %v1247_v6 = vmul.f32 %v5602_v18, %v1242_v30 }
 0x3be   :  { %v1230_v20 = vpop.permute.xlu0 %1229  ;;  %v1266_v38 = vpop.permute.xlu1 %1265 }
 0x3bf   :  { %v1271_v16 = vmul.f32 %v5589_v21, %v1266_v38  ;;  %v1235_v29 = vmul.f32 %v5607_v4, %v1230_v20 }
 0x3c2   :  { %v1244_v19 = vpop.permute.xlu0 %1243  ;;  %v1280_v12 = vpop.permute.xlu1 %1279 }
 0x3c3   :  { %v1248_v13 = vmul.f32 %v5602_v18, %v1244_v19  ;;  %v1284_v44 = vmul.f32 %v5584_v3, %v1280_v12  ;;  %v1234_v18 = vmul.f32 %v5607_v4, %v1228_v46 }
 0x3c5   :  { %3919 = vmatprep.subr.mxu0 %v1284_v44 }
 0x3c6   :  { %v1226_v7 = vpop.permute.xlu0 %1225  ;;  %3920 = vmatpush3.msra.mxu0 %v1248_v13  ;;  %v1262_v63 = vpop.permute.xlu1 %1261 }
 0x3c7   :  { %3921 = vmatprep.subr.mxu0 %v1283_v39  ;;  %v1269_v17 = vmul.f32 %v5589_v21, %v1262_v63  ;;  %v1233_v19 = vmul.f32 %v5607_v4, %v1226_v7 }
 0x3c8   :  { %3922 = vmatpush3.msra.mxu0 %v1247_v6 }
 0x3c9   :  { %3923 = vmatprep.subr.mxu0 %v1282_v8 }
 0x3ca   :  { %v1232_v59 = vpop.permute.xlu0 %1231  ;;  %3924 = vmatpush3.msra.mxu0 %v1246_v52  ;;  %v1268_v50 = vpop.permute.xlu1 %1267 }
 0x3cb   :  { %v1236_v31 = vmul.f32 %v5607_v4, %v1232_v59  ;;  %v1272_v30 = vmul.f32 %v5589_v21, %v1268_v50  ;;  %3925 = vmatprep.subr.mxu0 %v1281_v47 }
 0x3cc   :  { %3926 = vmatpush3.msra.mxu0 %v1245_v62 }
 0x3cd   :  { %3927 = vmatprep.subr.mxu0 %v1272_v30 }
 0x3ce   :  { %v1218_v14 = vpop.permute.xlu0 %1217  ;;  %3928 = vmatpush3.msra.mxu0 %v1236_v31  ;;  %v1254_v3 = vpop.permute.xlu1 %1253 }
 0x3cf   :  { %3929 = vmatprep.subr.mxu0 %v1271_v16  ;;  %v1259_v28 = vmul.f32 %v5594_v51, %v1254_v3  ;;  %v1223_v46 = vmul.f32 %v5613_v35, %v1218_v14  ;;  %v3785_v3 = vld [vmem:[%s7199_s6 + $0x98] sm:$0xff] }
 0x3d0   :  { %3930 = vmatpush3.msra.mxu0 %v1235_v29 }
 0x3d1   :  { %3931 = vmatprep.subr.mxu0 %v1270_v49 }
 0x3d2   :  { %v1220_v12 = vpop.permute.xlu0 %1219  ;;  %3932 = vmatpush3.msra.mxu0 %v1234_v18  ;;  %v1256_v38 = vpop.permute.xlu1 %1255 }
 0x3d3   :  { %v1224_v13 = vmul.f32 %v5613_v35, %v1220_v12  ;;  %v1260_v20 = vmul.f32 %v5594_v51, %v1256_v38  ;;  %3933 = vmatprep.subr.mxu0 %v1269_v17  ;;  %v3784_v17 = vld [vmem:[%s7199_s6 + $0x90] sm:$0xff]  ;;  %v3787_v38 = vld [vmem:[%s7199_s6 + $0xa8] sm:$0xff] }
 0x3d4   :  { %3934 = vmatpush3.msra.mxu0 %v1233_v19  ;;  %v3783_v19 = vld [vmem:[%s7199_s6 + $0x88] sm:$0xff]  ;;  %v3788_v12 = vld [vmem:[%s7199_s6 + $0xb0] sm:$0xff] }
 0x3d5   :  { %3935 = vmatprep.subr.mxu0 %v1260_v20 }
 0x3d6   :  { %v1216_v44 = vpop.permute.xlu0 %1215  ;;  %3936 = vmatpush3.msra.mxu0 %v1224_v13  ;;  %v1252_v21 = vpop.permute.xlu1 %1251  ;;  %v3789_v13 = vld [vmem:[%s7199_s6 + $0xb8] sm:$0xff] }
 0x3d7   :  { %v1222_v39 = vmul.f32 %v5613_v35, %v1216_v44  ;;  %v1258_v4 = vmul.f32 %v5594_v51, %v1252_v21  ;;  %3937 = vmatprep.subr.mxu0 %v1259_v28 }
 0x3d8   :  { %3938 = vmatpush3.msra.mxu0 %v1223_v46 }
 0x3d9   :  { %3939 = vmatprep.subr.mxu0 %v1258_v4 }
 0x3da   :  { %v1214_v6 = vpop.permute.xlu0 %1213  ;;  %3940 = vmatpush3.msra.mxu0 %v1222_v39  ;;  %v1250_v7 = vpop.permute.xlu1 %1249 }
 0x3db   :  { %v1221_v63 = vmul.f32 %v5613_v35, %v1214_v6  ;;  %v1257_v8 = vmul.f32 %v5594_v51, %v1250_v7  ;;  %v3778_v35 = vld [vmem:[%s7199_s6 + $0x60] sm:$0xff] }
 0x3dd   :  { %3941 = vmatprep.subr.mxu0 %v1257_v8 }
 0x3de   :  { %v1206_v52 = vpop.permute.xlu0 %1205  ;;  %3942 = vmatpush3.msra.mxu0 %v1221_v63  ;;  %v1208_v47 = vpop.permute.xlu1 %1207 }
 0x3df   :  { %v1212_v62 = vmul.f32 %v5621_v60, %v1208_v47  ;;  %3943 = vmatprep.subr.mxu0 %v5835_v43  ;;  %v1211_v59 = vmul.f32 %v5621_v60, %v1206_v52 }
 0x3e1   :  { %3944 = vmatpush3.msra.mxu0 %v1212_v62 }
 0x3e2   :  { %v1202_v50 = vpop.permute.xlu0 %1201  ;;  %3945 = vmatprep.subr.mxu0 %v5825_v45  ;;  %v1204_v31 = vpop.permute.xlu1 %1203  ;;  %v3782_v45 = vld [vmem:[%s7199_s6 + $0x80] sm:$0xff] }
 0x3e3   :  { %v1210_v30 = vmul.f32 %v5621_v60, %v1204_v31  ;;  %3946 = vmatpush3.msra.mxu0 %v1211_v59  ;;  %v1209_v51 = vmul.f32 %v5621_v60, %v1202_v50  ;;  %v3781_v60 = vld [vmem:[%s7199_s6 + $0x78] sm:$0xff] }
 0x3e4   :  { %3947 = vmatprep.subr.mxu0 %v5815_v53 }
 0x3e5   :  { %3948 = vmatpush3.msra.mxu0 %v1210_v30 }
 0x3e6   :  { %v1290_v43 = vpop.permute.xlu0 %1289  ;;  %3949 = vmatprep.subr.mxu0 %v5809_v15  ;;  %v1292_v16 = vpop.permute.xlu1 %1291 }
 0x3e7   :  { %v1296_v29 = vmul.f32 %v5578_v36, %v1292_v16  ;;  %3950 = vmatpush3.msra.mxu0 %v1209_v51  ;;  %v1295_v53 = vmul.f32 %v5578_v36, %v1290_v43 }
 0x3e8   :  { %1374 = vmatmul.mubr.f32.vlgmr.msra.gmra.mxu0 %v3778_v35 }
 0x3e9   :  { %4227 = vmatprep.subr.mxu1 %v1296_v29  ;;  %1378 = vmatprep.mubr.f32.mxu0 %v3782_v45 }
 0x3ea   :  { %v1286_v14 = vpop.permute.xlu0 %1285  ;;  %4228 = vmatpush3.msra.mxu1 %v1296_v29  ;;  %v1288_v15 = vpop.permute.xlu1 %1287 }
 0x3eb   :  { %v1294_v49 = vmul.f32 %v5578_v36, %v1288_v15  ;;  %4229 = vmatprep.subr.mxu1 %v1295_v53  ;;  %v1293_v18 = vmul.f32 %v5578_v36, %v1286_v14  ;;  %v3786_v36 = vld [vmem:[%s7199_s6 + $0xa0] sm:$0xff] }
 0x3ec   :  { %1379 = vmatmul.mubr.f32.gmra.mxu0 %v3781_v60  ;;  %4230 = vmatpush3.msra.mxu1 %v1295_v53 }
 0x3ed   :  { %4231 = vmatprep.subr.mxu1 %v1294_v49  ;;  %1383 = vmatprep.mubr.f32.mxu0 %v3785_v3 }
 0x3ee   :  { %4232 = vmatpush3.msra.mxu1 %v1294_v49 }
 0x3ef   :  { %4233 = vmatprep.subr.mxu1 %v1293_v18 }
 0x3f0   :  { %1384 = vmatmul.mubr.f32.gmra.mxu0 %v3784_v17  ;;  %4234 = vmatpush3.msra.mxu1 %v1293_v18 }
 0x3f1   :  { %4236 = vmatmul.mubr.msk.f32.vlgmr.msra.gmra.mxu1 %vm943_vm1, %v3783_v19  ;;  %1388 = vmatprep.mubr.f32.mxu0 %v3788_v12 }
 0x3f2   :  { %4238 = vmatprep.mubr.msk.f32.mxu1 %vm943_vm1, %v3786_v36 }
 0x3f4   :  { %1389 = vmatmul.mubr.f32.gmra.mxu0 %v3787_v38 }
 0x3f5   :  { %4239 = vmatmul.mubr.msk.f32.gmra.mxu1 %vm943_vm1, %v3789_v13 }
 0x3f7   :  { %v1492_v20 = vpop.permute.xlu0 %1491  ;;  %v1497_v28 = vpop.permute.xlu1 %1496 }
 0x3fb   :  { %v1487_v44 = vpop.permute.xlu0 %1486  ;;  %v1521_v39 = vpop.permute.xlu1 %1520 }
 0x3ff   :  { %v1482_v63 = vpop.permute.xlu0 %1481  ;;  %v1516_v52 = vpop.permute.xlu1 %1515 }
 0x403   :  { %v1506_v45 = vpop.permute.xlu0 %1505  ;;  %v1511_v53 = vpop.permute.xlu1 %1510 }
 0x4a8   :  { %v3951_v46 = vpop.f32.mrf.mxu0 }
 0x4aa   :  { %v3952_v21 = vpop.f32.mrf.mxu0 }
 0x4ab   :  { %v3953_v62 = vadd.f32 %v3952_v21, %v3951_v46 }
 0x4ac   :  { %v3954_v4 = vpop.f32.mrf.mxu0 }
 0x4ae   :  { %v3955_v6 = vpop.f32.mrf.mxu0 }
 0x4af   :  { %v3956_v7 = vadd.f32 %v3955_v6, %v3954_v4  ;;  %v3815_v4 = vld [vmem:[%s7200_s7 + $0x48] sm:$0xff]  ;;  %v3821_v6 = vld [vmem:[%s7201_s8 + $0x58] sm:$0xff] }
 0x4b0   :  { %v3957_v8 = vpop.f32.mrf.mxu0 }
 0x4b1   :  { %v4237_v47 = vpop.f32.mrf.mxu1 }
 0x4b2   :  { %v1466_v59 = vadd.f32 %v4237_v47, %v3956_v7  ;;  %v3958_v50 = vpop.f32.mrf.mxu0  ;;  %v3814_v7 = vld [vmem:[%s7200_s7 + $0x40] sm:$0xff] }
 0x4b3   :  { %v1460_v31 = vpop.f32.mrf.mxu1  ;;  %v3959_v51 = vadd.f32 %v3958_v50, %v3957_v8  ;;  %v3818_v8 = vld [vmem:[%s7201_s8 + $0x40] sm:$0xff] }
 0x4b4   :  { %v1500_v30 = vmul.f32 %v1487_v44, %v1466_v59  ;;  %v1461_v35 = vadd.f32 %v3953_v62, %v1460_v31  ;;  %v3960_v43 = vpop.f32.mrf.mxu0 }
 0x4b5   :  { %v4240_v16 = vpop.f32.mrf.mxu1 }
 0x4b6   :  { %v1499_v29 = vmul.f32 %v1482_v63, %v1461_v35  ;;  %v1524_v14 = vadd.f32 %v1511_v53, %v1500_v30  ;;  %v3961_v49 = vpop.f32.mrf.mxu0  ;;  %v3820_v63 = vld [vmem:[%s7201_s8 + $0x50] sm:$0xff]  ;;  %v6087_v53 = vld [vmem:[%s7379_s0 + $0x3] ss:$0 sm:$0xff] }
 0x4b7   :  { %v1470_v60 = vpop.f32.mrf.mxu1  ;;  %v3962_v12 = vadd.f32 %v3961_v49, %v3960_v43 }
 0x4b8   :  { %v1523_v15 = vadd.f32 %v1506_v45, %v1499_v29  ;;  %v1471_v3 = vadd.f32 %v3959_v51, %v1470_v60  ;;  %v1528_v17 = vadd.f32 %v1524_v14, %v5637_v1  ;;  %v6093_v14 = vld [vmem:[%s7379_s0 + $0x7] ss:$0 sm:$0xff] }
 0x4b9   :  { %v1476_v13 = vadd.f32 %v4240_v16, %v3962_v12 }
 0x4ba   :  { %v1527_v18 = vadd.f32 %v1523_v15, %v5647_v37  ;;  %v1501_v36 = vmul.f32 %v1492_v20, %v1471_v3  ;;  %v5989_v38 = vmax.f32 %v1528_v17, 0.0 }
 0x4bb   :  { %v1502_v1 = vmul.f32 %v1497_v28, %v1476_v13  ;;  %v3816_v28 = vld [vmem:[%s7200_s7 + $0x50] sm:$0xff] }
 0x4bc   :  { %v5983_v19 = vmax.f32 %v1527_v18, 0.0  ;;  %v1525_v46 = vadd.f32 %v1516_v52, %v1501_v36  ;;  %v3819_v52 = vld [vmem:[%s7201_s8 + $0x48] sm:$0xff] }
 0x4bd   :  { %v1526_v20 = vadd.f32 %v1521_v39, %v1502_v1  ;;  %v3817_v39 = vld [vmem:[%s7200_s7 + $0x58] sm:$0xff] }
 0x4be   :  { %1594 = vrot.lane.b32.xlu0 %v5983_v19, %s4477_s3  ;;  %1630 = vrot.lane.b32.xlu1 %v5983_v19, %s4475_s28  ;;  %v1529_v37 = vadd.f32 %v1525_v46, %v5667_v48 }
 0x4bf   :  { %v1530_v21 = vadd.f32 %v1526_v20, %v5657_v5  ;;  %v3803_v5 = vld [vmem:[%s7199_s6 + $0xc8] sm:$0xff]  ;;  %v6105_v20 = vld [vmem:[%s7379_s0 + $0x2] ss:$0 sm:$0xff] }
 0x4c0   :  { %v6000_v44 = vmax.f32 %v1529_v37, 0.0  ;;  %1730 = vmatprep.mubr.f32.mxu1 %v3803_v5  ;;  %v6111_v5 = vld [vmem:[%s7379_s0 + $0x6] ss:$0 sm:$0xff] }
 0x4c1   :  { %v6011_v48 = vmax.f32 %v1530_v21, 0.0 }
 0x4c2   :  { %1596 = vrot.lane.b32.xlu0 %v5989_v38, %s4477_s3  ;;  %1632 = vrot.lane.b32.xlu1 %v5989_v38, %s4475_s28 }
 0x4c6   :  { %1584 = vrot.lane.b32.xlu0 %v5989_v38, %s4478_s26  ;;  %1620 = vrot.lane.b32.xlu1 %v5989_v38, %s4474_s12 }
 0x4ca   :  { %1598 = vrot.lane.b32.xlu0 %v6000_v44, %s4477_s3  ;;  %1634 = vrot.lane.b32.xlu1 %v6000_v44, %s4475_s28 }
 0x4ce   :  { %1586 = vrot.lane.b32.xlu0 %v6000_v44, %s4478_s26  ;;  %1622 = vrot.lane.b32.xlu1 %v6000_v44, %s4474_s12 }
 0x4d2   :  { %1600 = vrot.lane.b32.xlu0 %v6011_v48, %s4477_s3  ;;  %1636 = vrot.lane.b32.xlu1 %v6011_v48, %s4475_s28 }
 0x4d6   :  { %1582 = vrot.lane.b32.xlu0 %v5983_v19, %s4478_s26  ;;  %1618 = vrot.lane.b32.xlu1 %v5983_v19, %s4474_s12 }
 0x4da   :  { %1588 = vrot.lane.b32.xlu0 %v6011_v48, %s4478_s26  ;;  %1624 = vrot.lane.b32.xlu1 %v6011_v48, %s4474_s12 }
 0x4de   :  { %1574 = vrot.lane.b32.xlu0 %v6000_v44, %s4479_s20  ;;  %1610 = vrot.lane.b32.xlu1 %v6000_v44, %s4476_s29 }
 0x4e2   :  { %1576 = vrot.lane.b32.xlu0 %v6011_v48, %s4479_s20  ;;  %1612 = vrot.lane.b32.xlu1 %v6011_v48, %s4476_s29 }
 0x4e6   :  { %1572 = vrot.lane.b32.xlu0 %v5989_v38, %s4479_s20  ;;  %1608 = vrot.lane.b32.xlu1 %v5989_v38, %s4476_s29 }
 0x4ea   :  { %1570 = vrot.lane.b32.xlu0 %v5983_v19, %s4479_s20  ;;  %1606 = vrot.lane.b32.xlu1 %v5983_v19, %s4476_s29 }
 0x4ee   :  { %1562 = vrot.lane.b32.xlu0 %v6000_v44, %s4480_s24  ;;  %1564 = vrot.lane.b32.xlu1 %v6011_v48, %s4480_s24 }
 0x4f2   :  { %1558 = vrot.lane.b32.xlu0 %v5983_v19, %s4480_s24  ;;  %1560 = vrot.lane.b32.xlu1 %v5989_v38, %s4480_s24 }
 0x4f6   :  { %1646 = vrot.lane.b32.xlu0 %v6000_v44, %s7380_s21  ;;  %1648 = vrot.lane.b32.xlu1 %v6011_v48, %s7380_s21 }
 0x4fa   :  { %1642 = vrot.lane.b32.xlu0 %v5983_v19, %s7380_s21  ;;  %1644 = vrot.lane.b32.xlu1 %v5989_v38, %s7380_s21 }
 0x4fe   :  { %1848 = vperm.xlu0 %4431, %v3816_v28   ;;  %1853 = vperm.xlu1 %4432, %v3817_v39  }
 0x502   :  { %1843 = vperm.xlu0 %4431, %v3815_v4   ;;  %1877 = vperm.xlu1 %4432, %v3821_v6  }
 0x506   :  { %1838 = vperm.xlu0 %4431, %v3814_v7   ;;  %1872 = vperm.xlu1 %4432, %v3820_v63  }
 0x50a   :  { %1862 = vperm.xlu0 %4431, %v3818_v8   ;;  %1867 = vperm.xlu1 %4432, %v3819_v52  }
 0x530   :  { %v1595_v47 = vpop.permute.xlu0 %1594  ;;  %v1631_v62 = vpop.permute.xlu1 %1630 }
 0x531   :  { %v1638_v13 = vmul.f32 %v6093_v14, %v1631_v62  ;;  %v1602_v46 = vmul.f32 %v6087_v53, %v1595_v47 }
 0x534   :  { %v1597_v59 = vpop.permute.xlu0 %1596  ;;  %v1633_v50 = vpop.permute.xlu1 %1632 }
 0x535   :  { %v1639_v12 = vmul.f32 %v6093_v14, %v1633_v50  ;;  %v1603_v36 = vmul.f32 %v6087_v53, %v1597_v59  ;;  %v6123_v50 = vld [vmem:[%s7379_s0 + $0x1] ss:$0 sm:$0xff] }
 0x538   :  { %v1585_v31 = vpop.permute.xlu0 %1584  ;;  %v1621_v30 = vpop.permute.xlu1 %1620 }
 0x539   :  { %v1627_v63 = vmul.f32 %v6111_v5, %v1621_v30  ;;  %v1591_v8 = vmul.f32 %v6105_v20, %v1585_v31  ;;  %v6129_v31 = vld [vmem:[%s7379_s0 + $0x5] ss:$0 sm:$0xff] }
 0x53c   :  { %v1599_v51 = vpop.permute.xlu0 %1598  ;;  %v1635_v35 = vpop.permute.xlu1 %1634 }
 0x53d   :  { %v1640_v3 = vmul.f32 %v6093_v14, %v1635_v35  ;;  %v1604_v49 = vmul.f32 %v6087_v53, %v1599_v51 }
 0x540   :  { %v1587_v43 = vpop.permute.xlu0 %1586  ;;  %v1623_v16 = vpop.permute.xlu1 %1622 }
 0x541   :  { %v1628_v39 = vmul.f32 %v6111_v5, %v1623_v16  ;;  %v1592_v4 = vmul.f32 %v6105_v20, %v1587_v43 }
 0x544   :  { %v1601_v45 = vpop.permute.xlu0 %1600  ;;  %v1637_v29 = vpop.permute.xlu1 %1636 }
 0x545   :  { %v1605_v60 = vmul.f32 %v6087_v53, %v1601_v45  ;;  %v1641_v15 = vmul.f32 %v6093_v14, %v1637_v29 }
 0x547   :  { %3971 = vmatprep.subr.mxu1 %v1641_v15 }
 0x548   :  { %v1583_v18 = vpop.permute.xlu0 %1582  ;;  %3972 = vmatpush3.msra.mxu1 %v1605_v60  ;;  %v1619_v17 = vpop.permute.xlu1 %1618 }
 0x549   :  { %3973 = vmatprep.subr.mxu1 %v1640_v3  ;;  %v1626_v52 = vmul.f32 %v6111_v5, %v1619_v17  ;;  %v1590_v47 = vmul.f32 %v6105_v20, %v1583_v18 }
 0x54a   :  { %3974 = vmatpush3.msra.mxu1 %v1604_v49 }
 0x54b   :  { %3975 = vmatprep.subr.mxu1 %v1639_v12 }
 0x54c   :  { %v1589_v1 = vpop.permute.xlu0 %1588  ;;  %3976 = vmatpush3.msra.mxu1 %v1603_v36  ;;  %v1625_v37 = vpop.permute.xlu1 %1624  ;;  %v6141_v36 = vld [vmem:[%s7379_s0] ss:$0 sm:$0xff] }
 0x54d   :  { %v1593_v21 = vmul.f32 %v6105_v20, %v1589_v1  ;;  %v1629_v28 = vmul.f32 %v6111_v5, %v1625_v37  ;;  %3977 = vmatprep.subr.mxu1 %v1638_v13 }
 0x54e   :  { %3978 = vmatpush3.msra.mxu1 %v1602_v46 }
 0x54f   :  { %3979 = vmatprep.subr.mxu1 %v1629_v28 }
 0x550   :  { %v1575_v6 = vpop.permute.xlu0 %1574  ;;  %3980 = vmatpush3.msra.mxu1 %v1593_v21  ;;  %v1611_v7 = vpop.permute.xlu1 %1610 }
 0x551   :  { %3981 = vmatprep.subr.mxu1 %v1628_v39  ;;  %v1616_v35 = vmul.f32 %v6129_v31, %v1611_v7  ;;  %v1580_v43 = vmul.f32 %v6123_v50, %v1575_v6  ;;  %v3802_v39 = vld [vmem:[%s7199_s6 + $0xc0] sm:$0xff] }
 0x552   :  { %3982 = vmatpush3.msra.mxu1 %v1592_v4  ;;  %v3806_v7 = vld [vmem:[%s7199_s6 + $0xe0] sm:$0xff] }
 0x553   :  { %3983 = vmatprep.subr.mxu1 %v1627_v63  ;;  %v6160_v63 = vld [vmem:[%s7379_s0 + $0x8] ss:$0 sm:$0xff] }
 0x554   :  { %v1577_v62 = vpop.permute.xlu0 %1576  ;;  %3984 = vmatpush3.msra.mxu1 %v1591_v8  ;;  %v1613_v59 = vpop.permute.xlu1 %1612 }
 0x555   :  { %v1581_v51 = vmul.f32 %v6123_v50, %v1577_v62  ;;  %v1617_v30 = vmul.f32 %v6129_v31, %v1613_v59  ;;  %3985 = vmatprep.subr.mxu1 %v1626_v52  ;;  %v3809_v59 = vld [vmem:[%s7199_s6 + $0xf8] sm:$0xff] }
 0x556   :  { %3986 = vmatpush3.msra.mxu1 %v1590_v47  ;;  %v3805_v47 = vld [vmem:[%s7199_s6 + $0xd8] sm:$0xff] }
 0x557   :  { %3987 = vmatprep.subr.mxu1 %v1617_v30 }
 0x558   :  { %v1573_v16 = vpop.permute.xlu0 %1572  ;;  %3988 = vmatpush3.msra.mxu1 %v1581_v51  ;;  %v1609_v45 = vpop.permute.xlu1 %1608 }
 0x559   :  { %v1579_v29 = vmul.f32 %v6123_v50, %v1573_v16  ;;  %v1615_v60 = vmul.f32 %v6129_v31, %v1609_v45  ;;  %3989 = vmatprep.subr.mxu1 %v1616_v35  ;;  %v3808_v35 = vld [vmem:[%s7199_s6 + $0xf0] sm:$0xff]  ;;  %v3811_v45 = vld [vmem:[%s7199_s6 + $0x108] sm:$0xff] }
 0x55a   :  { %3990 = vmatpush3.msra.mxu1 %v1580_v43  ;;  %v3812_v16 = vld [vmem:[%s7199_s6 + $0x110] sm:$0xff] }
 0x55b   :  { %3991 = vmatprep.subr.mxu1 %v1615_v60  ;;  %v3807_v60 = vld [vmem:[%s7199_s6 + $0xe8] sm:$0xff] }
 0x55c   :  { %v1571_v15 = vpop.permute.xlu0 %1570  ;;  %3992 = vmatpush3.msra.mxu1 %v1579_v29  ;;  %v1607_v3 = vpop.permute.xlu1 %1606  ;;  %v3804_v29 = vld [vmem:[%s7199_s6 + $0xd0] sm:$0xff] }
 0x55d   :  { %v1578_v49 = vmul.f32 %v6123_v50, %v1571_v15  ;;  %v1614_v18 = vmul.f32 %v6129_v31, %v1607_v3  ;;  %v3810_v15 = vld [vmem:[%s7199_s6 + $0x100] sm:$0xff]  ;;  %v3813_v3 = vld [vmem:[%s7199_s6 + $0x118] sm:$0xff] }
 0x55f   :  { %3993 = vmatprep.subr.mxu1 %v1614_v18 }
 0x560   :  { %v1563_v17 = vpop.permute.xlu0 %1562  ;;  %3994 = vmatpush3.msra.mxu1 %v1578_v49  ;;  %v1565_v12 = vpop.permute.xlu1 %1564 }
 0x561   :  { %v1569_v13 = vmul.f32 %v6141_v36, %v1565_v12  ;;  %3995 = vmatprep.subr.mxu1 %v6011_v48  ;;  %v1568_v46 = vmul.f32 %v6141_v36, %v1563_v17 }
 0x563   :  { %3996 = vmatpush3.msra.mxu1 %v1569_v13 }
 0x564   :  { %v1559_v1 = vpop.permute.xlu0 %1558  ;;  %3997 = vmatprep.subr.mxu1 %v6000_v44  ;;  %v1561_v37 = vpop.permute.xlu1 %1560 }
 0x565   :  { %v1567_v21 = vmul.f32 %v6141_v36, %v1561_v37  ;;  %3998 = vmatpush3.msra.mxu1 %v1568_v46  ;;  %v1566_v28 = vmul.f32 %v6141_v36, %v1559_v1 }
 0x566   :  { %3999 = vmatprep.subr.mxu1 %v5989_v38 }
 0x567   :  { %4000 = vmatpush3.msra.mxu1 %v1567_v21 }
 0x568   :  { %v1647_v4 = vpop.permute.xlu0 %1646  ;;  %4001 = vmatprep.subr.mxu1 %v5983_v19  ;;  %v1649_v6 = vpop.permute.xlu1 %1648 }
 0x569   :  { %v1653_v8 = vmul.f32 %v6160_v63, %v1649_v6  ;;  %4002 = vmatpush3.msra.mxu1 %v1566_v28  ;;  %v1652_v52 = vmul.f32 %v6160_v63, %v1647_v4 }
 0x56a   :  { %1731 = vmatmul.mubr.f32.vlgmr.msra.gmra.mxu1 %v3802_v39 }
 0x56b   :  { %4241 = vmatprep.subr.mxu1 %v1653_v8  ;;  %1735 = vmatprep.mubr.f32.mxu1 %v3806_v7 }
 0x56c   :  { %4242 = vmatpush3.msra.mxu1 %v1653_v8  ;;  %v1645_v62 = vpop.permute.xlu1 %1644  ;;  %v1643_v51 = vpop.permute.xlu0 %1642 }
 0x56d   :  { %v1651_v30 = vmul.f32 %v6160_v63, %v1645_v62  ;;  %4243 = vmatprep.subr.mxu1 %v1652_v52  ;;  %v1650_v43 = vmul.f32 %v6160_v63, %v1643_v51 }
 0x56e   :  { %1736 = vmatmul.mubr.f32.gmra.mxu1 %v3805_v47 }
 0x56f   :  { %4244 = vmatpush3.msra.mxu1 %v1652_v52  ;;  %1740 = vmatprep.mubr.f32.mxu1 %v3809_v59 }
 0x570   :  { %4245 = vmatprep.subr.mxu1 %v1651_v30 }
 0x571   :  { %4246 = vmatpush3.msra.mxu1 %v1651_v30 }
 0x572   :  { %4247 = vmatprep.subr.mxu1 %v1650_v43  ;;  %1741 = vmatmul.mubr.f32.gmra.mxu1 %v3808_v35 }
 0x573   :  { %4248 = vmatpush3.msra.mxu1 %v1650_v43  ;;  %1745 = vmatprep.mubr.f32.mxu1 %v3812_v16 }
 0x576   :  { %1746 = vmatmul.mubr.f32.gmra.mxu1 %v3811_v45 }
 0x577   :  { %4249 = vmatprep.mubr.msk.f32.mxu1 %vm943_vm1, %v3804_v29 }
 0x579   :  { %v1854_v18 = vpop.permute.xlu1 %1853  ;;  %v1849_v46 = vpop.permute.xlu0 %1848 }
 0x57a   :  { %4250 = vmatmul.mubr.msk.f32.vlgmr.msra.gmra.mxu1 %vm943_vm1, %v3807_v60 }
 0x57b   :  { %4252 = vmatprep.mubr.msk.f32.mxu1 %vm943_vm1, %v3810_v15 }
 0x57d   :  { %v1878_v1 = vpop.permute.xlu1 %1877  ;;  %v1844_v39 = vpop.permute.xlu0 %1843 }
 0x57e   :  { %4253 = vmatmul.mubr.msk.f32.gmra.mxu1 %vm943_vm1, %v3813_v3 }
 0x581   :  { %v1873_v4 = vpop.permute.xlu1 %1872  ;;  %v1839_v30 = vpop.permute.xlu0 %1838 }
 0x585   :  { %v1868_v35 = vpop.permute.xlu1 %1867  ;;  %v1863_v15 = vpop.permute.xlu0 %1862 }
 0x62a   :  { %v4003_v49 = vpop.f32.mrf.mxu1 }
 0x62c   :  { %v4004_v17 = vpop.f32.mrf.mxu1 }
 0x62d   :  { %v4005_v52 = vadd.f32 %v4004_v17, %v4003_v49 }
 0x62e   :  { %v4006_v12 = vpop.f32.mrf.mxu1 }
 0x630   :  { %v4007_v13 = vpop.f32.mrf.mxu1 }
 0x631   :  { %v4008_v7 = vadd.f32 %v4007_v13, %v4006_v12 }
 0x632   :  { %v4009_v37 = vpop.f32.mrf.mxu1 }
 0x634   :  { %v4010_v21 = vpop.f32.mrf.mxu1 }
 0x636   :  { %v4012_v28 = vpop.f32.mrf.mxu1 }
 0x638   :  { %v4013_v6 = vpop.f32.mrf.mxu1 }
 0x639   :  { %v4014_v60 = vadd.f32 %v4013_v6, %v4012_v28  ;;  %v4011_v28 = vadd.f32 %v4010_v21, %v4009_v37  ;;  %v3828_v37 = vld [vmem:[%s7199_s6 + $0x130] sm:$0xff] }
 0x63a   :  { %v4251_v8 = vpop.f32.mrf.mxu1  ;;  %4263 = vmatprep.mubr.msk.f32.mxu1 %vm943_vm1, %v3828_v37  ;;  %v3840_v21 = vld [vmem:[%s7200_s7 + $0x70] sm:$0xff] }
 0x63b   :  { %v1823_v47 = vadd.f32 %v4251_v8, %v4008_v7 }
 0x63c   :  { %v1817_v62 = vpop.f32.mrf.mxu1 }
 0x63d   :  { %v1857_v59 = vmul.f32 %v1844_v39, %v1823_v47  ;;  %v1818_v51 = vadd.f32 %v4005_v52, %v1817_v62  ;;  %v3839_v52 = vld [vmem:[%s7200_s7 + $0x68] sm:$0xff]  ;;  %v3845_v47 = vld [vmem:[%s7201_s8 + $0x78] sm:$0xff]  ;;  %v3838_v62 = vld [vmem:[%s7200_s7 + $0x60] sm:$0xff] }
 0x63e   :  { %v4254_v29 = vpop.f32.mrf.mxu1 }
 0x63f   :  { %v1881_v43 = vadd.f32 %v1868_v35, %v1857_v59  ;;  %v1856_v45 = vmul.f32 %v1839_v30, %v1818_v51  ;;  %v1833_v49 = vadd.f32 %v4254_v29, %v4014_v60  ;;  %v3844_v59 = vld [vmem:[%s7201_s8 + $0x70] sm:$0xff]  ;;  %v3842_v51 = vld [vmem:[%s7201_s8 + $0x60] sm:$0xff]  ;;  %v3843_v30 = vld [vmem:[%s7201_s8 + $0x68] sm:$0xff] }
 0x640   :  { %v1827_v13 = vpop.f32.mrf.mxu1  ;;  %v2329_v35 = vld [vmem:[%s7203_s10 + $0x8] sm:$0xf]  ;;  %v2342_v29 = vld [vmem:[%s7204_s11] sm:$0xff] }
 0x641   :  { %v6197_v16 = vmax.f32 %v1881_v43, 0.0  ;;  %v1880_v3 = vadd.f32 %v1863_v15, %v1856_v45  ;;  %v1859_v12 = vmul.f32 %v1854_v18, %v1833_v49  ;;  %v1828_v6 = vadd.f32 %v4011_v28, %v1827_v13  ;;  %v2328_v43 = vld [vmem:[%s7203_s10] sm:$0xff]  ;;  %v2343_v45 = vld [vmem:[%s7204_s11 + $0x8] sm:$0xf] }
 0x643   :  { %1949 = vrot.lane.b32.xlu0 %v6197_v16, %s4477_s3  ;;  %1985 = vrot.lane.b32.xlu1 %v6197_v16, %s4475_s28  ;;  %v6207_v17 = vmax.f32 %v1880_v3, 0.0  ;;  %v1883_v39 = vadd.f32 %v1878_v1, %v1859_v12  ;;  %v1858_v8 = vmul.f32 %v1849_v46, %v1828_v6  ;;  %v3827_v46 = vld [vmem:[%s7199_s6 + $0x128] sm:$0xff] }
 0x644   :  { %2083 = vmatprep.mubr.f32.mxu0 %v3827_v46 }
 0x645   :  { %v6217_v7 = vmax.f32 %v1883_v39, 0.0  ;;  %v1882_v18 = vadd.f32 %v1873_v4, %v1858_v8  ;;  %v3841_v4 = vld [vmem:[%s7200_s7 + $0x78] sm:$0xff] }
 0x647   :  { %1937 = vrot.lane.b32.xlu0 %v6197_v16, %s4478_s26  ;;  %1973 = vrot.lane.b32.xlu1 %v6197_v16, %s4474_s12  ;;  %v6227_v1 = vmax.f32 %v1882_v18, 0.0 }
 0x64b   :  { %1947 = vrot.lane.b32.xlu0 %v6207_v17, %s4477_s3  ;;  %1983 = vrot.lane.b32.xlu1 %v6207_v17, %s4475_s28 }
 0x64f   :  { %1935 = vrot.lane.b32.xlu0 %v6207_v17, %s4478_s26  ;;  %1971 = vrot.lane.b32.xlu1 %v6207_v17, %s4474_s12 }
 0x653   :  { %1953 = vrot.lane.b32.xlu0 %v6217_v7, %s4477_s3  ;;  %1989 = vrot.lane.b32.xlu1 %v6217_v7, %s4475_s28 }
 0x657   :  { %1941 = vrot.lane.b32.xlu0 %v6217_v7, %s4478_s26  ;;  %1977 = vrot.lane.b32.xlu1 %v6217_v7, %s4474_s12 }
 0x65b   :  { %1951 = vrot.lane.b32.xlu0 %v6227_v1, %s4477_s3  ;;  %1987 = vrot.lane.b32.xlu1 %v6227_v1, %s4475_s28 }
 0x65f   :  { %1929 = vrot.lane.b32.xlu0 %v6217_v7, %s4479_s20  ;;  %1965 = vrot.lane.b32.xlu1 %v6217_v7, %s4476_s29 }
 0x663   :  { %1939 = vrot.lane.b32.xlu0 %v6227_v1, %s4478_s26  ;;  %1975 = vrot.lane.b32.xlu1 %v6227_v1, %s4474_s12 }
 0x667   :  { %1925 = vrot.lane.b32.xlu0 %v6197_v16, %s4479_s20  ;;  %1961 = vrot.lane.b32.xlu1 %v6197_v16, %s4476_s29 }
 0x66b   :  { %1927 = vrot.lane.b32.xlu0 %v6227_v1, %s4479_s20  ;;  %1963 = vrot.lane.b32.xlu1 %v6227_v1, %s4476_s29 }
 0x66f   :  { %1923 = vrot.lane.b32.xlu0 %v6207_v17, %s4479_s20  ;;  %1959 = vrot.lane.b32.xlu1 %v6207_v17, %s4476_s29 }
 0x673   :  { %1915 = vrot.lane.b32.xlu0 %v6227_v1, %s4480_s24  ;;  %1917 = vrot.lane.b32.xlu1 %v6217_v7, %s4480_s24 }
 0x677   :  { %1911 = vrot.lane.b32.xlu0 %v6207_v17, %s4480_s24  ;;  %1913 = vrot.lane.b32.xlu1 %v6197_v16, %s4480_s24 }
 0x67b   :  { %1999 = vrot.lane.b32.xlu0 %v6227_v1, %s7380_s21  ;;  %2001 = vrot.lane.b32.xlu1 %v6217_v7, %s7380_s21 }
 0x67f   :  { %1995 = vrot.lane.b32.xlu0 %v6207_v17, %s7380_s21  ;;  %1997 = vrot.lane.b32.xlu1 %v6197_v16, %s7380_s21 }
 0x683   :  { %2201 = vperm.xlu0 %4431, %v3840_v21   ;;  %2206 = vperm.xlu1 %4432, %v3841_v4  }
 0x687   :  { %2196 = vperm.xlu0 %4431, %v3839_v52   ;;  %2230 = vperm.xlu1 %4432, %v3845_v47  }
 0x68b   :  { %2191 = vperm.xlu0 %4431, %v3838_v62   ;;  %2225 = vperm.xlu1 %4432, %v3844_v59  }
 0x68f   :  { %2215 = vperm.xlu0 %4431, %v3842_v51   ;;  %2220 = vperm.xlu1 %4432, %v3843_v30  }
 0x693   :  { %2337 = vperm.xlu0 %4431, %v2329_v35   ;;  %2332 = vperm.xlu1 %4432, %v2328_v43  }
 0x697   :  { %2351 = vperm.xlu0 %4431, %v2343_v45   ;;  %2346 = vperm.xlu1 %4432, %v2342_v29  }
 0x6b5   :  { %v1950_v60 = vpop.permute.xlu0 %1949  ;;  %v1986_v15 = vpop.permute.xlu1 %1985 }
 0x6b6   :  { %v1992_v59 = vmul.f32 %v6093_v14, %v1986_v15  ;;  %v1956_v51 = vmul.f32 %v6087_v53, %v1950_v60 }
 0x6b9   :  { %v1938_v3 = vpop.permute.xlu0 %1937  ;;  %v1974_v49 = vpop.permute.xlu1 %1973 }
 0x6bd   :  { %v1948_v12 = vpop.permute.xlu0 %1947  ;;  %v1984_v13 = vpop.permute.xlu1 %1983 }
 0x6be   :  { %v1991_v43 = vmul.f32 %v6093_v14, %v1984_v13  ;;  %v1955_v45 = vmul.f32 %v6087_v53, %v1948_v12 }
 0x6c1   :  { %v1936_v28 = vpop.permute.xlu0 %1935  ;;  %v1972_v39 = vpop.permute.xlu1 %1971 }
 0x6c5   :  { %v1954_v6 = vpop.permute.xlu0 %1953  ;;  %v1990_v8 = vpop.permute.xlu1 %1989 }
 0x6c6   :  { %v1958_v18 = vmul.f32 %v6087_v53, %v1954_v6  ;;  %v1994_v46 = vmul.f32 %v6093_v14, %v1990_v8 }
 0x6c8   :  { %4023 = vmatprep.subr.mxu0 %v1994_v46  ;;  %v1979_v46 = vmul.f32 %v6111_v5, %v1972_v39 }
 0x6c9   :  { %v1942_v37 = vpop.permute.xlu0 %1941  ;;  %4024 = vmatpush3.msra.mxu0 %v1958_v18  ;;  %v1978_v21 = vpop.permute.xlu1 %1977 }
 0x6ca   :  { %v1982_v29 = vmul.f32 %v6111_v5, %v1978_v21  ;;  %v1946_v6 = vmul.f32 %v6105_v20, %v1942_v37  ;;  %v1943_v37 = vmul.f32 %v6105_v20, %v1936_v28 }
 0x6cd   :  { %v1952_v4 = vpop.permute.xlu0 %1951  ;;  %v1988_v52 = vpop.permute.xlu1 %1987 }
 0x6ce   :  { %v1957_v47 = vmul.f32 %v6087_v53, %v1952_v4  ;;  %v1993_v62 = vmul.f32 %v6093_v14, %v1988_v52  ;;  %v1980_v14 = vmul.f32 %v6111_v5, %v1974_v49  ;;  %v1944_v53 = vmul.f32 %v6105_v20, %v1938_v3 }
 0x6d0   :  { %4025 = vmatprep.subr.mxu0 %v1993_v62 }
 0x6d1   :  { %v1930_v30 = vpop.permute.xlu0 %1929  ;;  %4026 = vmatpush3.msra.mxu0 %v1957_v47  ;;  %v1966_v35 = vpop.permute.xlu1 %1965 }
 0x6d2   :  { %4027 = vmatprep.subr.mxu0 %v1992_v59  ;;  %v1970_v21 = vmul.f32 %v6129_v31, %v1966_v35  ;;  %v1934_v4 = vmul.f32 %v6123_v50, %v1930_v30 }
 0x6d3   :  { %4028 = vmatpush3.msra.mxu0 %v1956_v51 }
 0x6d4   :  { %4029 = vmatprep.subr.mxu0 %v1991_v43 }
 0x6d5   :  { %v1940_v8 = vpop.permute.xlu0 %1939  ;;  %4030 = vmatpush3.msra.mxu0 %v1955_v45  ;;  %v1976_v15 = vpop.permute.xlu1 %1975 }
 0x6d6   :  { %v1945_v18 = vmul.f32 %v6105_v20, %v1940_v8  ;;  %v1981_v60 = vmul.f32 %v6111_v5, %v1976_v15  ;;  %4031 = vmatprep.subr.mxu0 %v1982_v29 }
 0x6d7   :  { %4032 = vmatpush3.msra.mxu0 %v1946_v6  ;;  %v3826_v6 = vld [vmem:[%s7199_s6 + $0x120] sm:$0xff] }
 0x6d8   :  { %4033 = vmatprep.subr.mxu0 %v1981_v60  ;;  %v3833_v60 = vld [vmem:[%s7199_s6 + $0x158] sm:$0xff] }
 0x6d9   :  { %v1926_v12 = vpop.permute.xlu0 %1925  ;;  %4034 = vmatpush3.msra.mxu0 %v1945_v18  ;;  %v1962_v13 = vpop.permute.xlu1 %1961 }
 0x6da   :  { %4035 = vmatprep.subr.mxu0 %v1980_v14  ;;  %v1968_v5 = vmul.f32 %v6129_v31, %v1962_v13  ;;  %v1932_v20 = vmul.f32 %v6123_v50, %v1926_v12  ;;  %v3832_v12 = vld [vmem:[%s7199_s6 + $0x150] sm:$0xff]  ;;  %v3831_v13 = vld [vmem:[%s7199_s6 + $0x148] sm:$0xff] }
 0x6db   :  { %4036 = vmatpush3.msra.mxu0 %v1944_v53 }
 0x6dc   :  { %4037 = vmatprep.subr.mxu0 %v1979_v46  ;;  %v3836_v46 = vld [vmem:[%s7199_s6 + $0x170] sm:$0xff] }
 0x6dd   :  { %v1928_v52 = vpop.permute.xlu0 %1927  ;;  %4038 = vmatpush3.msra.mxu0 %v1943_v37  ;;  %v1964_v49 = vpop.permute.xlu1 %1963  ;;  %v3835_v37 = vld [vmem:[%s7199_s6 + $0x168] sm:$0xff] }
 0x6de   :  { %v1933_v47 = vmul.f32 %v6123_v50, %v1928_v52  ;;  %v1969_v3 = vmul.f32 %v6129_v31, %v1964_v49  ;;  %4039 = vmatprep.subr.mxu0 %v1970_v21  ;;  %v3837_v21 = vld [vmem:[%s7199_s6 + $0x178] sm:$0xff] }
 0x6df   :  { %4040 = vmatpush3.msra.mxu0 %v1934_v4  ;;  %v2245_v4 = vld [vmem:[%s7202_s9] sm:$0xff] }
 0x6e0   :  { %4041 = vmatprep.subr.mxu0 %v1969_v3 }
 0x6e1   :  { %v1924_v28 = vpop.permute.xlu0 %1923  ;;  %4042 = vmatpush3.msra.mxu0 %v1933_v47  ;;  %v1960_v39 = vpop.permute.xlu1 %1959 }
 0x6e2   :  { %v1931_v62 = vmul.f32 %v6123_v50, %v1924_v28  ;;  %v1967_v59 = vmul.f32 %v6129_v31, %v1960_v39  ;;  %4043 = vmatprep.subr.mxu0 %v1968_v5 }
 0x6e3   :  { %4044 = vmatpush3.msra.mxu0 %v1932_v20 }
 0x6e4   :  { %4045 = vmatprep.subr.mxu0 %v1967_v59 }
 0x6e5   :  { %v1916_v51 = vpop.permute.xlu0 %1915  ;;  %4046 = vmatpush3.msra.mxu0 %v1931_v62  ;;  %v1918_v30 = vpop.permute.xlu1 %1917 }
 0x6e6   :  { %v1922_v35 = vmul.f32 %v6141_v36, %v1918_v30  ;;  %4047 = vmatprep.subr.mxu0 %v6217_v7  ;;  %v1921_v43 = vmul.f32 %v6141_v36, %v1916_v51 }
 0x6e8   :  { %4048 = vmatpush3.msra.mxu0 %v1922_v35 }
 0x6e9   :  { %v1912_v45 = vpop.permute.xlu0 %1911  ;;  %4049 = vmatprep.subr.mxu0 %v6227_v1  ;;  %v1914_v29 = vpop.permute.xlu1 %1913  ;;  %v3830_v1 = vld [vmem:[%s7199_s6 + $0x140] sm:$0xff] }
 0x6ea   :  { %v1920_v50 = vmul.f32 %v6141_v36, %v1914_v29  ;;  %4050 = vmatpush3.msra.mxu0 %v1921_v43  ;;  %v1919_v31 = vmul.f32 %v6141_v36, %v1912_v45  ;;  %v3829_v36 = vld [vmem:[%s7199_s6 + $0x138] sm:$0xff] }
 0x6eb   :  { %4051 = vmatprep.subr.mxu0 %v6197_v16 }
 0x6ec   :  { %4052 = vmatpush3.msra.mxu0 %v1920_v50 }
 0x6ed   :  { %v2000_v7 = vpop.permute.xlu0 %1999  ;;  %4053 = vmatprep.subr.mxu0 %v6207_v17  ;;  %v2002_v8 = vpop.permute.xlu1 %2001 }
 0x6ee   :  { %v2006_v15 = vmul.f32 %v6160_v63, %v2002_v8  ;;  %4054 = vmatpush3.msra.mxu0 %v1919_v31  ;;  %v2005_v16 = vmul.f32 %v6160_v63, %v2000_v7 }
 0x6ef   :  { %2084 = vmatmul.mubr.f32.vlgmr.msra.gmra.mxu0 %v3826_v6 }
 0x6f0   :  { %4255 = vmatprep.subr.mxu1 %v2006_v15  ;;  %2088 = vmatprep.mubr.f32.mxu0 %v3830_v1 }
 0x6f1   :  { %v1996_v18 = vpop.permute.xlu0 %1995  ;;  %4256 = vmatpush3.msra.mxu1 %v2006_v15  ;;  %v1998_v17 = vpop.permute.xlu1 %1997 }
 0x6f2   :  { %v2004_v14 = vmul.f32 %v6160_v63, %v1998_v17  ;;  %4257 = vmatprep.subr.mxu1 %v2005_v16  ;;  %v2003_v53 = vmul.f32 %v6160_v63, %v1996_v18  ;;  %v3834_v63 = vld [vmem:[%s7199_s6 + $0x160] sm:$0xff] }
 0x6f3   :  { %2089 = vmatmul.mubr.f32.gmra.mxu0 %v3829_v36  ;;  %4258 = vmatpush3.msra.mxu1 %v2005_v16 }
 0x6f4   :  { %4259 = vmatprep.subr.mxu1 %v2004_v14  ;;  %2093 = vmatprep.mubr.f32.mxu0 %v3833_v60 }
 0x6f5   :  { %4260 = vmatpush3.msra.mxu1 %v2004_v14 }
 0x6f6   :  { %4261 = vmatprep.subr.mxu1 %v2003_v53 }
 0x6f7   :  { %2094 = vmatmul.mubr.f32.gmra.mxu0 %v3832_v12  ;;  %4262 = vmatpush3.msra.mxu1 %v2003_v53 }
 0x6f8   :  { %4264 = vmatmul.mubr.msk.f32.vlgmr.msra.gmra.mxu1 %vm943_vm1, %v3831_v13  ;;  %2098 = vmatprep.mubr.f32.mxu0 %v3836_v46 }
 0x6f9   :  { %4266 = vmatprep.mubr.msk.f32.mxu1 %vm943_vm1, %v3834_v63 }
 0x6fb   :  { %2099 = vmatmul.mubr.f32.gmra.mxu0 %v3835_v37 }
 0x6fc   :  { %4267 = vmatmul.mubr.msk.f32.gmra.mxu1 %vm943_vm1, %v3837_v21 }
 0x6fd   :  { %4277 = vmatprep.mubr.msk.f32.mxu1 %vm943_vm1, %v2245_v4 }
 0x6fe   :  { %v2207_v49 = vpop.permute.xlu1 %2206  ;;  %v2202_v3 = vpop.permute.xlu0 %2201 }
 0x702   :  { %v2231_v28 = vpop.permute.xlu1 %2230  ;;  %v2197_v51 = vpop.permute.xlu0 %2196 }
 0x706   :  { %v2226_v31 = vpop.permute.xlu1 %2225  ;;  %v2192_v16 = vpop.permute.xlu0 %2191 }
 0x70a   :  { %v2221_v12 = vpop.permute.xlu1 %2220  ;;  %v2216_v37 = vpop.permute.xlu0 %2215 }
 0x7af   :  { %v4055_v52 = vpop.f32.mrf.mxu0 }
 0x7b1   :  { %v4056_v47 = vpop.f32.mrf.mxu0 }
 0x7b2   :  { %v4057_v45 = vadd.f32 %v4056_v47, %v4055_v52 }
 0x7b3   :  { %v4058_v5 = vpop.f32.mrf.mxu0 }
 0x7b5   :  { %v4059_v20 = vpop.f32.mrf.mxu0 }
 0x7b6   :  { %v4060_v62 = vadd.f32 %v4059_v20, %v4058_v5 }
 0x7b7   :  { %v4061_v39 = vpop.f32.mrf.mxu0 }
 0x7b8   :  { %v4265_v59 = vpop.f32.mrf.mxu1 }
 0x7b9   :  { %v4062_v30 = vpop.f32.mrf.mxu0  ;;  %v2176_v29 = vadd.f32 %v4265_v59, %v4060_v62 }
 0x7ba   :  { %v2170_v35 = vpop.f32.mrf.mxu1  ;;  %v4063_v6 = vadd.f32 %v4062_v30, %v4061_v39 }
 0x7bb   :  { %v4064_v43 = vpop.f32.mrf.mxu0  ;;  %v2171_v8 = vadd.f32 %v4057_v45, %v2170_v35  ;;  %v2210_v18 = vmul.f32 %v2197_v51, %v2176_v29 }
 0x7bc   :  { %v4268_v50 = vpop.f32.mrf.mxu1 }
 0x7bd   :  { %v4065_v7 = vpop.f32.mrf.mxu0  ;;  %v2209_v14 = vmul.f32 %v2192_v16, %v2171_v8  ;;  %v2234_v46 = vadd.f32 %v2221_v12, %v2210_v18 }
 0x7be   :  { %v4066_v1 = vadd.f32 %v4065_v7, %v4064_v43  ;;  %v2180_v15 = vpop.f32.mrf.mxu1 }
 0x7bf   :  { %v2181_v36 = vadd.f32 %v4063_v6, %v2180_v15  ;;  %v2233_v21 = vadd.f32 %v2216_v37, %v2209_v14  ;;  %v2238_v5 = vadd.f32 %v2234_v46, %v5989_v38  ;;  %v2338_v38 = vpop.permute.xlu0 %2337 }
 0x7c0   :  { %v2186_v17 = vadd.f32 %v4268_v50, %v4066_v1 }
 0x7c1   :  { %v2211_v60 = vmul.f32 %v2202_v3, %v2181_v36  ;;  %v2237_v39 = vadd.f32 %v2233_v21, %v5983_v19 }
 0x7c2   :  { %v2212_v53 = vmul.f32 %v2207_v49, %v2186_v17  ;;  %v2242_v49 = vmax.f32 %v2238_v5, 0.0 }
 0x7c3   :  { %v2235_v13 = vadd.f32 %v2226_v31, %v2211_v60  ;;  %v2241_v3 = vmax.f32 %v2237_v39, 0.0  ;;  %v2352_v19 = vpop.permute.xlu0 %2351 }
 0x7c4   :  { %v2236_v63 = vadd.f32 %v2231_v28, %v2212_v53 }
 0x7c5   :  { %v2239_v52 = vadd.f32 %v2235_v13, %v6000_v44  ;;  %v2333_v44 = vpop.permute.xlu1 %2332 }
 0x7c6   :  { %v2240_v4 = vadd.f32 %v2236_v63, %v6011_v48  ;;  %v2246_v48 = vld [vmem:[%s7202_s9 + $0x8] sm:$0xf] }
 0x7c7   :  { %v2243_v20 = vmax.f32 %v2239_v52, 0.0 }
 0x7c8   :  { %v2244_v47 = vmax.f32 %v2240_v4, 0.0 }
 0x7c9   :  { %v2347_v35 = vpop.permute.xlu1 %2346 }
 0x7ca   :  { %4269 = vmatprep.subr.mxu1 %v2244_v47 }
 0x7cb   :  { %4270 = vmatpush3.msra.mxu1 %v2244_v47 }
 0x7cc   :  { %4271 = vmatprep.subr.mxu1 %v2243_v20 }
 0x7cd   :  { %4272 = vmatpush3.msra.mxu1 %v2243_v20 }
 0x7ce   :  { %4273 = vmatprep.subr.mxu1 %v2242_v49 }
 0x7cf   :  { %4274 = vmatpush3.msra.mxu1 %v2242_v49 }
 0x7d0   :  { %4275 = vmatprep.subr.mxu1 %v2241_v3 }
 0x7d1   :  { %4276 = vmatpush3.msra.mxu1 %v2241_v3 }
 0x7d2   :  { %4278 = vmatmul.mubr.msk.f32.vlgmr.msra.gmra.mxu1 %vm943_vm1, %v2246_v48 }
 0x892   :  { %v4279_v28 = vpop.f32.mrf.mxu1 }
 0x893   :  { %v2341_v62 = vmul.f32 %v4279_v28, %v2338_v38 }
 0x894   :  { %v2319_v59 = vpop.f32.mrf.mxu1 }
 0x895   :  { %v2355_v51 = vadd.f32 %v2352_v19, %v2341_v62  ;;  %v2340_v30 = vmul.f32 %v2333_v44, %v2319_v59 }
 0x897   :  { %v6393_v43 = vmax.f32 %v2355_v51, 0.0  ;;  %v2354_v45 = vadd.f32 %v2347_v35, %v2340_v30 }
 0x899   :  { %v6395_v29 = vmax.f32 %v2354_v45, 0.0 }
 0x89a   :  { %4467 = dma.done.wait [#allocation4], 8320 }
 0x89b   :  { %4468 = vsyncadd [#allocation4], 4294958976  ;;  %v2380_v50 = vlaneseq  ;;  %v7381_v31 = vmov 0   ;;  %v7238_v6 = vmov 0.0   ;;  %vm4483_vm2 = vmmov 0   ;;  %v2371_v53 = vld [vmem:[#allocation2 + $0xe0] sm:$0xff]  ;;  %4339 = vmatprep.subr.mxu0 %v5535_v27 }
 0x89c   :  { %4441 = vset.pattern.permute.xlu0 %v7381_v31  ;;  %4442 = vset.pattern.permute.xlu1 %v7381_v31  ;;  %v2394_v12 = vld [vmem:[#allocation2 + $0xf0] sm:$0xff]  ;;  %v2458_v4 = vld [vmem:[#allocation2 + $0x98] sm:$0xff]  ;;  %v2372_v5 = vld [vmem:[#allocation2 + $0x8] sm:$0xff]  ;;  %vm2772_vm3 = vcmask 15360   ;;  %vm2781_vm4 = vcmask 8192  }
 0x89d   :  { %4280 = vmatprep.subr.mxu1 %v7238_v6  ;;  %4312 = vmatprep.mubr.msk.f32.mxu1 %vm4483_vm2, %v7238_v6  ;;  %v6403_v7 = vshrl.u32 %v2380_v50, 7  ;;  %v2426_v13 = vld [vmem:[#allocation2 + $0x1b0] sm:$0xff]  ;;  %v2395_v48 = vld [vmem:[#allocation2 + $0x18] sm:$0xff]  ;;  %v2427_v38 = vld [vmem:[#allocation2 + $0x1c0] sm:$0xff] }
 0x89e   :  { %4281 = vmatpush3.msra.mxu1 %v5535_v27  ;;  %v2490_v47 = vld [vmem:[#allocation2 + $0x90] sm:$0xff]  ;;  %v2459_v44 = vld [vmem:[#allocation2] sm:$0xff]  ;;  %v2373_v35 = vld [vmem:[#allocation2 + $0x48] sm:$0xff] }
 0x89f   :  { %4282 = vmatprep.subr.mxu1 %v7238_v6  ;;  %v6408_v8 = vsub.s32 0, %v6403_v7  ;;  %v6411_v1 = vsub.s32 1, %v6403_v7  ;;  %v7221_v15 = vsub.s32 2, %v6403_v7  ;;  %v7220_v16 = vsub.s32 3, %v6403_v7  ;;  %v2522_v30 = vld [vmem:[#allocation2 + $0x50] sm:$0xff]  ;;  %v2396_v45 = vld [vmem:[#allocation2 + $0xc0] sm:$0xff] }
 0x8a0   :  { %4283 = vmatpush3.msra.mxu1 %v5530_v2  ;;  %v2501_v36 = vsub.s32 4, %v6403_v7  ;;  %v2533_v46 = vsub.s32 5, %v6403_v7  ;;  %v2565_v49 = vsub.s32 6, %v6403_v7 }
 0x8a1   :  { %7382 = vst [vmem:[#allocation142_spill] sm:$0xff] %v6408_v8  ;;  %4284 = vmatprep.subr.mxu1 %v7238_v6  ;;  %v6420_v18 = vrot.slane %v6395_v29, %v6408_v8  ;;  %v6424_v17 = vrot.slane %v6395_v29, %v6411_v1  ;;  %v6429_v60 = vrot.slane %v6395_v29, %v7221_v15  ;;  %v2493_v15 = vld [vmem:[#allocation2 + $0x198] sm:$0xff] }
 0x8a2   :  { %4285 = vmatpush3.msra.mxu1 %v5525_v22  ;;  %v6434_v14 = vrot.slane %v6395_v29, %v7220_v16  ;;  %v6443_v52 = vrot.slane %v6395_v29, %v2501_v36  ;;  %v6452_v28 = vrot.slane %v6395_v29, %v2533_v46  ;;  %v2460_v46 = vld [vmem:[#allocation2 + $0x1b8] sm:$0xff] }
 0x8a3   :  { %4286 = vmatprep.subr.mxu1 %v7238_v6  ;;  %v2384_v63 = vmul.f32 %v6420_v18, %v2371_v53  ;;  %v2407_v37 = vmul.f32 %v6424_v17, %v2394_v12  ;;  %v2439_v21 = vmul.f32 %v6429_v60, %v2426_v13  ;;  %v2385_v3 = vmul.f32 %v6420_v18, %v2372_v5  ;;  %v2428_v13 = vld [vmem:[#allocation2 + $0x168] sm:$0xff] }
 0x8a4   :  { %4287 = vmatpush3.msra.mxu1 %v5520_v54  ;;  %v2471_v39 = vmul.f32 %v6434_v14, %v2458_v4  ;;  %v2408_v62 = vmul.f32 %v6424_v17, %v2395_v48  ;;  %v2440_v19 = vmul.f32 %v6429_v60, %v2427_v38  ;;  %v2503_v51 = vmul.f32 %v6443_v52, %v2490_v47  ;;  %v2491_v47 = vld [vmem:[#allocation2 + $0x110] sm:$0xff] }
 0x8a5   :  { %4288 = vmatprep.subr.mxu1 %v7238_v6  ;;  %v2416_v20 = vadd.f32 %v2407_v37, %v2384_v63  ;;  %v2472_v36 = vmul.f32 %v6434_v14, %v2459_v44  ;;  %v2386_v53 = vmul.f32 %v6420_v18, %v2373_v35  ;;  %v2409_v12 = vmul.f32 %v6424_v17, %v2396_v45  ;;  %v2554_v37 = vld [vmem:[#allocation2 + $0xa0] sm:$0xff]  ;;  %v2374_v44 = vld [vmem:[#allocation2 + $0x28] sm:$0xff] }
 0x8a6   :  { %4289 = vmatpush3.msra.mxu1 %v5515_v32  ;;  %v2417_v50 = vadd.f32 %v2408_v62, %v2385_v3  ;;  %v2597_v4 = vsub.s32 7, %v6403_v7  ;;  %v2441_v5 = vmul.f32 %v6429_v60, %v2428_v13  ;;  %v2473_v38 = vmul.f32 %v6434_v14, %v2460_v46  ;;  %v2397_v62 = vld [vmem:[#allocation2 + $0x180] sm:$0xff]  ;;  %v2461_v13 = vld [vmem:[#allocation2 + $0x38] sm:$0xff]  ;;  %v2523_v46 = vld [vmem:[#allocation2 + $0xa8] sm:$0xff] }
 0x8a7   :  { %4290 = vmatprep.subr.mxu1 %v7238_v6  ;;  %v2448_v59 = vadd.f32 %v2439_v21, %v2416_v20  ;;  %v6464_v21 = vrot.slane %v6395_v29, %v2565_v49  ;;  %v2535_v20 = vmul.f32 %v6452_v28, %v2522_v30  ;;  %v2418_v48 = vadd.f32 %v2409_v12, %v2386_v53  ;;  %v2375_v53 = vld [vmem:[#allocation2 + $0x100] sm:$0xff] }
 0x8a8   :  { %4291 = vmatpush3.msra.mxu1 %v5506_v23  ;;  %v2449_v3 = vadd.f32 %v2440_v19, %v2417_v50  ;;  %v2387_v35 = vmul.f32 %v6420_v18, %v2374_v44  ;;  %v2410_v45 = vmul.f32 %v6424_v17, %v2397_v62  ;;  %v2504_v19 = vmul.f32 %v6443_v52, %v2491_v47  ;;  %v2398_v44 = vld [vmem:[#allocation2 + $0x128] sm:$0xff] }
 0x8a9   :  { %4292 = vmatprep.subr.mxu1 %v7238_v6  ;;  %v2480_v63 = vadd.f32 %v2471_v39, %v2448_v59  ;;  %v2429_v39 = vld [vmem:[#allocation2 + $0x1f8] sm:$0xff]  ;;  %v2492_v59 = vld [vmem:[#allocation2 + $0x80] sm:$0xff]  ;;  %v2450_v30 = vadd.f32 %v2441_v5, %v2418_v48  ;;  %v2567_v12 = vmul.f32 %v6464_v21, %v2554_v37  ;;  %v2430_v62 = vld [vmem:[#allocation2 + $0xe8] sm:$0xff] }
 0x8aa   :  { %4293 = vmatpush3.msra.mxu1 %v5501_v58  ;;  %v2481_v16 = vadd.f32 %v2472_v36, %v2449_v3  ;;  %v2442_v50 = vmul.f32 %v6429_v60, %v2429_v39  ;;  %v2586_v3 = vld [vmem:[#allocation2 + $0x10] sm:$0xff]  ;;  %v2505_v5 = vmul.f32 %v6443_v52, %v2492_v59  ;;  %v2524_v48 = vld [vmem:[#allocation2 + $0x238] sm:$0xff]  ;;  %v2474_v39 = vmul.f32 %v6434_v14, %v2461_v13  ;;  %v2376_v59 = vld [vmem:[#allocation2 + $0x108] sm:$0xff] }
 0x8ab   :  { %4294 = vmatprep.subr.mxu1 %v7238_v6  ;;  %v2512_v49 = vadd.f32 %v2503_v51, %v2480_v63  ;;  %v6480_v51 = vrot.slane %v6395_v29, %v2597_v4  ;;  %v2419_v63 = vadd.f32 %v2410_v45, %v2387_v35  ;;  %v2482_v47 = vadd.f32 %v2473_v38, %v2450_v30  ;;  %v2555_v13 = vld [vmem:[#allocation2 + $0x150] sm:$0xff] }
 0x8ac   :  { %4295 = vmatpush3.msra.mxu1 %v5496_v55  ;;  %v2388_v29 = vmul.f32 %v6420_v18, %v2375_v53  ;;  %v2411_v4 = vmul.f32 %v6424_v17, %v2398_v44  ;;  %v2513_v35 = vadd.f32 %v2504_v19, %v2481_v16  ;;  %v2443_v38 = vmul.f32 %v6429_v60, %v2430_v62  ;;  %v2399_v53 = vld [vmem:[#allocation2 + $0x130] sm:$0xff]  ;;  %v2587_v16 = vld [vmem:[#allocation2 + $0x148] sm:$0xff]  ;;  %v2495_v55 = vld [vmem:[#allocation2 + $0xf8] sm:$0xff] }
 0x8ad   :  { %4296 = vmatprep.subr.mxu1 %v7238_v6  ;;  %v2544_v36 = vadd.f32 %v2535_v20, %v2512_v49  ;;  %v2451_v37 = vadd.f32 %v2442_v50, %v2419_v63  ;;  %v2536_v20 = vmul.f32 %v6452_v28, %v2523_v46  ;;  %v2462_v49 = vld [vmem:[#allocation2 + $0x1d8] sm:$0xff]  ;;  %v2599_v45 = vmul.f32 %v6480_v51, %v2586_v3  ;;  %v2556_v46 = vld [vmem:[#allocation2 + $0x70] sm:$0xff] }
 0x8ae   :  { %4297 = vmatpush3.msra.mxu1 %v5491_v26  ;;  %v2537_v30 = vmul.f32 %v6452_v28, %v2524_v48  ;;  %v2420_v50 = vadd.f32 %v2411_v4, %v2388_v29  ;;  %v2431_v63 = vld [vmem:[#allocation2 + $0x158] sm:$0xff]  ;;  %v2514_v19 = vadd.f32 %v2505_v5, %v2482_v47  ;;  %v2506_v62 = vmul.f32 %v6443_v52, %v2493_v15  ;;  %v2525_v26 = vld [vmem:[#allocation2 + $0x188] sm:$0xff]  ;;  %v2463_v5 = vld [vmem:[#allocation2 + $0x160] sm:$0xff] }
 0x8af   :  { %4298 = vmatprep.subr.mxu1 %v7238_v6  ;;  %v2576_v44 = vadd.f32 %v2567_v12, %v2544_v36  ;;  %v2475_v3 = vmul.f32 %v6434_v14, %v2462_v49  ;;  %v2389_v48 = vmul.f32 %v6420_v18, %v2376_v59  ;;  %v2545_v29 = vadd.f32 %v2536_v20, %v2513_v35  ;;  %v2494_v12 = vld [vmem:[#allocation2 + $0x1c8] sm:$0xff]  ;;  %v2377_v15 = vld [vmem:[#allocation2 + $0x78] sm:$0xff]  ;;  %v2400_v49 = vld [vmem:[#allocation2 + $0x230] sm:$0xff] }
 0x8b0   :  { %4299 = vmatpush3.msra.mxu1 %v5486_v34  ;;  %v2483_v34 = vadd.f32 %v2474_v39, %v2451_v37  ;;  %v2568_v4 = vmul.f32 %v6464_v21, %v2555_v13  ;;  %v2412_v36 = vmul.f32 %v6424_v17, %v2399_v53  ;;  %v2444_v47 = vmul.f32 %v6429_v60, %v2431_v63  ;;  %v2432_v59 = vld [vmem:[#allocation2 + $0x68] sm:$0xff]  ;;  %v2588_v13 = vld [vmem:[#allocation2 + $0x1a0] sm:$0xff]  ;;  %v2557_v53 = vld [vmem:[#allocation2 + $0x1f0] sm:$0xff] }
 0x8b1   :  { %4300 = vmatprep.subr.mxu1 %v7238_v6  ;;  %v2600_v39 = vmul.f32 %v6480_v51, %v2587_v16  ;;  %v2569_v37 = vmul.f32 %v6464_v21, %v2556_v46  ;;  %v2608_v35 = vadd.f32 %v2599_v45, %v2576_v44  ;;  %v2546_v20 = vadd.f32 %v2537_v30, %v2514_v19  ;;  %v2526_v63 = vld [vmem:[#allocation2 + $0x58] sm:$0xff]  ;;  %v2378_v44 = vld [vmem:[#allocation2 + $0x140] sm:$0xff]  ;;  %v2401_v19 = vld [vmem:[#allocation2 + $0xc8] sm:$0xff] }
 0x8b2   :  { %4301 = vmatpush3.msra.mxu1 %v5481_v24  ;;  %v2452_v24 = vadd.f32 %v2443_v38, %v2420_v50  ;;  %v2538_v38 = vmul.f32 %v6452_v28, %v2525_v26  ;;  %v2515_v50 = vadd.f32 %v2506_v62, %v2483_v34  ;;  %v2507_v16 = vmul.f32 %v6443_v52, %v2494_v12  ;;  %v2433_v12 = vld [vmem:[#allocation2 + $0x1e8] sm:$0xff] }
 0x8b3   :  { %4302 = vmatprep.subr.mxu1 %v7238_v6  ;;  %v2476_v46 = vmul.f32 %v6434_v14, %v2463_v5  ;;  %v2390_v26 = vmul.f32 %v6420_v18, %v2377_v15  ;;  %v2577_v58 = vadd.f32 %v2568_v4, %v2545_v29  ;;  %v2413_v30 = vmul.f32 %v6424_v17, %v2400_v49  ;;  %v2589_v4 = vld [vmem:[#allocation2 + $0x88] sm:$0xff] }
 0x8b4   :  { %4303 = vmatpush3.msra.mxu1 %v5476_v56  ;;  %v2421_v56 = vadd.f32 %v2412_v36, %v2389_v48  ;;  %v2445_v34 = vmul.f32 %v6429_v60, %v2432_v59  ;;  %v2570_v62 = vmul.f32 %v6464_v21, %v2557_v53  ;;  %v2464_v48 = vld [vmem:[#allocation2 + $0x220] sm:$0xff]  ;;  %v2578_v29 = vadd.f32 %v2569_v37, %v2546_v20  ;;  %v2558_v36 = vld [vmem:[#allocation2 + $0x210] sm:$0xff] }
 0x8b5   :  { %4304 = vmatprep.subr.mxu1 %v7238_v6  ;;  %v2422_v5 = vadd.f32 %v2413_v30, %v2390_v26  ;;  %v2527_v59 = vld [vmem:[#allocation2 + $0x120] sm:$0xff]  ;;  %v2414_v53 = vmul.f32 %v6424_v17, %v2401_v19  ;;  %v2446_v26 = vmul.f32 %v6429_v60, %v2433_v12  ;;  %v2590_v12 = vld [vmem:[#allocation2 + $0xd0] sm:$0xff] }
 0x8b6   :  { %4305 = vmatpush3.msra.mxu1 %v5471_v0  ;;  %v2484_v0 = vadd.f32 %v2475_v3, %v2452_v24  ;;  %v2453_v45 = vadd.f32 %v2444_v47, %v2421_v56  ;;  %v2601_v24 = vmul.f32 %v6480_v51, %v2588_v13  ;;  %v2539_v3 = vmul.f32 %v6452_v28, %v2526_v63  ;;  %v2379_v63 = vld [vmem:[#allocation2 + $0x1d0] sm:$0x1]  ;;  %v2362_v37 = vld [vmem:[%s7206_s13] sm:$0xff] }
 0x8b7   :  { %4306 = vmatprep.subr.mxu1 %v7238_v6  ;;  %v2547_v56 = vadd.f32 %v2538_v38, %v2515_v50  ;;  %v2508_v47 = vmul.f32 %v6443_v52, %v2495_v55  ;;  %v2391_v13 = vmul.f32 %v6420_v18, %v2378_v44  ;;  %v2609_v38 = vadd.f32 %v2600_v39, %v2577_v58  ;;  %v2496_v50 = vld [vmem:[#allocation2 + $0x218] sm:$0xff]  ;;  %v2465_v58 = vld [vmem:[#allocation2 + $0x200] sm:$0xff] }
 0x8b8   :  { %4307 = vmatpush3.msra.mxu1 %v5466_v57  ;;  %v2516_v15 = vadd.f32 %v2507_v16, %v2484_v0  ;;  %v2485_v49 = vadd.f32 %v2476_v46, %v2453_v45  ;;  %v2454_v20 = vadd.f32 %v2445_v34, %v2422_v5  ;;  %v2477_v55 = vmul.f32 %v6434_v14, %v2464_v48  ;;  %v2402_v0 = vld [vmem:[#allocation2 + $0x60] sm:$0x1]  ;;  %v2364_v16 = vld [vmem:[%s7206_s13 + $0x10] sm:$0xff]  ;;  %v2434_v39 = vld [vmem:[#allocation2 + $0x138] sm:$0x1] }
 0x8b9   :  { %4308 = vmatprep.subr.mxu1 %v7238_v6  ;;  %v2602_v46 = vmul.f32 %v6480_v51, %v2589_v4  ;;  %v2571_v45 = vmul.f32 %v6464_v21, %v2558_v36  ;;  %v2610_v30 = vadd.f32 %v2601_v24, %v2578_v29  ;;  %v2579_v34 = vadd.f32 %v2570_v62, %v2547_v56  ;;  %v2363_v36 = vld [vmem:[%s7206_s13 + $0x8] sm:$0xff]  ;;  %v2528_v62 = vld [vmem:[#allocation2 + $0x30] sm:$0xff] }
 0x8ba   :  { %4309 = vmatpush3.msra.mxu1 %v5461_v25  ;;  %v2540_v44 = vmul.f32 %v6452_v28, %v2527_v59  ;;  %v2392_v19 = vmul.f32 %v6420_v18, %v2379_v63  ;;  %2619 = vperm.xlu0 %4441, %v2362_v37   ;;  %v2548_v48 = vadd.f32 %v2539_v3, %v2516_v15  ;;  %v2497_v56 = vld [vmem:[#allocation2 + $0x228] sm:$0xff]  ;;  %v7383_v15 = vmov 0.0  }
 0x8bb   :  { %4310 = vmatprep.subr.mxu1 %v7238_v6  ;;  %v2517_v5 = vadd.f32 %v2508_v47, %v2485_v49  ;;  %v2415_v4 = vmul.f32 %v6424_v17, %v2402_v0  ;;  %2629 = vperm.xlu1 %4442, %v2364_v16   ;;  %v2486_v24 = vadd.f32 %v2477_v55, %v2454_v20  ;;  %v2365_v47 = vld [vmem:[%s7206_s13 + $0x18] sm:$0xff]  ;;  %v2466_v49 = vld [vmem:[#allocation2 + $0x20] sm:$0x1] }
 0x8bc   :  { %4311 = vmatpush3.msra.mxu1 %v5452_v33  ;;  %v2559_v33 = vld [vmem:[#allocation2 + $0x1a8] sm:$0xff]  ;;  %v2478_v18 = vmul.f32 %v6434_v14, %v2465_v58  ;;  %v2447_v3 = vmul.f32 %v6429_v60, %v2434_v39  ;;  %v2611_v59 = vadd.f32 %v2602_v46, %v2579_v34  ;;  %v2580_v63 = vadd.f32 %v2571_v45, %v2548_v48  ;;  %v2366_v55 = vld [vmem:[%s7206_s13 + $0x20] sm:$0xff]  ;;  %v2592_v34 = vld [vmem:[#allocation2 + $0x190] sm:$0xff] }
 0x8bd   :  { %4313 = vmatmul.mubr.f32.vlgmr.msra.gmra.mxu1 %v2608_v35  ;;  %v2423_v35 = vadd.f32 %v2414_v53, %v2391_v13  ;;  %v2424_v17 = vadd.f32 %v2415_v4, %v2392_v19  ;;  %v2603_v13 = vmul.f32 %v6480_v51, %v2590_v12  ;;  %v2572_v53 = vmul.f32 %v6464_v21, %v2559_v33  ;;  %v2529_v16 = vld [vmem:[#allocation2 + $0x1e0] sm:$0xff]  ;;  %v2367_v45 = vld [vmem:[%s7206_s13 + $0x28] sm:$0xff] }
 0x8be   :  { %4315 = vmatprep.mubr.msk.f32.mxu1 %vm4483_vm2, %v7238_v6  ;;  %v2509_v6 = vmul.f32 %v6443_v52, %v2496_v50  ;;  %2624 = vperm.xlu0 %4441, %v2363_v36   ;;  %v2549_v37 = vadd.f32 %v2540_v44, %v2517_v5  ;;  %v2541_v60 = vmul.f32 %v6452_v28, %v2528_v62  ;;  %v2561_v12 = vld [vmem:[#allocation2 + $0x40] sm:$0xff]  ;;  %v2530_v36 = vld [vmem:[#allocation2 + $0xb8] sm:$0x1] }
 0x8bf   :  { %v2455_v29 = vadd.f32 %v2446_v26, %v2423_v35  ;;  %v2510_v20 = vmul.f32 %v6443_v52, %v2497_v56  ;;  %2634 = vperm.xlu1 %4442, %v2365_v47   ;;  %v2560_v26 = vld [vmem:[#allocation2 + $0x118] sm:$0xff]  ;;  %v2456_v46 = vadd.f32 %v2447_v3, %v2424_v17  ;;  %v2479_v33 = vmul.f32 %v6434_v14, %v2466_v49  ;;  %v2498_v35 = vld [vmem:[#allocation2 + $0x170] sm:$0x1]  ;;  %v2370_v56 = vld [vmem:[%s7206_s13 + $0x40] sm:$0x1] }
 0x8c0   :  { %v2518_v50 = vadd.f32 %v2509_v6, %v2486_v24  ;;  %v2612_v39 = vadd.f32 %v2603_v13, %v2580_v63  ;;  %v2573_v6 = vmul.f32 %v6464_v21, %v2560_v26  ;;  %v2542_v44 = vmul.f32 %v6452_v28, %v2529_v16  ;;  %v2368_v14 = vld [vmem:[%s7206_s13 + $0x30] sm:$0xff]  ;;  %v2369_v24 = vld [vmem:[%s7206_s13 + $0x38] sm:$0xff] }
 0x8c1   :  { %4316 = vmatmul.mubr.f32.gmra.mxu1 %v2609_v38  ;;  %v2591_v38 = vld [vmem:[#allocation2 + $0x208] sm:$0xff]  ;;  %v2487_v0 = vadd.f32 %v2478_v18, %v2455_v29  ;;  %v2488_v5 = vadd.f32 %v2479_v33, %v2456_v46  ;;  %v2511_v4 = vmul.f32 %v6443_v52, %v2498_v35  ;;  %v2605_v62 = vmul.f32 %v6480_v51, %v2592_v34  ;;  %v2593_v17 = vld [vmem:[#allocation2 + $0xd8] sm:$0xff] }
 0x8c2   :  { %4318 = vmatprep.mubr.msk.f32.mxu1 %vm4483_vm2, %v7383_v15  ;;  %v2604_v58 = vmul.f32 %v6480_v51, %v2591_v38  ;;  %2639 = vperm.xlu0 %4441, %v2366_v55   ;;  %v2550_v19 = vadd.f32 %v2541_v60, %v2518_v50  ;;  %v2574_v29 = vmul.f32 %v6464_v21, %v2561_v12  ;;  %v2594_v38 = vld [vmem:[#allocation2 + $0xb0] sm:$0x1] }
 0x8c3   :  { %2644 = vperm.xlu1 %4442, %v2367_v45   ;;  %v2519_v48 = vadd.f32 %v2510_v20, %v2487_v0  ;;  %v2543_v18 = vmul.f32 %v6452_v28, %v2530_v36  ;;  %v2520_v49 = vadd.f32 %v2511_v4, %v2488_v5  ;;  %v2606_v13 = vmul.f32 %v6480_v51, %v2593_v17 }
 0x8c4   :  { %v2582_v3 = vadd.f32 %v2573_v6, %v2550_v19  ;;  %v2607_v55 = vmul.f32 %v6480_v51, %v2594_v38 }
 0x8c5   :  { %4319 = vmatmul.mubr.f32.gmra.mxu1 %v2610_v30  ;;  %v2581_v30 = vadd.f32 %v2572_v53, %v2549_v37  ;;  %v2551_v47 = vadd.f32 %v2542_v44, %v2519_v48  ;;  %v2552_v63 = vadd.f32 %v2543_v18, %v2520_v49 }
 0x8c6   :  { %4321 = vmatprep.mubr.msk.f32.mxu1 %vm4483_vm2, %v7383_v15  ;;  %2649 = vperm.xlu0 %4441, %v2368_v14   ;;  %v2614_v28 = vadd.f32 %v2605_v62, %v2582_v3 }
 0x8c7   :  { %2654 = vperm.xlu1 %4442, %v2369_v24   ;;  %v2613_v52 = vadd.f32 %v2604_v58, %v2581_v30  ;;  %v2583_v53 = vadd.f32 %v2574_v29, %v2551_v47 }
 0x8c9   :  { %4322 = vmatmul.mubr.f32.gmra.mxu1 %v2611_v59  ;;  %v2562_v59 = vld [vmem:[#allocation2 + $0x178] sm:$0x1]  ;;  %v2615_v60 = vadd.f32 %v2606_v13, %v2583_v53  ;;  %v6631_v53 = vrot.slane %v6393_v43, %v6408_v8 }
 0x8ca   :  { %4324 = vmatprep.mubr.msk.f32.mxu1 %vm4483_vm2, %v7383_v15  ;;  %2659 = vperm.xlu0 %4441, %v2370_v56   ;;  %v2575_v37 = vmul.f32 %v6464_v21, %v2562_v59 }
 0x8cc   :  { %v2584_v20 = vadd.f32 %v2575_v37, %v2552_v63  ;;  %v6635_v63 = vrot.slane %v6393_v43, %v6411_v1  ;;  %v7384_v37 = vsub.s32 2, %v6403_v7 }
 0x8cd   :  { %4325 = vmatmul.mubr.f32.gmra.mxu1 %v2612_v39 }
 0x8ce   :  { %4327 = vmatprep.mubr.msk.f32.mxu1 %vm4483_vm2, %v7383_v15  ;;  %v2616_v50 = vadd.f32 %v2607_v55, %v2584_v20  ;;  %v6640_v38 = vrot.slane %v6393_v43, %v7384_v37 }
 0x8d1   :  { %4328 = vmatmul.mubr.f32.gmra.mxu1 %v2613_v52 }
 0x8d2   :  { %4330 = vmatprep.mubr.msk.f32.mxu1 %vm4483_vm2, %v7383_v15 }
 0x8d5   :  { %4331 = vmatmul.mubr.f32.gmra.mxu1 %v2614_v28 }
 0x8d6   :  { %4333 = vmatprep.mubr.msk.f32.mxu1 %vm4483_vm2, %v7383_v15 }
 0x8d9   :  { %4334 = vmatmul.mubr.f32.gmra.mxu1 %v2615_v60  ;;  %v7385_v60 = vsub.s32 3, %v6403_v7 }
 0x8da   :  { %4336 = vmatprep.mubr.msk.f32.mxu1 %vm4483_vm2, %v7383_v15 }
 0x8db   :  { %v6645_v20 = vrot.slane %v6393_v43, %v7385_v60 }
 0x8dd   :  { %4337 = vmatmul.mubr.f32.gmra.mxu1 %v2616_v50 }
 0x935   :  { %v2620_v26 = vpop.permute.xlu0 %2619 }
 0x936   :  { %v2630_v33 = vpop.permute.xlu1 %2629 }
 0x939   :  { %v2625_v46 = vpop.permute.xlu0 %2624 }
 0x93a   :  { %v2635_v30 = vpop.permute.xlu1 %2634 }
 0x93d   :  { %v2640_v14 = vpop.permute.xlu0 %2639 }
 0x93e   :  { %v2645_v5 = vpop.permute.xlu1 %2644 }
 0x941   :  { %v2650_v62 = vpop.permute.xlu0 %2649 }
 0x942   :  { %v2655_v52 = vpop.permute.xlu1 %2654 }
 0x945   :  { %v2660_v49 = vpop.permute.xlu0 %2659 }
 0x97d   :  { %v2728_v21 = vpop.f32.mrf.mxu1 }
 0x97e   :  { %v2729_v0 = vadd.f32 %v2728_v21, %v2620_v26 }
 0x97f   :  { %v4314_v16 = vpop.f32.mrf.mxu1 }
 0x980   :  { %2773 = vst.msk [vmem:[%s7211_s18] sm:$0xff] %vm2772_vm3, %v2729_v0 }
 0x981   :  { %v2733_v51 = vpop.f32.mrf.mxu1 }
 0x982   :  { %v2734_v45 = vadd.f32 %v2733_v51, %v2625_v46 }
 0x983   :  { %v4317_v35 = vpop.f32.mrf.mxu1 }
 0x984   :  { %2774 = vst.msk [vmem:[%s7211_s18 + $0x8] sm:$0xff] %vm2772_vm3, %v2734_v45 }
 0x985   :  { %v2738_v15 = vpop.f32.mrf.mxu1 }
 0x986   :  { %v2739_v58 = vadd.f32 %v2738_v15, %v2630_v33 }
 0x987   :  { %v4320_v39 = vpop.f32.mrf.mxu1 }
 0x988   :  { %2775 = vst.msk [vmem:[%s7211_s18 + $0x10] sm:$0xff] %vm2772_vm3, %v2739_v58 }
 0x989   :  { %v2743_v6 = vpop.f32.mrf.mxu1 }
 0x98a   :  { %v2744_v34 = vadd.f32 %v2743_v6, %v2635_v30 }
 0x98b   :  { %v4323_v44 = vpop.f32.mrf.mxu1 }
 0x98c   :  { %2776 = vst.msk [vmem:[%s7211_s18 + $0x18] sm:$0xff] %vm2772_vm3, %v2744_v34 }
 0x98d   :  { %v2748_v19 = vpop.f32.mrf.mxu1 }
 0x98e   :  { %v2749_v48 = vadd.f32 %v2748_v19, %v2640_v14 }
 0x98f   :  { %v4326_v12 = vpop.f32.mrf.mxu1 }
 0x990   :  { %2777 = vst.msk [vmem:[%s7211_s18 + $0x20] sm:$0xff] %vm2772_vm3, %v2749_v48 }
 0x991   :  { %v2753_v4 = vpop.f32.mrf.mxu1 }
 0x992   :  { %v2754_v36 = vadd.f32 %v2753_v4, %v2645_v5 }
 0x993   :  { %v4329_v24 = vpop.f32.mrf.mxu1 }
 0x994   :  { %2778 = vst.msk [vmem:[%s7211_s18 + $0x28] sm:$0xff] %vm2772_vm3, %v2754_v36 }
 0x995   :  { %v2758_v29 = vpop.f32.mrf.mxu1 }
 0x996   :  { %v2759_v18 = vadd.f32 %v2758_v29, %v2650_v62 }
 0x997   :  { %v4332_v56 = vpop.f32.mrf.mxu1 }
 0x998   :  { %2779 = vst.msk [vmem:[%s7211_s18 + $0x30] sm:$0xff] %vm2772_vm3, %v2759_v18 }
 0x999   :  { %v2763_v3 = vpop.f32.mrf.mxu1 }
 0x99a   :  { %v2764_v47 = vadd.f32 %v2763_v3, %v2655_v52 }
 0x99b   :  { %v4335_v17 = vpop.f32.mrf.mxu1 }
 0x99c   :  { %2780 = vst.msk [vmem:[%s7211_s18 + $0x38] sm:$0xff] %vm2772_vm3, %v2764_v47 }
 0x99d   :  { %v2768_v59 = vpop.f32.mrf.mxu1 }
 0x99e   :  { %v2769_v13 = vadd.f32 %v2768_v59, %v2660_v49 }
 0x99f   :  { %v4338_v28 = vpop.f32.mrf.mxu1 }
 0x9a0   :  { %2782 = vst.msk [vmem:[%s7211_s18 + $0x40] sm:$0x1] %vm2781_vm4, %v2769_v13 }
 0x9a1   :  { %4469 = dma.done.wait [#allocation4 + $0x1], 16384 }
 0x9a2   :  { %4470 = vsyncadd [#allocation4 + $0x1], 4294950912  ;;  %4340 = vmatpush3.msra.mxu0 %v5535_v27  ;;  %4444 = vset.pattern.permute.xlu1 %v7381_v31  ;;  %v2855_v55 = vmul.f32 %v6631_v53, %v4807_v9  ;;  %v2924_v50 = vmul.f32 %v6635_v63, %v4967_v41  ;;  %v3025_v7 = vmul.f32 %v6640_v38, %v5127_v40  ;;  %v7386_v21 = vld [vmem:[#allocation42_spill] sm:$0xff]  ;;  %v7388_v0 = vld [vmem:[#allocation13_spill] sm:$0xff] }
 0x9a3   :  { %4341 = vmatprep.subr.mxu0 %v5530_v2  ;;  %v2856_v43 = vmul.f32 %v6631_v53, %v4812_v10  ;;  %v2925_v27 = vmul.f32 %v6635_v63, %v4972_v42  ;;  %v3126_v9 = vmul.f32 %v6645_v20, %v5287_v61  ;;  %v2857_v41 = vmul.f32 %v6631_v53, %v4817_v11  ;;  %v7389_v16 = vld [vmem:[#allocation43_spill] sm:$0xff]  ;;  %v7390_v11 = vld [vmem:[#allocation73_spill] sm:$0xff]  ;;  %v7391_v35 = vld [vmem:[#allocation74_spill] sm:$0xff] }
 0x9a4   :  { %4342 = vmatpush3.msra.mxu0 %v5530_v2  ;;  %v2956_v26 = vadd.f32 %v2924_v50, %v2855_v55  ;;  %v2926_v40 = vmul.f32 %v6635_v63, %v7386_v21  ;;  %v7387_v2 = vld [vmem:[#allocation72_spill] sm:$0xff]  ;;  %v2858_v42 = vmul.f32 %v6631_v53, %v7388_v0  ;;  %v2927_v46 = vmul.f32 %v6635_v63, %v7389_v16  ;;  %v7392_v58 = vld [vmem:[#allocation14_spill] sm:$0xff]  ;;  %v7394_v44 = vld [vmem:[#allocation103_spill] sm:$0xff] }
 0x9a5   :  { %4343 = vmatprep.subr.mxu0 %v5525_v22  ;;  %v3026_v10 = vmul.f32 %v6640_v38, %v7387_v2  ;;  %v2957_v51 = vadd.f32 %v2925_v27, %v2856_v43  ;;  %v3027_v45 = vmul.f32 %v6640_v38, %v7390_v11  ;;  %v3028_v15 = vmul.f32 %v6640_v38, %v7391_v35  ;;  %v7393_v30 = vld [vmem:[#allocation44_spill] sm:$0xff]  ;;  %v7396_v48 = vld [vmem:[#allocation15_spill] sm:$0xff]  ;;  %v7397_v36 = vld [vmem:[#allocation45_spill] sm:$0xff] }
 0x9a6   :  { %4344 = vmatpush3.msra.mxu0 %v5525_v22  ;;  %v3057_v61 = vadd.f32 %v3025_v7, %v2956_v26  ;;  %v2958_v33 = vadd.f32 %v2926_v40, %v2857_v41  ;;  %v2959_v22 = vadd.f32 %v2927_v46, %v2858_v42  ;;  %v2859_v39 = vmul.f32 %v6631_v53, %v7392_v58  ;;  %v7395_v19 = vld [vmem:[#allocation104_spill] sm:$0xff]  ;;  %v7398_v29 = vld [vmem:[#allocation105_spill] sm:$0xff]  ;;  %v7399_v52 = vld [vmem:[#allocation75_spill] sm:$0xff] }
 0x9a7   :  { %4345 = vmatprep.subr.mxu0 %v5520_v54  ;;  %v2928_v6 = vmul.f32 %v6635_v63, %v7393_v30  ;;  %v3127_v14 = vmul.f32 %v6645_v20, %v7394_v44  ;;  %v2860_v12 = vmul.f32 %v6631_v53, %v7396_v48  ;;  %v3058_v5 = vadd.f32 %v3026_v10, %v2957_v51  ;;  %v7400_v47 = vld [vmem:[#allocation141_spill] sm:$0xff]  ;;  %v7401_v17 = vld [vmem:[#allocation76_spill] sm:$0xff]  ;;  %v7403_v28 = vld [vmem:[#allocation46_spill] sm:$0xff] }
 0x9a8   :  { %4346 = vmatpush3.msra.mxu0 %v5520_v54  ;;  %v3158_v34 = vadd.f32 %v3126_v9, %v3057_v61  ;;  %v3128_v54 = vmul.f32 %v6645_v20, %v7395_v19  ;;  %v3059_v4 = vadd.f32 %v3027_v45, %v2958_v33  ;;  %v2929_v24 = vmul.f32 %v6635_v63, %v7397_v36  ;;  %v7402_v59 = vld [vmem:[#allocation16_spill] sm:$0xff]  ;;  %v7404_v60 = vld [vmem:[#allocation17_spill] sm:$0xff]  ;;  %v7405_v50 = vld [vmem:[#allocation47_spill] sm:$0xff] }
 0x9a9   :  { %4347 = vmatprep.subr.mxu0 %v5515_v32  ;;  %v3060_v62 = vadd.f32 %v3028_v15, %v2959_v22  ;;  %v3129_v18 = vmul.f32 %v6645_v20, %v7398_v29  ;;  %v2960_v56 = vadd.f32 %v2928_v6, %v2859_v39  ;;  %v3029_v3 = vmul.f32 %v6640_v38, %v7399_v52  ;;  %v7406_v43 = vld [vmem:[#allocation140_spill] sm:$0xff]  ;;  %v7407_v9 = vld [vmem:[#allocation106_spill] sm:$0xff]  ;;  %v7410_v46 = vld [vmem:[#allocation139_spill] sm:$0xff] }
 0x9aa   :  { %4348 = vmatpush3.msra.mxu0 %v5515_v32  ;;  %4371 = vmatprep.mubr.f32.mxu0 %v3158_v34  ;;  %v2817_v32 = vld [vmem:[%s7208_s15 + $0xf0] sm:$0xff]  ;;  %v3030_v49 = vmul.f32 %v6640_v38, %v7401_v17  ;;  %v2861_v13 = vmul.f32 %v6631_v53, %v7402_v59  ;;  %v2930_v37 = vmul.f32 %v6635_v63, %v7403_v28  ;;  %v7409_v42 = vld [vmem:[#allocation48_spill] sm:$0xff]  ;;  %v7411_v51 = vld [vmem:[#allocation77_spill] sm:$0xff] }
 0x9ab   :  { %4349 = vmatprep.subr.mxu0 %v5506_v23  ;;  %3342 = vperm.xlu1 %4444, %v2817_v32   ;;  %v2862_v55 = vmul.f32 %v6631_v53, %v7404_v60  ;;  %v2931_v7 = vmul.f32 %v6635_v63, %v7405_v50  ;;  %v6717_v27 = vadd.f32 %v3127_v14, %v3058_v5  ;;  %v2801_v21 = vld [vmem:[%s7208_s15 + $0x70] sm:$0xff]  ;;  %v7414_v39 = vld [vmem:[#allocation108_spill] sm:$0xff]  ;;  %v7418_v48 = vld [vmem:[#allocation49_spill] sm:$0xff] }
 0x9ac   :  { %4350 = vmatpush3.msra.mxu0 %v5506_v23  ;;  %v2961_v23 = vadd.f32 %v2929_v24, %v2860_v12  ;;  %v6719_v26 = vadd.f32 %v3128_v54, %v3059_v4  ;;  %v3130_v41 = vmul.f32 %v6645_v20, %v7407_v9  ;;  %v6727_v40 = vadd.f32 %v3129_v18, %v3060_v62  ;;  %v7408_v10 = vld [vmem:[#allocation18_spill] sm:$0xff]  ;;  %v7413_v15 = vld [vmem:[#allocation107_spill] sm:$0xff]  ;;  %v7419_v36 = vld [vmem:[#allocation109_spill] sm:$0xff] }
 0x9ad   :  { %4351 = vmatprep.subr.mxu0 %v7400_v47  ;;  %v3061_v2 = vadd.f32 %v3029_v3, %v2960_v56  ;;  %v2863_v0 = vmul.f32 %v6631_v53, %v7408_v10  ;;  %v2932_v16 = vmul.f32 %v6635_v63, %v7409_v42  ;;  %v2962_v61 = vadd.f32 %v2930_v37, %v2861_v13  ;;  %v7412_v45 = vld [vmem:[#allocation78_spill] sm:$0xff]  ;;  %v7416_v44 = vld [vmem:[#allocation79_spill] sm:$0xff]  ;;  %v7420_v32 = vld [vmem:[#allocation20_spill] sm:$0xff] }
 0x9ae   :  { %4352 = vmatpush3.msra.mxu0 %v7400_v47  ;;  %v3031_v33 = vmul.f32 %v6640_v38, %v7411_v51  ;;  %v2963_v11 = vadd.f32 %v2931_v7, %v2862_v55  ;;  %v3032_v22 = vmul.f32 %v6640_v38, %v7412_v45  ;;  %v3062_v35 = vadd.f32 %v3030_v49, %v2961_v23  ;;  %v7415_v6 = vld [vmem:[#allocation138_spill] sm:$0xff]  ;;  %v7417_v19 = vld [vmem:[#allocation19_spill] sm:$0xff]  ;;  %v7422_v56 = vld [vmem:[#allocation137_spill] sm:$0xff] }
 0x9af   :  { %4353 = vmatprep.subr.mxu0 %v7406_v43  ;;  %v3131_v58 = vmul.f32 %v6645_v20, %v7413_v15  ;;  %v3132_v30 = vmul.f32 %v6645_v20, %v7414_v39  ;;  %3262 = vperm.xlu1 %4444, %v2801_v21   ;;  %v2964_v34 = vadd.f32 %v2932_v16, %v2863_v0  ;;  %v2800_v5 = vld [vmem:[%s7208_s15 + $0x68] sm:$0xff]  ;;  %v7424_v49 = vld [vmem:[#allocation51_spill] sm:$0xff]  ;;  %v7426_v23 = vld [vmem:[#allocation80_spill] sm:$0xff] }
 0x9b0   :  { %4354 = vmatpush3.msra.mxu0 %v7406_v43  ;;  %v3033_v14 = vmul.f32 %v6640_v38, %v7416_v44  ;;  %v2864_v54 = vmul.f32 %v6631_v53, %v7417_v19  ;;  %v2933_v12 = vmul.f32 %v6635_v63, %v7418_v48  ;;  %v6754_v4 = vadd.f32 %v3130_v41, %v3061_v2  ;;  %v7421_v29 = vld [vmem:[#allocation50_spill] sm:$0xff]  ;;  %v7423_v47 = vld [vmem:[#allocation21_spill] sm:$0xff]  ;;  %v7427_v55 = vld [vmem:[#allocation136_spill] sm:$0xff] }
 0x9b1   :  { %4355 = vmatprep.subr.mxu0 %v7410_v46  ;;  %v3133_v24 = vmul.f32 %v6645_v20, %v7419_v36  ;;  %v2865_v62 = vmul.f32 %v6631_v53, %v7420_v32  ;;  %v2934_v18 = vmul.f32 %v6635_v63, %v7421_v29  ;;  %v3063_v52 = vadd.f32 %v3031_v33, %v2962_v61  ;;  %v7425_v28 = vld [vmem:[#allocation110_spill] sm:$0xff]  ;;  %v7428_v43 = vld [vmem:[#allocation81_spill] sm:$0xff]  ;;  %v7432_v51 = vld [vmem:[#allocation135_spill] sm:$0xff] }
 0x9b2   :  { %4356 = vmatpush3.msra.mxu0 %v7410_v46  ;;  %v3064_v3 = vadd.f32 %v3032_v22, %v2963_v11  ;;  %v2866_v17 = vmul.f32 %v6631_v53, %v7423_v47  ;;  %v2935_v59 = vmul.f32 %v6635_v63, %v7424_v49  ;;  %v6768_v13 = vadd.f32 %v3131_v58, %v3062_v35  ;;  %v7429_v41 = vld [vmem:[#allocation22_spill] sm:$0xff]  ;;  %v2799_v2 = vld [vmem:[%s7208_s15 + $0x60] sm:$0xff]  ;;  %v7433_v45 = vld [vmem:[#allocation111_spill] sm:$0xff] }
 0x9b3   :  { %4357 = vmatprep.subr.mxu0 %v7415_v6  ;;  %v3134_v37 = vmul.f32 %v6645_v20, %v7425_v28  ;;  %v3034_v60 = vmul.f32 %v6640_v38, %v7426_v23  ;;  %3257 = vperm.xlu1 %4444, %v2800_v5   ;;  %v3065_v50 = vadd.f32 %v3033_v14, %v2964_v34  ;;  %v7430_v42 = vld [vmem:[#allocation82_spill] sm:$0xff]  ;;  %v7431_v46 = vld [vmem:[#allocation52_spill] sm:$0xff]  ;;  %v7434_v35 = vld [vmem:[#allocation83_spill] sm:$0xff] }
 0x9b4   :  { %4358 = vmatpush3.msra.mxu0 %v7415_v6  ;;  %v2965_v7 = vadd.f32 %v2933_v12, %v2864_v54  ;;  %v3035_v9 = vmul.f32 %v6640_v38, %v7428_v43  ;;  %v2867_v21 = vmul.f32 %v6631_v53, %v7429_v41  ;;  %v2966_v10 = vadd.f32 %v2934_v18, %v2865_v62  ;;  %v7435_v39 = vld [vmem:[#allocation23_spill] sm:$0xff]  ;;  %v7436_v34 = vld [vmem:[#allocation53_spill] sm:$0xff]  ;;  %v7437_v19 = vld [vmem:[#allocation112_spill] sm:$0xff] }
 0x9b5   :  { %4359 = vmatprep.subr.mxu0 %v7422_v56  ;;  %v2967_v0 = vadd.f32 %v2935_v59, %v2866_v17  ;;  %v3036_v16 = vmul.f32 %v6640_v38, %v7430_v42  ;;  %v2936_v61 = vmul.f32 %v6635_v63, %v7431_v46  ;;  %v6788_v33 = vadd.f32 %v3132_v30, %v3063_v52  ;;  %v7438_v48 = vld [vmem:[#allocation24_spill] sm:$0xff]  ;;  %v7439_v32 = vld [vmem:[#allocation113_spill] sm:$0xff]  ;;  %v7440_v29 = vld [vmem:[#allocation54_spill] sm:$0xff] }
 0x9b6   :  { %4360 = vmatpush3.msra.mxu0 %v7422_v56  ;;  %v6790_v11 = vadd.f32 %v3133_v24, %v3064_v3  ;;  %v3135_v22 = vmul.f32 %v6645_v20, %v7433_v45  ;;  %v3037_v15 = vmul.f32 %v6640_v38, %v7434_v35  ;;  %v2868_v6 = vmul.f32 %v6631_v53, %v7435_v39  ;;  %v2798_v5 = vld [vmem:[%s7208_s15 + $0x58] sm:$0xff]  ;;  %v7441_v56 = vld [vmem:[#allocation114_spill] sm:$0xff]  ;;  %v7443_v17 = vld [vmem:[#allocation25_spill] sm:$0xff] }
 0x9b7   :  { %4361 = vmatprep.subr.mxu0 %v7427_v55  ;;  %v2968_v58 = vadd.f32 %v2936_v61, %v2867_v21  ;;  %3252 = vperm.xlu1 %4444, %v2799_v2   ;;  %v2937_v44 = vmul.f32 %v6635_v63, %v7436_v34  ;;  %v6802_v30 = vadd.f32 %v3134_v37, %v3065_v50  ;;  %v7442_v3 = vld [vmem:[#allocation84_spill] sm:$0xff]  ;;  %v7445_v23 = vld [vmem:[#allocation115_spill] sm:$0xff] }
 0x9b8   :  { %4362 = vmatpush3.msra.mxu0 %v7427_v55  ;;  %v3066_v14 = vadd.f32 %v3034_v60, %v2965_v7  ;;  %v3136_v54 = vmul.f32 %v6645_v20, %v7437_v19  ;;  %v2869_v12 = vmul.f32 %v6631_v53, %v7438_v48  ;;  %v3067_v36 = vadd.f32 %v3035_v9, %v2966_v10  ;;  %v7446_v55 = vld [vmem:[#allocation134_spill] sm:$0xff]  ;;  %v7447_v7 = vld [vmem:[#allocation85_spill] sm:$0xff]  ;;  %v7449_v21 = vld [vmem:[#allocation56_spill] sm:$0xff] }
 0x9b9   :  { %4363 = vmatprep.subr.mxu0 %v7432_v51  ;;  %v3068_v24 = vadd.f32 %v3036_v16, %v2967_v0  ;;  %v3137_v62 = vmul.f32 %v6645_v20, %v7439_v32  ;;  %v2938_v18 = vmul.f32 %v6635_v63, %v7440_v29  ;;  %v3138_v52 = vmul.f32 %v6645_v20, %v7441_v56  ;;  %v7448_v9 = vld [vmem:[#allocation26_spill] sm:$0xff]  ;;  %v7451_v16 = vld [vmem:[#allocation87_spill] sm:$0xff]  ;;  %v7453_v45 = vld [vmem:[#allocation116_spill] sm:$0xff] }
 0x9ba   :  { %4364 = vmatpush3.msra.mxu0 %v7432_v51  ;;  %v3038_v47 = vmul.f32 %v6640_v38, %v7442_v3  ;;  %v2870_v49 = vmul.f32 %v6631_v53, %v7443_v17  ;;  %v3069_v28 = vadd.f32 %v3037_v15, %v2968_v58  ;;  %v2969_v37 = vadd.f32 %v2937_v44, %v2868_v6  ;;  %v7450_v0 = vld [vmem:[#allocation86_spill] sm:$0xff]  ;;  %v7452_v61 = vld [vmem:[#allocation27_spill] sm:$0xff]  ;;  %v7454_v58 = vld [vmem:[#allocation57_spill] sm:$0xff] }
 0x9bb   :  { %4365 = vmatprep.subr.mxu0 %v5466_v57  ;;  %v3139_v60 = vmul.f32 %v6645_v20, %v7445_v23  ;;  %3247 = vperm.xlu1 %4444, %v2798_v5   ;;  %v2970_v50 = vadd.f32 %v2938_v18, %v2869_v12  ;;  %v3039_v43 = vmul.f32 %v6640_v38, %v7447_v7  ;;  %v7455_v6 = vld [vmem:[#allocation88_spill] sm:$0xff]  ;;  %v7456_v48 = vld [vmem:[#allocation117_spill] sm:$0xff]  ;;  %v7458_v29 = vld [vmem:[#allocation118_spill] sm:$0xff] }
 0x9bc   :  { %4366 = vmatpush3.msra.mxu0 %v5466_v57  ;;  %v7444_v57 = vld [vmem:[#allocation55_spill] sm:$0xff]  ;;  %v2871_v41 = vmul.f32 %v6631_v53, %v7448_v9  ;;  %v2940_v2 = vmul.f32 %v6635_v63, %v7449_v21  ;;  %v3040_v42 = vmul.f32 %v6640_v38, %v7450_v0  ;;  %v3041_v46 = vmul.f32 %v6640_v38, %v7451_v16  ;;  %v7457_v12 = vld [vmem:[#allocation28_spill] sm:$0xff]  ;;  %v7459_v3 = vld [vmem:[#allocation58_spill] sm:$0xff] }
 0x9bd   :  { %4367 = vmatprep.subr.mxu0 %v5461_v25  ;;  %v2939_v59 = vmul.f32 %v6635_v63, %v7444_v57  ;;  %v2872_v51 = vmul.f32 %v6631_v53, %v7452_v61  ;;  %v3140_v35 = vmul.f32 %v6645_v20, %v7453_v45  ;;  %v2941_v39 = vmul.f32 %v6635_v63, %v7454_v58  ;;  %v2818_v44 = vld [vmem:[%s7208_s15 + $0xf8] sm:$0xff]  ;;  %v7460_v57 = vld [vmem:[#allocation29_spill] sm:$0xff]  ;;  %v7467_v16 = vld [vmem:[#allocation30_spill] sm:$0xff] }
 0x9be   :  { %4368 = vmatpush3.msra.mxu0 %v5461_v25  ;;  %v2797_v25 = vld [vmem:[%s7208_s15 + $0x50] sm:$0xff]  ;;  %v2972_v15 = vadd.f32 %v2940_v2, %v2871_v41  ;;  %v3042_v34 = vmul.f32 %v6640_v38, %v7455_v6  ;;  %v3070_v19 = vadd.f32 %v3038_v47, %v2969_v37  ;;  %v2873_v5 = vmul.f32 %v6631_v53, %v7457_v12  ;;  %v2802_v9 = vld [vmem:[%s7208_s15 + $0x78] sm:$0xff]  ;;  %v7463_v2 = vld [vmem:[#allocation89_spill] sm:$0xff] }
 0x9bf   :  { %4369 = vmatprep.subr.mxu0 %v7446_v55  ;;  %v2971_v10 = vadd.f32 %v2939_v59, %v2870_v49  ;;  %3242 = vperm.xlu1 %4444, %v2797_v25   ;;  %v3071_v32 = vadd.f32 %v3039_v43, %v2970_v50  ;;  %v3142_v18 = vmul.f32 %v6645_v20, %v7458_v29  ;;  %v7461_v37 = vld [vmem:[#allocation59_spill] sm:$0xff]  ;;  %v7465_v0 = vld [vmem:[#allocation120_spill] sm:$0xff]  ;;  %v2816_v45 = vld [vmem:[%s7208_s15 + $0xe8] sm:$0xff] }
 0x9c0   :  { %4370 = vmatpush3.msra.mxu0 %v7446_v55  ;;  %v2973_v56 = vadd.f32 %v2941_v39, %v2872_v51  ;;  %4443 = vset.pattern.permute.xlu0 %v7381_v31  ;;  %v2942_v17 = vmul.f32 %v6635_v63, %v7459_v3  ;;  %v3073_v49 = vadd.f32 %v3041_v46, %v2972_v15  ;;  %v7462_v7 = vld [vmem:[#allocation119_spill] sm:$0xff]  ;;  %v7468_v61 = vld [vmem:[#allocation60_spill] sm:$0xff]  ;;  %v7475_v29 = vld [vmem:[#allocation33_spill] sm:$0xff] }
 0x9c1   :  { %4372 = vmatmul.mubr.f32.vlgmr.msra.gmra.mxu0 %v6717_v27  ;;  %v3141_v27 = vmul.f32 %v6645_v20, %v7456_v48  ;;  %v3072_v47 = vadd.f32 %v3040_v42, %v2971_v10  ;;  %3347 = vperm.xlu0 %4443, %v2818_v44   ;;  %v2874_v59 = vmul.f32 %v6631_v53, %v7460_v57  ;;  %v2795_v10 = vld [vmem:[%s7208_s15 + $0x40] sm:$0xff]  ;;  %v2794_v12 = vld [vmem:[%s7208_s15 + $0x38] sm:$0xff] }
 0x9c2   :  { %4374 = vmatprep.mubr.f32.mxu0 %v6719_v26  ;;  %v2796_v26 = vld [vmem:[%s7208_s15 + $0x48] sm:$0xff]  ;;  %v2943_v23 = vmul.f32 %v6635_v63, %v7461_v37  ;;  %v3167_v55 = vadd.f32 %v3135_v22, %v3066_v14  ;;  %v6873_v31 = vadd.f32 %v3136_v54, %v3067_v36  ;;  %v3074_v50 = vadd.f32 %v3042_v34, %v2973_v56  ;;  %v7470_v58 = vld [vmem:[#allocation32_spill] sm:$0xff]  ;;  %v7471_v34 = vld [vmem:[#allocation31_spill] sm:$0xff] }
 0x9c3   :  { %v3143_v43 = vmul.f32 %v6645_v20, %v7462_v7  ;;  %v6881_v41 = vadd.f32 %v3137_v62, %v3068_v24  ;;  %v2974_v21 = vadd.f32 %v2942_v17, %v2873_v5  ;;  %v3043_v25 = vmul.f32 %v6640_v38, %v7463_v2  ;;  %3237 = vperm.xlu1 %4444, %v2796_v26   ;;  %v7464_v54 = vld [vmem:[#allocation90_spill] sm:$0xff]  ;;  %v7474_v5 = vld [vmem:[#allocation61_spill] sm:$0xff]  ;;  %v7476_v56 = vld [vmem:[#allocation63_spill] sm:$0xff] }
 0x9c4   :  { %v6887_v22 = vadd.f32 %v3139_v60, %v3070_v19  ;;  %v2975_v14 = vadd.f32 %v2943_v23, %v2874_v59  ;;  %v3044_v36 = vmul.f32 %v6640_v38, %v7464_v54  ;;  %v6896_v24 = vadd.f32 %v3141_v27, %v3072_v47  ;;  %v7466_v60 = vld [vmem:[#allocation121_spill] sm:$0xff]  ;;  %v7472_v19 = vld [vmem:[#allocation62_spill] sm:$0xff]  ;;  %v7478_v57 = vld [vmem:[#allocation124_spill] sm:$0xff] }
 0x9c5   :  { %4375 = vmatmul.mubr.f32.gmra.mxu0 %v6727_v40  ;;  %v6885_v40 = vadd.f32 %v3138_v52, %v3069_v28  ;;  %v6898_v62 = vadd.f32 %v3142_v18, %v3073_v49  ;;  %v6902_v52 = vmul.f32 %v6645_v20, %v7465_v0  ;;  %3267 = vperm.xlu0 %4443, %v2802_v9   ;;  %v7477_v17 = vld [vmem:[#allocation94_spill] sm:$0xff]  ;;  %v7481_v9 = vld [vmem:[#allocation64_spill] sm:$0xff] }
 0x9c6   :  { %4377 = vmatprep.mubr.f32.mxu0 %v6754_v4  ;;  %v6894_v4 = vadd.f32 %v3140_v35, %v3071_v32  ;;  %v6905_v28 = vadd.f32 %v3143_v43, %v3074_v50  ;;  %v6909_v42 = vmul.f32 %v6645_v20, %v7466_v60  ;;  %v2875_v46 = vmul.f32 %v6631_v53, %v7467_v16  ;;  %v7479_v37 = vld [vmem:[#allocation34_spill] sm:$0xff]  ;;  %v2815_v50 = vld [vmem:[%s7208_s15 + $0xe0] sm:$0xff] }
 0x9c7   :  { %v2944_v51 = vmul.f32 %v6635_v63, %v7468_v61  ;;  %v6919_v35 = vadd.f32 %v3043_v25, %v2974_v21  ;;  %3232 = vperm.xlu1 %4444, %v2795_v10   ;;  %v2877_v39 = vmul.f32 %v6631_v53, %v7470_v58  ;;  %v6927_v6 = vadd.f32 %v3044_v36, %v2975_v14  ;;  %v7480_v43 = vld [vmem:[#allocation125_spill] sm:$0xff]  ;;  %v7482_v25 = vld [vmem:[#allocation95_spill] sm:$0xff]  ;;  %v7483_v54 = vld [vmem:[#allocation126_spill] sm:$0xff] }
 0x9c8   :  { %v6931_v44 = vmul.f32 %v6631_v53, %v7471_v34  ;;  %v2946_v48 = vmul.f32 %v6635_v63, %v7472_v19  ;;  %v6942_v32 = vmul.f32 %v6635_v63, %v7474_v5  ;;  %v2878_v18 = vmul.f32 %v6631_v53, %v7475_v29  ;;  %v2793_v10 = vld [vmem:[%s7208_s15 + $0x30] sm:$0xff]  ;;  %v7488_v34 = vld [vmem:[#allocation36_spill] sm:$0xff] }
 0x9c9   :  { %4378 = vmatmul.mubr.f32.gmra.mxu0 %v6768_v13  ;;  %v7469_v13 = vld [vmem:[#allocation91_spill] sm:$0xff]  ;;  %3337 = vperm.xlu0 %4443, %v2816_v45   ;;  %v2947_v3 = vmul.f32 %v6635_v63, %v7476_v56  ;;  %v3048_v26 = vmul.f32 %v6640_v38, %v7477_v17  ;;  %v6951_v47 = vadd.f32 %v2944_v51, %v2875_v46  ;;  %v7485_v46 = vld [vmem:[#allocation65_spill] sm:$0xff]  ;;  %v7486_v51 = vld [vmem:[#allocation96_spill] sm:$0xff] }
 0x9ca   :  { %4380 = vmatprep.mubr.f32.mxu0 %v6788_v33  ;;  %v6923_v15 = vmul.f32 %v6640_v38, %v7469_v13  ;;  %v7473_v33 = vld [vmem:[#allocation93_spill] sm:$0xff]  ;;  %v2978_v49 = vadd.f32 %v2946_v48, %v2877_v39  ;;  %v3148_v59 = vmul.f32 %v6645_v20, %v7478_v57  ;;  %v2879_v23 = vmul.f32 %v6631_v53, %v7479_v37  ;;  %v7487_v58 = vld [vmem:[#allocation127_spill] sm:$0xff]  ;;  %v7489_v48 = vld [vmem:[#allocation66_spill] sm:$0xff] }
 0x9cb   :  { %v3047_v27 = vmul.f32 %v6640_v38, %v7473_v33  ;;  %3227 = vperm.xlu1 %4444, %v2794_v12   ;;  %v2979_v7 = vadd.f32 %v2947_v3, %v2878_v18  ;;  %v2948_v21 = vmul.f32 %v6635_v63, %v7481_v9  ;;  %v3049_v14 = vmul.f32 %v6640_v38, %v7482_v25  ;;  %v7490_v18 = vld [vmem:[#allocation97_spill] sm:$0xff]  ;;  %v7491_v3 = vld [vmem:[#allocation128_spill] sm:$0xff]  ;;  %v7493_v37 = vld [vmem:[#allocation67_spill] sm:$0xff] }
 0x9cc   :  { %v3150_v36 = vmul.f32 %v6645_v20, %v7483_v54  ;;  %v2949_v61 = vmul.f32 %v6635_v63, %v7485_v46  ;;  %v3050_v45 = vmul.f32 %v6640_v38, %v7486_v51  ;;  %v3151_v39 = vmul.f32 %v6645_v20, %v7487_v58  ;;  %v7497_v25 = vld [vmem:[#allocation68_spill] sm:$0xff]  ;;  %v2813_v54 = vld [vmem:[%s7208_s15 + $0xd0] sm:$0xff]  ;;  %v7501_v58 = vld [vmem:[#allocation69_spill] sm:$0xff] }
 0x9cd   :  { %4381 = vmatmul.mubr.f32.gmra.mxu0 %v6790_v11  ;;  %v3149_v11 = vmul.f32 %v6645_v20, %v7480_v43  ;;  %v3079_v2 = vadd.f32 %v3047_v27, %v2978_v49  ;;  %v3080_v60 = vadd.f32 %v3048_v26, %v2979_v7  ;;  %v2980_v16 = vadd.f32 %v2948_v21, %v2879_v23  ;;  %v2814_v27 = vld [vmem:[%s7208_s15 + $0xd8] sm:$0xff]  ;;  %v2792_v26 = vld [vmem:[%s7208_s15 + $0x28] sm:$0xff] }
 0x9ce   :  { %4383 = vmatprep.mubr.f32.mxu0 %v6802_v30  ;;  %v7484_v30 = vld [vmem:[#allocation35_spill] sm:$0xff]  ;;  %3332 = vperm.xlu0 %4443, %v2815_v50   ;;  %v2881_v19 = vmul.f32 %v6631_v53, %v7488_v34  ;;  %v2950_v33 = vmul.f32 %v6635_v63, %v7489_v48  ;;  %v3051_v56 = vmul.f32 %v6640_v38, %v7490_v18  ;;  %v7492_v49 = vld [vmem:[#allocation37_spill] sm:$0xff]  ;;  %v7494_v50 = vld [vmem:[#allocation98_spill] sm:$0xff] }
 0x9cf   :  { %v2880_v0 = vmul.f32 %v6631_v53, %v7484_v30  ;;  %v6978_v13 = vadd.f32 %v3148_v59, %v3079_v2  ;;  %v6990_v12 = vadd.f32 %v3149_v11, %v3080_v60  ;;  %3222 = vperm.xlu1 %4444, %v2793_v10   ;;  %v3152_v17 = vmul.f32 %v6645_v20, %v7491_v3  ;;  %v7495_v11 = vld [vmem:[#allocation129_spill] sm:$0xff]  ;;  %v7496_v21 = vld [vmem:[#allocation38_spill] sm:$0xff]  ;;  %v7498_v10 = vld [vmem:[#allocation99_spill] sm:$0xff] }
 0x9d0   :  { %v2982_v29 = vadd.f32 %v2950_v33, %v2881_v19  ;;  %v2882_v57 = vmul.f32 %v6631_v53, %v7492_v49  ;;  %v2951_v23 = vmul.f32 %v6635_v63, %v7493_v37  ;;  %v3052_v7 = vmul.f32 %v6640_v38, %v7494_v50  ;;  %v7500_v51 = vld [vmem:[#allocation39_spill] sm:$0xff]  ;;  %v7502_v34 = vld [vmem:[#allocation100_spill] sm:$0xff]  ;;  %v7508_v50 = vld [vmem:[#allocation41_spill] sm:$0xff] }
 0x9d1   :  { %4384 = vmatmul.mubr.f32.gmra.mxu0 %v3167_v55  ;;  %v3081_v55 = vadd.f32 %v3049_v14, %v2980_v16  ;;  %v2981_v5 = vadd.f32 %v2949_v61, %v2880_v0  ;;  %v3153_v9 = vmul.f32 %v6645_v20, %v7495_v11  ;;  %v2883_v2 = vmul.f32 %v6631_v53, %v7496_v21  ;;  %v7499_v16 = vld [vmem:[#allocation130_spill] sm:$0xff]  ;;  %v2791_v61 = vld [vmem:[%s7208_s15 + $0x20] sm:$0xff]  ;;  %v7503_v48 = vld [vmem:[#allocation131_spill] sm:$0xff] }
 0x9d2   :  { %4386 = vmatprep.mubr.f32.mxu0 %v6873_v31  ;;  %3327 = vperm.xlu0 %4443, %v2814_v27   ;;  %v3083_v43 = vadd.f32 %v3051_v56, %v2982_v29  ;;  %v2952_v14 = vmul.f32 %v6635_v63, %v7497_v25  ;;  %v3053_v30 = vmul.f32 %v6640_v38, %v7498_v10  ;;  %v7505_v29 = vld [vmem:[#allocation70_spill] sm:$0xff]  ;;  %v7506_v56 = vld [vmem:[#allocation101_spill] sm:$0xff] }
 0x9d3   :  { %v7001_v31 = vadd.f32 %v3150_v36, %v3081_v55  ;;  %v3082_v59 = vadd.f32 %v3050_v45, %v2981_v5  ;;  %3217 = vperm.xlu1 %4444, %v2792_v26   ;;  %v3154_v46 = vmul.f32 %v6645_v20, %v7499_v16  ;;  %v3054_v19 = vmul.f32 %v6640_v38, %v7502_v34  ;;  %v7504_v55 = vld [vmem:[#allocation40_spill] sm:$0xff]  ;;  %v7510_v21 = vld [vmem:[#allocation122_spill] sm:$0xff] }
 0x9d4   :  { %v7022_v0 = vadd.f32 %v3152_v17, %v3083_v43  ;;  %v2984_v60 = vadd.f32 %v2952_v14, %v2883_v2  ;;  %v3155_v33 = vmul.f32 %v6645_v20, %v7503_v48  ;;  %v2885_v5 = vmul.f32 %v6631_v53, %v7504_v55  ;;  %v2812_v17 = vld [vmem:[%s7208_s15 + $0xc8] sm:$0xff]  ;;  %v7509_v43 = vld [vmem:[#allocation71_spill] sm:$0xff] }
 0x9d5   :  { %4387 = vmatmul.mubr.f32.gmra.mxu0 %v6881_v41  ;;  %v7018_v36 = vadd.f32 %v3151_v39, %v3082_v59  ;;  %v2983_v41 = vadd.f32 %v2951_v23, %v2882_v57  ;;  %v2953_v39 = vmul.f32 %v6635_v63, %v7501_v58  ;;  %v2954_v18 = vmul.f32 %v6635_v63, %v7505_v29  ;;  %v2790_v23 = vld [vmem:[%s7208_s15 + $0x18] sm:$0xff]  ;;  %v7512_v14 = vld [vmem:[#allocation102_spill] sm:$0xff] }
 0x9d6   :  { %4389 = vmatprep.mubr.f32.mxu0 %v6885_v40  ;;  %v2884_v40 = vmul.f32 %v6631_v53, %v7500_v51  ;;  %3322 = vperm.xlu0 %4443, %v2813_v54   ;;  %v3085_v27 = vadd.f32 %v3053_v30, %v2984_v60  ;;  %v3055_v3 = vmul.f32 %v6640_v38, %v7506_v56  ;;  %v7513_v30 = vld [vmem:[#allocation133_spill] sm:$0xff]  ;;  %v7514_v51 = vld [vmem:[#allocation123_spill] sm:$0xff] }
 0x9d7   :  { %v3084_v45 = vadd.f32 %v3052_v7, %v2983_v41  ;;  %3212 = vperm.xlu1 %4444, %v2791_v61   ;;  %v2986_v37 = vadd.f32 %v2954_v18, %v2885_v5  ;;  %v2886_v7 = vmul.f32 %v6631_v53, %v7508_v50  ;;  %v2955_v11 = vmul.f32 %v6635_v63, %v7509_v43  ;;  %v2811_v60 = vld [vmem:[%s7208_s15 + $0xc0] sm:$0xff]  ;;  %v2806_v58 = vld [vmem:[%s7208_s15 + $0x98] sm:$0xff] }
 0x9d8   :  { %v2985_v49 = vadd.f32 %v2953_v39, %v2884_v40  ;;  %v3186_v59 = vadd.f32 %v3154_v46, %v3085_v27  ;;  %v3056_v54 = vmul.f32 %v6640_v38, %v7512_v14  ;;  %v2977_v41 = vadd.f32 %v6942_v32, %v6931_v44  ;;  %v2789_v46 = vld [vmem:[%s7208_s15 + $0x10] sm:$0xff]  ;;  %v2788_v40 = vld [vmem:[%s7208_s15 + $0x8] sm:$0xff] }
 0x9d9   :  { %4390 = vmatmul.mubr.f32.gmra.mxu0 %v6887_v22  ;;  %v3185_v26 = vadd.f32 %v3153_v9, %v3084_v45  ;;  %v7507_v22 = vld [vmem:[#allocation132_spill] sm:$0xff]  ;;  %v3087_v53 = vadd.f32 %v3055_v3, %v2986_v37  ;;  %v2987_v10 = vadd.f32 %v2955_v11, %v2886_v7  ;;  %v3157_v63 = vmul.f32 %v6645_v20, %v7513_v30 }
 0x9da   :  { %4392 = vmatprep.mubr.f32.mxu0 %v6894_v4  ;;  %v3156_v57 = vmul.f32 %v6645_v20, %v7507_v22  ;;  %v3146_v4 = vmul.f32 %v6645_v20, %v7510_v21  ;;  %v7511_v9 = vld [vmem:[#allocation92_spill] sm:$0xff]  ;;  %v3086_v25 = vadd.f32 %v3054_v19, %v2985_v49  ;;  %3317 = vperm.xlu0 %4443, %v2812_v17  }
 0x9db   :  { %v3046_v2 = vmul.f32 %v6640_v38, %v7511_v9  ;;  %v3176_v16 = vadd.f32 %v6902_v52, %v6919_v35  ;;  %v3077_v38 = vadd.f32 %v6923_v15, %v6951_v47  ;;  %3207 = vperm.xlu1 %4444, %v2790_v23   ;;  %v3088_v32 = vadd.f32 %v3056_v54, %v2987_v10  ;;  %v2810_v15 = vld [vmem:[%s7208_s15 + $0xb8] sm:$0xff]  ;;  %v2807_v45 = vld [vmem:[%s7208_s15 + $0xa0] sm:$0xff] }
 0x9dc   :  { %v3188_v44 = vadd.f32 %v3156_v57, %v3087_v53  ;;  %v3147_v52 = vmul.f32 %v6645_v20, %v7514_v51  ;;  %v2787_v20 = vld [vmem:[%s7208_s15] sm:$0xff] }
 0x9dd   :  { %4393 = vmatmul.mubr.f32.gmra.mxu0 %v6896_v24  ;;  %v3187_v24 = vadd.f32 %v3155_v33, %v3086_v25  ;;  %v3078_v61 = vadd.f32 %v3046_v2, %v2977_v41  ;;  %v3189_v35 = vadd.f32 %v3157_v63, %v3088_v32  ;;  %v3178_v47 = vadd.f32 %v3146_v4, %v3077_v38 }
 0x9de   :  { %4395 = vmatprep.mubr.f32.mxu0 %v6898_v62  ;;  %3312 = vperm.xlu0 %4443, %v2811_v60   ;;  %v3177_v62 = vadd.f32 %v6909_v42, %v6927_v6  ;;  %v2809_v42 = vld [vmem:[%s7208_s15 + $0xb0] sm:$0xff]  ;;  %v2808_v6 = vld [vmem:[%s7208_s15 + $0xa8] sm:$0xff] }
 0x9df   :  { %3202 = vperm.xlu1 %4444, %v2789_v46  }
 0x9e1   :  { %4396 = vmatmul.mubr.f32.gmra.mxu0 %v6905_v28  ;;  %v3179_v28 = vadd.f32 %v3147_v52, %v3078_v61 }
 0x9e2   :  { %4398 = vmatprep.mubr.f32.mxu0 %v3176_v16  ;;  %3307 = vperm.xlu0 %4443, %v2810_v15  }
 0x9e3   :  { %3197 = vperm.xlu1 %4444, %v2788_v40  }
 0x9e5   :  { %4399 = vmatmul.mubr.f32.gmra.mxu0 %v3177_v62 }
 0x9e6   :  { %4401 = vmatprep.mubr.f32.mxu0 %v3178_v47  ;;  %3302 = vperm.xlu0 %4443, %v2809_v42  }
 0x9e7   :  { %3192 = vperm.xlu1 %4444, %v2787_v20  }
 0x9e9   :  { %4402 = vmatmul.mubr.f32.gmra.mxu0 %v3179_v28 }
 0x9ea   :  { %4404 = vmatprep.mubr.f32.mxu0 %v6978_v13  ;;  %3297 = vperm.xlu0 %4443, %v2808_v6   ;;  %v2805_v13 = vld [vmem:[%s7208_s15 + $0x90] sm:$0xff] }
 0x9ed   :  { %4405 = vmatmul.mubr.f32.gmra.mxu0 %v6990_v12  ;;  %v2804_v12 = vld [vmem:[%s7208_s15 + $0x88] sm:$0xff] }
 0x9ee   :  { %4407 = vmatprep.mubr.f32.mxu0 %v7001_v31  ;;  %3292 = vperm.xlu0 %4443, %v2807_v45   ;;  %v2803_v31 = vld [vmem:[%s7208_s15 + $0x80] sm:$0xff]  ;;  %s4484_s15 = smov [#allocation6]  }
 0x9f1   :  { %4408 = vmatmul.mubr.f32.gmra.mxu0 %v7018_v36  ;;  %v3608_v36 = vld [vmem:[#allocation5] sm:$0x1] }
 0x9f2   :  { %4410 = vmatprep.mubr.f32.mxu0 %v7022_v0  ;;  %3287 = vperm.xlu0 %4443, %v2806_v58   ;;  %v7122_v0 = vld [vmem:[%s7209_s16] sm:$0x3]  ;;  %s3709_s16 = sshll.u32 %s4484_s15, 4  ;;  %s3710_s16 = int_to_ptr.vmem [resolvable:$true] %s3709_s16 }
 0x9f3   :  { %7515 = vst [vmem:[#allocation42_spill] sm:$0xff] %v7122_v0  ;;  %v3626_v39 = vrot.slane %v7122_v0, %v6411_v1  ;;  %s4447_s13 = scalar_lea.vmem %s3710_s16, 16  ;;  %s4451_s28 = scalar_lea.vmem %s3710_s16, 32 }
 0x9f4   :  { %p4448_p0 = scmp.ne.s32.totalorder %s3710_s16, %s4447_s13  ;;  %p4452_p1 = scmp.lt.s32.totalorder %s3710_s16, %s3710_s16 }
 0x9f5   :  { %4411 = vmatmul.mubr.f32.gmra.mxu0 %v3185_v26  ;;  %3693 = vmatprep.mubr.f32.mxu1 %v3626_v39  ;;  %p4453_p2 = scmp.lt.s32.totalorder %s4451_s28, %s4447_s13 }
 0x9f6   :  { %4413 = vmatprep.mubr.f32.mxu0 %v3186_v59  ;;  %3282 = vperm.xlu0 %4443, %v2805_v13  }
 0x9f7   :  { %p4454_p3 = por %p4453_p2, %p4452_p1 }
 0x9f9   :  { %4414 = vmatmul.mubr.f32.gmra.mxu0 %v3187_v24  ;;  %p4455_p4 = pnand %p4454_p3, %p4448_p0 }
 0x9fa   :  { %4416 = vmatprep.mubr.f32.mxu0 %v3188_v44  ;;  %3277 = vperm.xlu0 %4443, %v2804_v12  }
 0x9fd   :  { %4417 = vmatmul.mubr.f32.gmra.mxu0 %v3189_v35 }
 0x9fe   :  { %3272 = vperm.xlu0 %4443, %v2803_v31  }
 0xa02   :  { %3611 = vperm.xlu0 %4443, %v3608_v36  }
 0xa26   :  { %v3343_v34 = vpop.permute.xlu1 %3342 }
 0xa2a   :  { %v3263_v27 = vpop.permute.xlu1 %3262 }
 0xa2e   :  { %v3258_v56 = vpop.permute.xlu1 %3257 }
 0xa32   :  { %v3253_v49 = vpop.permute.xlu1 %3252 }
 0xa36   :  { %v3248_v23 = vpop.permute.xlu1 %3247 }
 0xa3a   :  { %v3243_v21 = vpop.permute.xlu1 %3242 }
 0xa3c   :  { %v3348_v19 = vpop.permute.xlu0 %3347 }
 0xa3e   :  { %v3238_v14 = vpop.permute.xlu1 %3237 }
 0xa40   :  { %v3268_v55 = vpop.permute.xlu0 %3267 }
 0xa42   :  { %v3233_v30 = vpop.permute.xlu1 %3232 }
 0xa44   :  { %v3338_v3 = vpop.permute.xlu0 %3337 }
 0xa46   :  { %v3228_v24 = vpop.permute.xlu1 %3227 }
 0xa49   :  { %v3333_v22 = vpop.permute.xlu0 %3332 }
 0xa4a   :  { %v7160_v61 = vpop.permute.xlu1 %3222 }
 0xa4d   :  { %v3328_v50 = vpop.permute.xlu0 %3327 }
 0xa4e   :  { %v7162_v47 = vpop.permute.xlu1 %3217 }
 0xa51   :  { %v3323_v4 = vpop.permute.xlu0 %3322 }
 0xa52   :  { %v7164_v13 = vpop.permute.xlu1 %3212 }
 0xa55   :  { %v3318_v54 = vpop.permute.xlu0 %3317 }
 0xa59   :  { %v3313_v63 = vpop.permute.xlu0 %3312 }
 0xa5d   :  { %v3308_v44 = vpop.permute.xlu0 %3307 }
 0xa61   :  { %v3303_v51 = vpop.permute.xlu0 %3302 }
 0xa65   :  { %v3298_v40 = vpop.permute.xlu0 %3297 }
 0xa69   :  { %v3293_v39 = vpop.permute.xlu0 %3292 }
 0xa81   :  { %v7126_v48 = vpop.f32.mrf.mxu0 }
 0xa82   :  { %7516 = vst [vmem:[#allocation72_spill] sm:$0xff] %v7126_v48 }
 0xa83   :  { %v7128_v33 = vpop.f32.mrf.mxu0 }
 0xa84   :  { %7517 = vst [vmem:[#allocation13_spill] sm:$0xff] %v7128_v33 }
 0xa85   :  { %v7130_v5 = vpop.f32.mrf.mxu0 }
 0xa87   :  { %v7132_v29 = vpop.f32.mrf.mxu0 }
 0xa88   :  { %7518 = vst [vmem:[#allocation43_spill] sm:$0xff] %v7132_v29 }
 0xa89   :  { %v7134_v18 = vpop.f32.mrf.mxu0 }
 0xa8b   :  { %v7136_v17 = vpop.f32.mrf.mxu0 }
 0xa8d   :  { %v7138_v1 = vpop.f32.mrf.mxu0 }
 0xa8f   :  { %v7140_v26 = vpop.f32.mrf.mxu0 }
 0xa91   :  { %v7142_v57 = vpop.f32.mrf.mxu0 }
 0xa93   :  { %v7144_v59 = vpop.f32.mrf.mxu0 }
 0xa95   :  { %v4388_v37 = vpop.f32.mrf.mxu0 }
 0xa97   :  { %v3466_v7 = vpop.f32.mrf.mxu0 }
 0xa99   :  { %v4391_v43 = vpop.f32.mrf.mxu0 }
 0xa9a   :  { %v3482_v0 = vadd.f32 %v4391_v43, %v3258_v56 }
 0xa9b   :  { %v3476_v11 = vpop.f32.mrf.mxu0 }
 0xa9c   :  { %v3477_v48 = vadd.f32 %v3476_v11, %v3253_v49  ;;  %v3462_v49 = vadd.f32 %v7142_v57, %v3238_v14 }
 0xa9d   :  { %v4394_v9 = vpop.f32.mrf.mxu0 }
 0xa9e   :  { %v3492_v42 = vadd.f32 %v4394_v9, %v3268_v55  ;;  %v3208_v9 = vpop.permute.xlu1 %3207  ;;  %v3587_v56 = vmax.f32 %v3477_v48, 0.0  ;;  %v3452_v48 = vadd.f32 %v7138_v1, %v3228_v24  ;;  %v3437_v24 = vadd.f32 %v7136_v17, %v7164_v13 }
 0xa9f   :  { %v3486_v2 = vpop.f32.mrf.mxu0 }
 0xaa0   :  { %v3487_v45 = vadd.f32 %v3486_v2, %v3263_v27  ;;  %v3590_v8 = vmax.f32 %v3492_v42, 0.0  ;;  %v3588_v27 = vmax.f32 %v3482_v0, 0.0  ;;  %v3457_v0 = vadd.f32 %v7144_v59, %v3233_v30 }
 0xaa1   :  { %v7146_v25 = vpop.f32.mrf.mxu0  ;;  %v3582_v1 = vmax.f32 %v3452_v48, 0.0 }
 0xaa2   :  { %7519 = vst [vmem:[#allocation73_spill] sm:$0xff] %v7146_v25  ;;  %v3589_v25 = vmax.f32 %v3487_v45, 0.0  ;;  %v3583_v14 = vmax.f32 %v3457_v0, 0.0 }
 0xaa3   :  { %v7148_v41 = vpop.f32.mrf.mxu0 }
 0xaa4   :  { %7520 = vst [vmem:[#allocation74_spill] sm:$0xff] %v7148_v41 }
 0xaa5   :  { %v7150_v53 = vpop.f32.mrf.mxu0 }
 0xaa7   :  { %v7152_v10 = vpop.f32.mrf.mxu0 }
 0xaa9   :  { %v7154_v60 = vpop.f32.mrf.mxu0 }
 0xaaa   :  { %v3522_v59 = vadd.f32 %v7154_v60, %v3298_v40 }
 0xaab   :  { %v7156_v16 = vpop.f32.mrf.mxu0 }
 0xaad   :  { %v4406_v38 = vpop.f32.mrf.mxu0 }
 0xaaf   :  { %v7158_v32 = vpop.f32.mrf.mxu0 }
 0xab0   :  { %v3527_v57 = vadd.f32 %v7158_v32, %v3303_v51  ;;  %v3596_v32 = vmax.f32 %v3522_v59, 0.0 }
 0xab1   :  { %v4409_v46 = vpop.f32.mrf.mxu0 }
 0xab3   :  { %v3536_v62 = vpop.f32.mrf.mxu0 }
 0xab5   :  { %v4412_v52 = vpop.f32.mrf.mxu0 }
 0xab6   :  { %v3552_v29 = vadd.f32 %v4412_v52, %v3328_v50  ;;  %v3537_v50 = vadd.f32 %v3536_v62, %v3313_v63  ;;  %v3517_v63 = vadd.f32 %v7156_v16, %v3293_v39  ;;  %v7521_v16 = vld [vmem:[#allocation43_spill] sm:$0xff]  ;;  %v3579_v52 = vmax.f32 %v3437_v24, 0.0  ;;  %v7526_v39 = vld [vmem:[#allocation142_spill] sm:$0xff] }
 0xab7   :  { %v3546_v35 = vpop.f32.mrf.mxu0 }
 0xab8   :  { %v3547_v2 = vadd.f32 %v3546_v35, %v3323_v4  ;;  %v3602_v43 = vmax.f32 %v3552_v29, 0.0  ;;  %v7522_v35 = vld [vmem:[#allocation73_spill] sm:$0xff] }
 0xab9   :  { %v4415_v15 = vpop.f32.mrf.mxu0 }
 0xaba   :  { %v3562_v12 = vadd.f32 %v4415_v15, %v3338_v3  ;;  %v3467_v15 = vadd.f32 %v3466_v7, %v3243_v21  ;;  %v3601_v11 = vmax.f32 %v3547_v2, 0.0  ;;  %v3584_v7 = vmax.f32 %v3462_v49, 0.0 }
 0xabb   :  { %v3556_v28 = vpop.f32.mrf.mxu0  ;;  %v3599_v21 = vmax.f32 %v3537_v50, 0.0 }
 0xabc   :  { %v3557_v33 = vadd.f32 %v3556_v28, %v3333_v22  ;;  %v3604_v55 = vmax.f32 %v3562_v12, 0.0  ;;  %v3542_v22 = vadd.f32 %v4409_v46, %v3318_v54  ;;  %v3432_v46 = vadd.f32 %v7130_v5, %v3208_v9  ;;  %v7524_v5 = vld [vmem:[#allocation74_spill] sm:$0xff] }
 0xabd   :  { %v4418_v20 = vpop.f32.mrf.mxu0 }
 0xabe   :  { %v3572_v6 = vadd.f32 %v4418_v20, %v3348_v19  ;;  %v3472_v19 = vadd.f32 %v4388_v37, %v3248_v23  ;;  %v3603_v3 = vmax.f32 %v3557_v33, 0.0  ;;  %v3585_v37 = vmax.f32 %v3467_v15, 0.0  ;;  %v3203_v33 = vpop.permute.xlu1 %3202 }
 0xabf   :  { %v3566_v58 = vpop.f32.mrf.mxu0  ;;  %v3532_v23 = vadd.f32 %v4406_v38, %v3308_v44  ;;  %v3600_v4 = vmax.f32 %v3542_v22, 0.0  ;;  %v3597_v38 = vmax.f32 %v3527_v57, 0.0  ;;  %v3427_v51 = vadd.f32 %v7521_v16, %v3203_v33 }
 0xac0   :  { %v3567_v31 = vadd.f32 %v3566_v58, %v3343_v34  ;;  %v3606_v36 = vmax.f32 %v3572_v6, 0.0  ;;  %v3288_v34 = vpop.permute.xlu0 %3287  ;;  %v3578_v42 = vmax.f32 %v3432_v46, 0.0 }
 0xac1   :  { %v3598_v54 = vmax.f32 %v3532_v23, 0.0  ;;  %v3512_v60 = vadd.f32 %v7150_v53, %v3288_v34  ;;  %v7523_v53 = vld [vmem:[#allocation72_spill] sm:$0xff]  ;;  %v3577_v13 = vmax.f32 %v3427_v51, 0.0 }
 0xac2   :  { %v3605_v41 = vmax.f32 %v3567_v31, 0.0  ;;  %4154 = vmatprep.subr.mxu1 %v3606_v36  ;;  %v3198_v30 = vpop.permute.xlu1 %3197 }
 0xac3   :  { %4155 = vmatpush3.msra.mxu1 %v3590_v8  ;;  %v3586_v8 = vmax.f32 %v3472_v19, 0.0  ;;  %v3594_v40 = vmax.f32 %v3512_v60, 0.0  ;;  %v3422_v28 = vadd.f32 %v7523_v53, %v3198_v30 }
 0xac4   :  { %4156 = vmatprep.subr.mxu1 %v3605_v41  ;;  %v3283_v29 = vpop.permute.xlu0 %3282  ;;  %v3442_v41 = vadd.f32 %v7134_v18, %v7162_v47 }
 0xac5   :  { %4157 = vmatpush3.msra.mxu1 %v3589_v25  ;;  %v3447_v25 = vadd.f32 %v7140_v26, %v7160_v61  ;;  %v3507_v62 = vadd.f32 %v7152_v10, %v3283_v29  ;;  %v3595_v61 = vmax.f32 %v3517_v63, 0.0  ;;  %v7525_v10 = vld [vmem:[#allocation13_spill] sm:$0xff]  ;;  %v3576_v31 = vmax.f32 %v3422_v28, 0.0 }
 0xac6   :  { %4158 = vmatprep.subr.mxu1 %v3604_v55  ;;  %v3580_v18 = vmax.f32 %v3442_v41, 0.0  ;;  %v3193_v17 = vpop.permute.xlu1 %3192  ;;  %v7527_v55 = vld [vmem:[#allocation42_spill] sm:$0xff] }
 0xac7   :  { %4159 = vmatpush3.msra.mxu1 %v3588_v27  ;;  %v3581_v26 = vmax.f32 %v3447_v25, 0.0  ;;  %v3593_v45 = vmax.f32 %v3507_v62, 0.0  ;;  %v3417_v58 = vadd.f32 %v7525_v10, %v3193_v17  ;;  %v3622_v19 = vrot.slane %v7527_v55, %v7526_v39 }
 0xac8   :  { %4160 = vmatprep.subr.mxu1 %v3603_v3  ;;  %v3278_v44 = vpop.permute.xlu0 %3277 }
 0xac9   :  { %4161 = vmatpush3.msra.mxu1 %v3587_v56  ;;  %v3502_v47 = vadd.f32 %v7522_v35, %v3278_v44  ;;  %v3575_v27 = vmax.f32 %v3417_v58, 0.0 }
 0xaca   :  { %4162 = vmatprep.subr.mxu1 %v3602_v43 }
 0xacb   :  { %4163 = vmatpush3.msra.mxu1 %v3586_v8  ;;  %v3592_v12 = vmax.f32 %v3502_v47, 0.0 }
 0xacc   :  { %4164 = vmatprep.subr.mxu1 %v3601_v11  ;;  %v3273_v20 = vpop.permute.xlu0 %3272 }
 0xacd   :  { %4165 = vmatpush3.msra.mxu1 %v3585_v37  ;;  %v3497_v6 = vadd.f32 %v7524_v5, %v3273_v20 }
 0xace   :  { %4166 = vmatprep.subr.mxu1 %v3600_v4 }
 0xacf   :  { %4167 = vmatpush3.msra.mxu1 %v3584_v7  ;;  %v3591_v36 = vmax.f32 %v3497_v6, 0.0 }
 0xad0   :  { %4168 = vmatprep.subr.mxu1 %v3599_v21  ;;  %v3612_v9 = vpop.permute.xlu0 %3611 }
 0xad1   :  { %4169 = vmatpush3.msra.mxu1 %v3583_v14  ;;  %v3617_v34 = vrot.slane %v3612_v9, %v7526_v39 }
 0xad2   :  { %4170 = vmatprep.subr.mxu1 %v3598_v54 }
 0xad3   :  { %4171 = vmatpush3.msra.mxu1 %v3582_v1 }
 0xad4   :  { %4172 = vmatprep.subr.mxu1 %v3597_v38 }
 0xad5   :  { %4173 = vmatpush3.msra.mxu1 %v3581_v26 }
 0xad6   :  { %4174 = vmatprep.subr.mxu1 %v3596_v32 }
 0xad7   :  { %4175 = vmatpush3.msra.mxu1 %v3580_v18 }
 0xad8   :  { %4176 = vmatprep.subr.mxu1 %v3595_v61 }
 0xad9   :  { %4177 = vmatpush3.msra.mxu1 %v3579_v52 }
 0xada   :  { %4178 = vmatprep.subr.mxu1 %v3594_v40 }
 0xadb   :  { %4179 = vmatpush3.msra.mxu1 %v3578_v42 }
 0xadc   :  { %4180 = vmatprep.subr.mxu1 %v3593_v45 }
 0xadd   :  { %4181 = vmatpush3.msra.mxu1 %v3577_v13 }
 0xade   :  { %4182 = vmatprep.subr.mxu1 %v3592_v12 }
 0xadf   :  { %4183 = vmatpush3.msra.mxu1 %v3576_v31 }
 0xae0   :  { %4184 = vmatprep.subr.mxu1 %v3591_v36 }
 0xae1   :  { %4185 = vmatpush3.msra.mxu1 %v3575_v27 }
 0xae2   :  { %3694 = vmatmul.mubr.f32.vlgmr.msra.gmra.mxu1 %v3622_v19 }
 0xba2   :  { %v4186_v2 = vpop.f32.mrf.mxu1 }
 0xba4   :  { %v4187_v3 = vpop.f32.mrf.mxu1 }
 0xba5   :  { %v4188_v15 = vadd.f32 %v4187_v3, %v4186_v2 }
 0xba7   :  { %v3696_v56 = vadd.f32 %v4188_v15, %v3617_v34 }
 0xba9   :  { %4445 = vtanh.f32 %v3696_v56 }
 0xbb6   :  { %v4446_v22 = vpop.eup %4445 }
 0xbb7   :  { %3700 = vst.msk [vmem:[#allocation6] sm:$0x1] %vm2781_vm4, %v4446_v22 }
 0xbb8   :  { %4458 = shalt.err (!%p4455_p4)
}
 0xbb9   :  { %3712 = dma.vmem_to_hbm [thread:$0]  %s3710_s16, 16, %s7212_s19, [#allocation7]  }
 0xbba   :  { %4471 = dma.done.wait [#allocation7], 16  }
 0xbbb   :  { %4472 = vsyncadd [#allocation7], 4294967280 }
 0xbbc   :  { %3718 = vsyncpa [#allocation7], 1 }
 0xbbd   :  { %3719 = vsyncmov [#allocation4] }
 0xbc0   :  { %s3720_s12 = vpop.sfrf %3719 }
 0xbc1   :  { %p3852_p5 = scmp.ne.s32.totalorder %s3720_s12, 0 }
 0xbc3   :  { %3724 = shalt.err (%p3852_p5)  }
 0xbc4   :  { %3726 = vsyncmov [#allocation4 + $0x1] }
 0xbc7   :  { %s3727_s26 = vpop.sfrf %3726 }
 0xbc8   :  { %p3853_p6 = scmp.ne.s32.totalorder %s3727_s26, 0 }
 0xbca   :  { %3731 = shalt.err (%p3853_p6)  }

</bundles_post_ra>
